<compile_context>
chip_gen: v7x
topology: tpu7x:2x2x1
jax: 0.10.0
libtpu: 0.0.40
codegen_flags: <defaults>
</compile_context>

<pallas_src>
import functools
import math

import jax
import jax.numpy as jnp
from jax.experimental import pallas as pl
from jax.experimental.pallas import tpu as pltpu

N_FFT = 640
HOP = 320
N_FREQ = N_FFT // 2 + 1        # 321, hard-coded in StageNet
N_FREQ_PAD = 384               # 321 padded up to a lane multiple (3 * 128)


# ---------------------------------------------------------------------------
# in-kernel helpers
# ---------------------------------------------------------------------------
def _apply_act(y, act):
    if act == "relu":
        return jnp.maximum(y, 0.0)
    if act == "sigmoid":
        return jax.nn.sigmoid(y)
    if act == "tanh":
        return jnp.tanh(y)
    return y


def _causal_depthwise_conv(p, kw, lorder):
    """c[i, d] = sum_{s} kw[lorder-1-s, d] * p[i-s, d]   (zero padding for i-s < 0).

    Matches nn.Conv2d(kernel=[lorder,1], groups=D, bias=False) applied to the
    left-zero-padded projection in UniDeepFsmn.  Implemented with a zero-padded
    copy and static time slices (direction-unambiguous, no masks).
    """
    t, d = p.shape
    pad = jnp.zeros((lorder - 1, d), p.dtype)
    pp = jnp.concatenate([pad, p], axis=0)            # (t + lorder - 1, d)
    c = jnp.zeros_like(p)
    # taps with s >= t can only ever touch padding rows -> statically skipped.
    for s in range(min(lorder, t)):
        start = lorder - 1 - s
        c = c + pp[start:start + t, :] * kw[lorder - 1 - s][None, :]
    return c


def _fsmn_body(h, w1, b1, w2, kw, lorder):
    """UniDeepFsmn: h + p + causal_depthwise_conv(p),  p = project(relu(linear(h))).

    h: (T, D) f32.  w1: (D, H) bf16, b1: (1, H) f32, w2: (H, D) bf16,
    kw: (lorder, D) f32 depthwise taps (kw[lorder-1] multiplies the current frame).
    """
    z = jnp.dot(h.astype(jnp.bfloat16), w1, preferred_element_type=jnp.float32)
    z = jnp.maximum(z + b1, 0.0)
    p = jnp.dot(z.astype(jnp.bfloat16), w2, preferred_element_type=jnp.float32)
    c = _causal_depthwise_conv(p, kw, lorder)
    return h + p + c


# ---------------------------------------------------------------------------
# Pallas kernels (one fused kernel per stage + one STFT-magnitude kernel)
# ---------------------------------------------------------------------------
def _stage1_kernel(x_ref, w_in_ref, b_in_ref, w1s_ref, b1s_ref, w2s_ref, kws_ref,
                   w_out_ref, b_out_ref, o_ref, *, n_layers, lorder, out_act):
    x = x_ref[0]                                                    # (T, indim)
    h = jnp.dot(x.astype(jnp.bfloat16), w_in_ref[...],
                preferred_element_type=jnp.float32)
    h = jnp.maximum(h + b_in_ref[...], 0.0)                         # (T, H)
    for l in range(n_layers):
        h = _fsmn_body(h, w1s_ref[l], b1s_ref[l], w2s_ref[l], kws_ref[l], lorder)
    y = jnp.dot(h.astype(jnp.bfloat16), w_out_ref[...],
                preferred_element_type=jnp.float32) + b_out_ref[...]
    o_ref[0] = _apply_act(y, out_act)                               # (T, 384)


def _stage2_kernel(s1_ref, mag_ref, feat_ref, w_est_ref, w_feat_ref, b_in_ref,
                   w1s_ref, b1s_ref, w2s_ref, kws_ref, w_out_ref, b_out_ref,
                   o_ref, *, n_layers, lorder, out_act):
    # est = stage1_out * |STFT|, and concat([est, feat]) @ W_in is split into
    # est @ W_est + feat @ W_feat so no concat / partial store is ever needed.
    est = s1_ref[0] * mag_ref[0]                                    # (T, 384) f32
    h = jnp.dot(est.astype(jnp.bfloat16), w_est_ref[...],
                preferred_element_type=jnp.float32)
    h = h + jnp.dot(feat_ref[0].astype(jnp.bfloat16), w_feat_ref[...],
                    preferred_element_type=jnp.float32)
    h = jnp.maximum(h + b_in_ref[...], 0.0)                         # (T, H)
    for l in range(n_layers):
        h = _fsmn_body(h, w1s_ref[l], b1s_ref[l], w2s_ref[l], kws_ref[l], lorder)
    y = jnp.dot(h.astype(jnp.bfloat16), w_out_ref[...],
                preferred_element_type=jnp.float32) + b_out_ref[...]
    o_ref[0] = _apply_act(y, out_act)                               # (T, outdim)


def _stft_mag_kernel(mix_ref, dft_lo_ref, dft_hi_ref, o_ref):
    # mix_ref: (1, T+1, HOP) f32.  Frame f = samples [f*HOP, f*HOP + 2*HOP), so the
    # windowed DFT of frame f is mix[f] @ WDFT_lo + mix[f+1] @ WDFT_hi — no framed
    # tensor is ever materialized.  WDFT already contains the hamming window;
    # columns are [cos | -sin], each half lane-padded 321 -> 384 with zeros.
    t = o_ref.shape[1]
    m = mix_ref[0] * (1.0 / 32768.0)                                # (T+1, HOP) f32
    lo = m[:t].astype(jnp.bfloat16)
    hi = m[1:t + 1].astype(jnp.bfloat16)
    y = jnp.dot(lo, dft_lo_ref[...], preferred_element_type=jnp.float32)
    y = y + jnp.dot(hi, dft_hi_ref[...], preferred_element_type=jnp.float32)
    nfp = y.shape[1] // 2
    re = y[:, :nfp]
    im = y[:, nfp:]
    o_ref[0] = jnp.sqrt(re * re + im * im)                          # (T, 384)


# ---------------------------------------------------------------------------
# wrappers
# ---------------------------------------------------------------------------
def _const_spec(arr):
    ndim = arr.ndim
    return pl.BlockSpec(arr.shape, lambda i: (0,) * ndim)


def run_stage1(feat, p, lorder):
    b, t, indim = feat.shape
    nfp = p["w_out"].shape[1]
    n_layers = int(p["w1s"].shape[0])
    kernel = functools.partial(
        _stage1_kernel, n_layers=n_layers, lorder=lorder, out_act=p["out_act"])
    return pl.pallas_call(
        kernel,
        out_shape=jax.ShapeDtypeStruct((b, t, nfp), jnp.float32),
        grid=(b,),
        in_specs=[
            pl.BlockSpec((1, t, indim), lambda i: (i, 0, 0)),
            _const_spec(p["w_in"]), _const_spec(p["b_in"]),
            _const_spec(p["w1s"]), _const_spec(p["b1s"]),
            _const_spec(p["w2s"]), _const_spec(p["kws"]),
            _const_spec(p["w_out"]), _const_spec(p["b_out"]),
        ],
        out_specs=pl.BlockSpec((1, t, nfp), lambda i: (i, 0, 0)),
        compiler_params=pltpu.CompilerParams(
            dimension_semantics=("parallel",)),
    )(feat, p["w_in"], p["b_in"], p["w1s"], p["b1s"], p["w2s"], p["kws"],
      p["w_out"], p["b_out"])


def run_stage2(s1, mag, feat, p, lorder):
    b, t, indim = feat.shape
    outdim = p["w_out"].shape[1]
    nfp = s1.shape[-1]
    n_layers = int(p["w1s"].shape[0])
    kernel = functools.partial(
        _stage2_kernel, n_layers=n_layers, lorder=lorder, out_act=p["out_act"])
    return pl.pallas_call(
        kernel,
        out_shape=jax.ShapeDtypeStruct((b, t, outdim), jnp.float32),
        grid=(b,),
        in_specs=[
            pl.BlockSpec((1, t, nfp), lambda i: (i, 0, 0)),
            pl.BlockSpec((1, t, nfp), lambda i: (i, 0, 0)),
            pl.BlockSpec((1, t, indim), lambda i: (i, 0, 0)),
            _const_spec(p["w_est"]), _const_spec(p["w_feat"]),
            _const_spec(p["b_in"]),
            _const_spec(p["w1s"]), _const_spec(p["b1s"]),
            _const_spec(p["w2s"]), _const_spec(p["kws"]),
            _const_spec(p["w_out"]), _const_spec(p["b_out"]),
        ],
        out_specs=pl.BlockSpec((1, t, outdim), lambda i: (i, 0, 0)),
        compiler_params=pltpu.CompilerParams(
            dimension_semantics=("parallel",)),
    )(s1, mag, feat, p["w_est"], p["w_feat"], p["b_in"], p["w1s"], p["b1s"],
      p["w2s"], p["kws"], p["w_out"], p["b_out"])


def stft_magnitude(mixture, stft_p, n_frames):
    """|STFT(mixture/32768)| (hamming periodic=False, n_fft=640, hop=320,
    center=False), lane-padded to (B, n_frames, 384); pad columns are exactly 0."""
    b = mixture.shape[0]
    need = (n_frames + 1) * HOP
    assert mixture.shape[1] >= need, "mixture too short for requested frame count"
    mix = mixture[:, :need].reshape(b, n_frames + 1, HOP)
    dft_lo, dft_hi = stft_p["dft_lo"], stft_p["dft_hi"]
    nfp = dft_lo.shape[1] // 2
    return pl.pallas_call(
        _stft_mag_kernel,
        out_shape=jax.ShapeDtypeStruct((b, n_frames, nfp), jnp.float32),
        grid=(b,),
        in_specs=[
            pl.BlockSpec((1, n_frames + 1, HOP), lambda i: (i, 0, 0)),
            _const_spec(dft_lo), _const_spec(dft_hi),
        ],
        out_specs=pl.BlockSpec((1, n_frames, nfp), lambda i: (i, 0, 0)),
        compiler_params=pltpu.CompilerParams(
            dimension_semantics=("parallel",)),
    )(mix, dft_lo, dft_hi)


# ---------------------------------------------------------------------------
# Parameters (deterministic synthetic init — no checkpoint loading)
# ---------------------------------------------------------------------------
def _uniform(key, shape, fan_in, dtype=jnp.float32):
    bound = 1.0 / math.sqrt(fan_in)
    return jax.random.uniform(key, shape, jnp.float32, -bound, bound).astype(dtype)


def _fsmn_stack_params(key, n_layers, dim, lorder):
    k1, k2, k3, k4 = jax.random.split(key, 4)
    return dict(
        w1s=_uniform(k1, (n_layers, dim, dim), dim, jnp.bfloat16),
        b1s=_uniform(k2, (n_layers, 1, dim), dim),
        w2s=_uniform(k3, (n_layers, dim, dim), dim, jnp.bfloat16),  # project (no bias)
        kws=_uniform(k4, (n_layers, lorder, dim), lorder),          # depthwise taps
    )


def make_stft_consts():
    """Hamming-window-folded [cos | -sin] DFT matrix halves, padded 321->384, bf16."""
    n = jnp.arange(N_FFT, dtype=jnp.float32)[:, None]
    k = jnp.arange(N_FREQ, dtype=jnp.float32)[None, :]
    ang = 2.0 * jnp.pi * n * k / N_FFT
    win = 0.54 - 0.46 * jnp.cos(2.0 * jnp.pi * n / (N_FFT - 1))     # periodic=False
    cos_m = win * jnp.cos(ang)                                      # (640, 321)
    sin_m = -(win * jnp.sin(ang))
    pad = jnp.zeros((N_FFT, N_FREQ_PAD - N_FREQ), jnp.float32)
    full = jnp.concatenate([cos_m, pad, sin_m, pad], axis=1).astype(jnp.bfloat16)
    return {"dft_lo": full[:HOP], "dft_hi": full[HOP:]}


def init_params(key, indim, outdim, layers, layers2, hidden_dim, lorder, crm=False):
    ks = iter(jax.random.split(key, 12))
    stage1 = dict(
        w_in=_uniform(next(ks), (indim, hidden_dim), indim, jnp.bfloat16),
        b_in=_uniform(next(ks), (1, hidden_dim), indim),
        **_fsmn_stack_params(next(ks), layers, hidden_dim, lorder),
        w_out=jnp.pad(_uniform(next(ks), (hidden_dim, N_FREQ), hidden_dim),
                      ((0, 0), (0, N_FREQ_PAD - N_FREQ))).astype(jnp.bfloat16),
        b_out=jnp.pad(_uniform(next(ks), (1, N_FREQ), hidden_dim),
                      ((0, 0), (0, N_FREQ_PAD - N_FREQ))),
        out_act="sigmoid",
    )
    fan2 = N_FREQ + indim
    stage2 = dict(
        w_est=jnp.pad(_uniform(next(ks), (N_FREQ, hidden_dim), fan2),
                      ((0, N_FREQ_PAD - N_FREQ), (0, 0))).astype(jnp.bfloat16),
        w_feat=_uniform(next(ks), (indim, hidden_dim), fan2, jnp.bfloat16),
        b_in=_uniform(next(ks), (1, hidden_dim), fan2),
        **_fsmn_stack_params(next(ks), layers2, hidden_dim, lorder),
        w_out=_uniform(next(ks), (hidden_dim, outdim), hidden_dim, jnp.bfloat16),
        b_out=_uniform(next(ks), (1, outdim), hidden_dim),
        out_act="tanh" if crm else "sigmoid",
    )
    return {"stage1": stage1, "stage2": stage2, "stft": make_stft_consts()}


# ---------------------------------------------------------------------------
# Forward
# ---------------------------------------------------------------------------
def stagenet_forward(params, feat, mixture, lorder, ctl=None):
    _, t, _ = feat.shape
    s1 = run_stage1(feat, params["stage1"], lorder)       # (B, T, 384) lane-padded
    if ctl == "off":
        return s1[..., :N_FREQ]
    mag = stft_magnitude(mixture, params["stft"], t)      # (B, T, 384), pad cols = 0
    return run_stage2(s1, mag, feat, params["stage2"], lorder)


# ---------------------------------------------------------------------------
# Pure-jnp reference (mirrors the kernels, incl. bf16 operand casts)
# ---------------------------------------------------------------------------
def _bt_dot(x, w):
    return jnp.einsum("btd,de->bte", x.astype(jnp.bfloat16), w,
                      preferred_element_type=jnp.float32)


def _ref_fsmn(h, w1, b1, w2, kw, lorder):
    z = jnp.maximum(_bt_dot(h, w1) + b1, 0.0)
    p = _bt_dot(z, w2)
    b, t, d = p.shape
    pad = jnp.zeros((b, lorder - 1, d), p.dtype)
    pp = jnp.concatenate([pad, p], axis=1)
    c = jnp.zeros_like(p)
    for s in range(min(lorder, t)):
        start = lorder - 1 - s
        c = c + pp[:, start:start + t, :] * kw[lorder - 1 - s][None, None, :]
    return h + p + c


def stagenet_reference(params, feat, mixture, lorder):
    p1 = params["stage1"]
    h = jnp.maximum(_bt_dot(feat, p1["w_in"]) + p1["b_in"], 0.0)
    for l in range(p1["w1s"].shape[0]):
        h = _ref_fsmn(h, p1["w1s"][l], p1["b1s"][l], p1["w2s"][l], p1["kws"][l], lorder)
    s1 = jax.nn.sigmoid(_bt_dot(h, p1["w_out"]) + p1["b_out"])

    st = params["stft"]
    b, t, _ = feat.shape
    mix = (mixture[:, :(t + 1) * HOP] * (1.0 / 32768.0)).reshape(b, t + 1, HOP)
    y = _bt_dot(mix[:, :t], st["dft_lo"]) + _bt_dot(mix[:, 1:], st["dft_hi"])
    nfp = y.shape[-1] // 2
    mag = jnp.sqrt(y[..., :nfp] ** 2 + y[..., nfp:] ** 2)

    p2 = params["stage2"]
    est = s1 * mag
    h = jnp.maximum(_bt_dot(est, p2["w_est"]) + _bt_dot(feat, p2["w_feat"])
                    + p2["b_in"], 0.0)
    for l in range(p2["w1s"].shape[0]):
        h = _ref_fsmn(h, p2["w1s"][l], p2["b1s"][l], p2["w2s"][l], p2["kws"][l], lorder)
    y = _bt_dot(h, p2["w_out"]) + p2["b_out"]
    return _apply_act(y, p2["out_act"])


# ---------------------------------------------------------------------------
if __name__ == "__main__":
    B, T = 2, 16
    INDIM, OUTDIM, HIDDEN = 64, 64, 64
    LAYERS, LAYERS2, LORDER = 2, 2, 20
    MIX_LEN = N_FFT + (T - 1) * HOP   # exactly T STFT frames with center=False

    key = jax.random.PRNGKey(0)
    kp, kf, km = jax.random.split(key, 3)
    params = init_params(kp, INDIM, OUTDIM, LAYERS, LAYERS2, HIDDEN, LORDER)
    feat = jax.random.normal(kf, (B, T, INDIM), jnp.float32)
    mixture = jax.random.uniform(km, (B, MIX_LEN), jnp.float32, -32768.0, 32768.0)

    fwd = jax.jit(lambda f, m: stagenet_forward(params, f, m, LORDER))
    out = fwd(feat, mixture)
    jax.block_until_ready(out)
    assert out.shape == (B, T, OUTDIM) and out.dtype == jnp.float32

    # correctness: compare against the pure-jnp mirror (same bf16 operand casts)
    ref = stagenet_reference(params, feat, mixture, LORDER)
    max_diff = float(jnp.max(jnp.abs(out - ref)))
    assert max_diff < 2e-2, f"mismatch vs jnp reference: {max_diff}"
    print("KERNEL_OK")
</pallas_src>

<mosaic_0001>
module attributes {stable_mosaic.version = 11 : i64} {
  func.func @_stft_mag_kernel(%arg0: i32, %arg1: memref<1x17x320xf32, #tpu.memory_space<vmem>>, %arg2: memref<320x768xbf16, #tpu.memory_space<vmem>>, %arg3: memref<320x768xbf16, #tpu.memory_space<vmem>>, %arg4: memref<1x16x384xf32, #tpu.memory_space<vmem>>) attributes {dimension_semantics = [#tpu.dimension_semantics<parallel>], iteration_bounds = array<i64: 2>, scalar_prefetch = 0 : i64, scratch_operands = 0 : i64, tpu.core_type = #tpu.core_type<tc>, window_params = [{transform_indices = @transform_0, window_bounds = array<i64: 1, 17, 320>}, {pipeline_mode = #tpu.pipeline_mode<synchronous>, transform_indices = @transform_1, window_bounds = array<i64: 320, 768>}, {pipeline_mode = #tpu.pipeline_mode<synchronous>, transform_indices = @transform_2, window_bounds = array<i64: 320, 768>}, {transform_indices = @transform_3, window_bounds = array<i64: 1, 16, 384>}]} {
    %c0 = arith.constant 0 : index
    %c0_0 = arith.constant 0 : index
    %c0_1 = arith.constant 0 : index
    %0 = vector.load %arg1[%c0, %c0_0, %c0_1] : memref<1x17x320xf32, #tpu.memory_space<vmem>>, vector<1x17x320xf32>
    %1 = vector.shape_cast %0 : vector<1x17x320xf32> to vector<17x320xf32>
    %cst = arith.constant 3.05175781E-5 : f32
    %2 = vector.broadcast %cst : f32 to vector<17x320xf32>
    %3 = arith.mulf %1, %2 : vector<17x320xf32>
    %4 = vector.extract_strided_slice %3 {offsets = [0, 0], sizes = [16, 320], strides = [1, 1]} : vector<17x320xf32> to vector<16x320xf32>
    %5 = arith.truncf %4 : vector<16x320xf32> to vector<16x320xbf16>
    %6 = vector.extract_strided_slice %3 {offsets = [1, 0], sizes = [16, 320], strides = [1, 1]} : vector<17x320xf32> to vector<16x320xf32>
    %7 = arith.truncf %6 : vector<16x320xf32> to vector<16x320xbf16>
    %c0_2 = arith.constant 0 : index
    %c0_3 = arith.constant 0 : index
    %8 = vector.load %arg2[%c0_2, %c0_3] : memref<320x768xbf16, #tpu.memory_space<vmem>>, vector<320x768xbf16>
    %cst_4 = arith.constant dense<0.000000e+00> : vector<16x768xf32>
    %9 = tpu.matmul %5, %8, %cst_4 {dimension_numbers = #tpu.dot_dimension_numbers<[1], [0], [0], [1], [0, 0, 1, 1], [], []>} : vector<16x320xbf16>, vector<320x768xbf16>, vector<16x768xf32> -> vector<16x768xf32>
    %c0_5 = arith.constant 0 : index
    %c0_6 = arith.constant 0 : index
    %10 = vector.load %arg3[%c0_5, %c0_6] : memref<320x768xbf16, #tpu.memory_space<vmem>>, vector<320x768xbf16>
    %cst_7 = arith.constant dense<0.000000e+00> : vector<16x768xf32>
    %11 = tpu.matmul %7, %10, %cst_7 {dimension_numbers = #tpu.dot_dimension_numbers<[1], [0], [0], [1], [0, 0, 1, 1], [], []>} : vector<16x320xbf16>, vector<320x768xbf16>, vector<16x768xf32> -> vector<16x768xf32>
    %12 = arith.addf %9, %11 : vector<16x768xf32>
    %13 = vector.extract_strided_slice %12 {offsets = [0, 0], sizes = [16, 384], strides = [1, 1]} : vector<16x768xf32> to vector<16x384xf32>
    %14 = vector.extract_strided_slice %12 {offsets = [0, 384], sizes = [16, 384], strides = [1, 1]} : vector<16x768xf32> to vector<16x384xf32>
    %15 = arith.mulf %13, %13 : vector<16x384xf32>
    %16 = arith.mulf %14, %14 : vector<16x384xf32>
    %17 = arith.addf %15, %16 : vector<16x384xf32>
    %18 = math.sqrt %17 : vector<16x384xf32>
    %c0_8 = arith.constant 0 : index
    %c0_9 = arith.constant 0 : index
    %c0_10 = arith.constant 0 : index
    %19 = vector.load %arg4[%c0_8, %c0_9, %c0_10] : memref<1x16x384xf32, #tpu.memory_space<vmem>>, vector<1x16x384xf32>
    %20 = vector.shape_cast %19 : vector<1x16x384xf32> to vector<16x384xf32>
    %21 = vector.shape_cast %18 : vector<16x384xf32> to vector<1x16x384xf32>
    tpu.vector_store %arg4[%c0_8, %c0_9, %c0_10], %21 {strides = array<i32>} : memref<1x16x384xf32, #tpu.memory_space<vmem>>, vector<1x16x384xf32>,
    return
  }
  func.func @transform_0(%arg0: i32) -> (i32, i32, i32) {
    %c0_i32 = arith.constant 0 : i32
    %c0_i32_0 = arith.constant 0 : i32
    %c0_i32_1 = arith.constant 0 : i32
    return %arg0, %c0_i32, %c0_i32_0 : i32, i32, i32
  }
  func.func @transform_1(%arg0: i32) -> (i32, i32) {
    %c0_i32 = arith.constant 0 : i32
    %c0_i32_0 = arith.constant 0 : i32
    %c0_i32_1 = arith.constant 0 : i32
    return %c0_i32, %c0_i32_0 : i32, i32
  }
  func.func @transform_2(%arg0: i32) -> (i32, i32) {
    %c0_i32 = arith.constant 0 : i32
    %c0_i32_0 = arith.constant 0 : i32
    %c0_i32_1 = arith.constant 0 : i32
    return %c0_i32, %c0_i32_0 : i32, i32
  }
  func.func @transform_3(%arg0: i32) -> (i32, i32, i32) {
    %c0_i32 = arith.constant 0 : i32
    %c0_i32_0 = arith.constant 0 : i32
    %c0_i32_1 = arith.constant 0 : i32
    return %arg0, %c0_i32, %c0_i32_0 : i32, i32, i32
  }
}

module attributes {stable_mosaic.version = 11 : i64} {
  func.func @_stage2_kernel(%arg0: i32, %arg1: memref<1x16x384xf32, #tpu.memory_space<vmem>>, %arg2: memref<1x16x384xf32, #tpu.memory_space<vmem>>, %arg3: memref<1x16x64xf32, #tpu.memory_space<vmem>>, %arg4: memref<384x64xbf16, #tpu.memory_space<vmem>>, %arg5: memref<64x64xbf16, #tpu.memory_space<vmem>>, %arg6: memref<1x64xf32, #tpu.memory_space<vmem>>, %arg7: memref<2x64x64xbf16, #tpu.memory_space<vmem>>, %arg8: memref<2x1x64xf32, #tpu.memory_space<vmem>>, %arg9: memref<2x64x64xbf16, #tpu.memory_space<vmem>>, %arg10: memref<2x20x64xf32, #tpu.memory_space<vmem>>, %arg11: memref<64x64xbf16, #tpu.memory_space<vmem>>, %arg12: memref<1x64xf32, #tpu.memory_space<vmem>>, %arg13: memref<1x16x64xf32, #tpu.memory_space<vmem>>) attributes {dimension_semantics = [#tpu.dimension_semantics<parallel>], iteration_bounds = array<i64: 2>, scalar_prefetch = 0 : i64, scratch_operands = 0 : i64, tpu.core_type = #tpu.core_type<tc>, window_params = [{transform_indices = @transform_0, window_bounds = array<i64: 1, 16, 384>}, {transform_indices = @transform_1, window_bounds = array<i64: 1, 16, 384>}, {transform_indices = @transform_2, window_bounds = array<i64: 1, 16, 64>}, {pipeline_mode = #tpu.pipeline_mode<synchronous>, transform_indices = @transform_3, window_bounds = array<i64: 384, 64>}, {pipeline_mode = #tpu.pipeline_mode<synchronous>, transform_indices = @transform_4, window_bounds = array<i64: 64, 64>}, {pipeline_mode = #tpu.pipeline_mode<synchronous>, transform_indices = @transform_5, window_bounds = array<i64: 1, 64>}, {pipeline_mode = #tpu.pipeline_mode<synchronous>, transform_indices = @transform_6, window_bounds = array<i64: 2, 64, 64>}, {pipeline_mode = #tpu.pipeline_mode<synchronous>, transform_indices = @transform_7, window_bounds = array<i64: 2, 1, 64>}, {pipeline_mode = #tpu.pipeline_mode<synchronous>, transform_indices = @transform_8, window_bounds = array<i64: 2, 64, 64>}, {pipeline_mode = #tpu.pipeline_mode<synchronous>, transform_indices = @transform_9, window_bounds = array<i64: 2, 20, 64>}, {pipeline_mode = #tpu.pipeline_mode<synchronous>, transform_indices = @transform_10, window_bounds = array<i64: 64, 64>}, {pipeline_mode = #tpu.pipeline_mode<synchronous>, transform_indices = @transform_11, window_bounds = array<i64: 1, 64>}, {transform_indices = @transform_12, window_bounds = array<i64: 1, 16, 64>}]} {
    %c0 = arith.constant 0 : index
    %c0_0 = arith.constant 0 : index
    %c0_1 = arith.constant 0 : index
    %0 = vector.load %arg1[%c0, %c0_0, %c0_1] : memref<1x16x384xf32, #tpu.memory_space<vmem>>, vector<1x16x384xf32>
    %1 = vector.shape_cast %0 : vector<1x16x384xf32> to vector<16x384xf32>
    %c0_2 = arith.constant 0 : index
    %c0_3 = arith.constant 0 : index
    %c0_4 = arith.constant 0 : index
    %2 = vector.load %arg2[%c0_2, %c0_3, %c0_4] : memref<1x16x384xf32, #tpu.memory_space<vmem>>, vector<1x16x384xf32>
    %3 = vector.shape_cast %2 : vector<1x16x384xf32> to vector<16x384xf32>
    %4 = arith.mulf %1, %3 : vector<16x384xf32>
    %5 = arith.truncf %4 : vector<16x384xf32> to vector<16x384xbf16>
    %c0_5 = arith.constant 0 : index
    %c0_6 = arith.constant 0 : index
    %6 = vector.load %arg4[%c0_5, %c0_6] : memref<384x64xbf16, #tpu.memory_space<vmem>>, vector<384x64xbf16>
    %cst = arith.constant dense<0.000000e+00> : vector<16x64xf32>
    %7 = tpu.matmul %5, %6, %cst {dimension_numbers = #tpu.dot_dimension_numbers<[1], [0], [0], [1], [0, 0, 1, 1], [], []>} : vector<16x384xbf16>, vector<384x64xbf16>, vector<16x64xf32> -> vector<16x64xf32>
    %c0_7 = arith.constant 0 : index
    %c0_8 = arith.constant 0 : index
    %c0_9 = arith.constant 0 : index
    %8 = vector.load %arg3[%c0_7, %c0_8, %c0_9] : memref<1x16x64xf32, #tpu.memory_space<vmem>>, vector<1x16x64xf32>
    %9 = vector.shape_cast %8 : vector<1x16x64xf32> to vector<16x64xf32>
    %10 = arith.truncf %9 : vector<16x64xf32> to vector<16x64xbf16>
    %c0_10 = arith.constant 0 : index
    %c0_11 = arith.constant 0 : index
    %11 = vector.load %arg5[%c0_10, %c0_11] : memref<64x64xbf16, #tpu.memory_space<vmem>>, vector<64x64xbf16>
    %cst_12 = arith.constant dense<0.000000e+00> : vector<16x64xf32>
    %12 = tpu.matmul %10, %11, %cst_12 {dimension_numbers = #tpu.dot_dimension_numbers<[1], [0], [0], [1], [0, 0, 1, 1], [], []>} : vector<16x64xbf16>, vector<64x64xbf16>, vector<16x64xf32> -> vector<16x64xf32>
    %13 = arith.addf %7, %12 : vector<16x64xf32>
    %c0_13 = arith.constant 0 : index
    %c0_14 = arith.constant 0 : index
    %14 = vector.load %arg6[%c0_13, %c0_14] : memref<1x64xf32, #tpu.memory_space<vmem>>, vector<1x64xf32>
    %15 = vector.broadcast %14 : vector<1x64xf32> to vector<16x64xf32>
    %16 = arith.addf %13, %15 : vector<16x64xf32>
    %cst_15 = arith.constant 0.000000e+00 : f32
    %17 = vector.broadcast %cst_15 : f32 to vector<16x64xf32>
    %18 = arith.maximumf %16, %17 : vector<16x64xf32>
    %c0_16 = arith.constant 0 : index
    %c0_17 = arith.constant 0 : index
    %c0_18 = arith.constant 0 : index
    %19 = vector.load %arg7[%c0_16, %c0_17, %c0_18] : memref<2x64x64xbf16, #tpu.memory_space<vmem>>, vector<1x64x64xbf16>
    %20 = vector.shape_cast %19 : vector<1x64x64xbf16> to vector<64x64xbf16>
    %c0_19 = arith.constant 0 : index
    %c0_20 = arith.constant 0 : index
    %c0_21 = arith.constant 0 : index
    %21 = vector.load %arg8[%c0_19, %c0_20, %c0_21] : memref<2x1x64xf32, #tpu.memory_space<vmem>>, vector<1x1x64xf32>
    %22 = vector.shape_cast %21 : vector<1x1x64xf32> to vector<1x64xf32>
    %c0_22 = arith.constant 0 : index
    %c0_23 = arith.constant 0 : index
    %c0_24 = arith.constant 0 : index
    %23 = vector.load %arg9[%c0_22, %c0_23, %c0_24] : memref<2x64x64xbf16, #tpu.memory_space<vmem>>, vector<1x64x64xbf16>
    %24 = vector.shape_cast %23 : vector<1x64x64xbf16> to vector<64x64xbf16>
    %c0_25 = arith.constant 0 : index
    %c0_26 = arith.constant 0 : index
    %c0_27 = arith.constant 0 : index
    %25 = vector.load %arg10[%c0_25, %c0_26, %c0_27] : memref<2x20x64xf32, #tpu.memory_space<vmem>>, vector<1x20x64xf32>
    %26 = vector.shape_cast %25 : vector<1x20x64xf32> to vector<20x64xf32>
    %27 = arith.truncf %18 : vector<16x64xf32> to vector<16x64xbf16>
    %cst_28 = arith.constant dense<0.000000e+00> : vector<16x64xf32>
    %28 = tpu.matmul %27, %20, %cst_28 {dimension_numbers = #tpu.dot_dimension_numbers<[1], [0], [0], [1], [0, 0, 1, 1], [], []>} : vector<16x64xbf16>, vector<64x64xbf16>, vector<16x64xf32> -> vector<16x64xf32>
    %29 = vector.broadcast %22 : vector<1x64xf32> to vector<16x64xf32>
    %30 = arith.addf %28, %29 : vector<16x64xf32>
    %cst_29 = arith.constant 0.000000e+00 : f32
    %31 = vector.broadcast %cst_29 : f32 to vector<16x64xf32>
    %32 = arith.maximumf %30, %31 : vector<16x64xf32>
    %33 = arith.truncf %32 : vector<16x64xf32> to vector<16x64xbf16>
    %cst_30 = arith.constant dense<0.000000e+00> : vector<16x64xf32>
    %34 = tpu.matmul %33, %24, %cst_30 {dimension_numbers = #tpu.dot_dimension_numbers<[1], [0], [0], [1], [0, 0, 1, 1], [], []>} : vector<16x64xbf16>, vector<64x64xbf16>, vector<16x64xf32> -> vector<16x64xf32>
    %cst_31 = arith.constant 0.000000e+00 : f32
    %35 = vector.broadcast %cst_31 : f32 to vector<19x64xf32>
    %36 = tpu.concatenate %35, %34 in 0 : vector<19x64xf32>, vector<16x64xf32> -> vector<35x64xf32>
    %cst_32 = arith.constant 0.000000e+00 : f32
    %37 = vector.broadcast %cst_32 : f32 to vector<16x64xf32>
    %38 = vector.extract_strided_slice %36 {offsets = [19, 0], sizes = [16, 64], strides = [1, 1]} : vector<35x64xf32> to vector<16x64xf32>
    %39 = vector.extract_strided_slice %26 {offsets = [19, 0], sizes = [1, 64], strides = [1, 1]} : vector<20x64xf32> to vector<1x64xf32>
    %40 = vector.shape_cast %39 : vector<1x64xf32> to vector<64xf32>
    %41 = vector.shape_cast %40 : vector<64xf32> to vector<1x64xf32>
    %42 = vector.broadcast %41 : vector<1x64xf32> to vector<16x64xf32>
    %43 = arith.mulf %38, %42 : vector<16x64xf32>
    %44 = arith.addf %37, %43 : vector<16x64xf32>
    %45 = vector.extract_strided_slice %36 {offsets = [18, 0], sizes = [16, 64], strides = [1, 1]} : vector<35x64xf32> to vector<16x64xf32>
    %46 = vector.extract_strided_slice %26 {offsets = [18, 0], sizes = [1, 64], strides = [1, 1]} : vector<20x64xf32> to vector<1x64xf32>
    %47 = vector.shape_cast %46 : vector<1x64xf32> to vector<64xf32>
    %48 = vector.shape_cast %47 : vector<64xf32> to vector<1x64xf32>
    %49 = vector.broadcast %48 : vector<1x64xf32> to vector<16x64xf32>
    %50 = arith.mulf %45, %49 : vector<16x64xf32>
    %51 = arith.addf %44, %50 : vector<16x64xf32>
    %52 = vector.extract_strided_slice %36 {offsets = [17, 0], sizes = [16, 64], strides = [1, 1]} : vector<35x64xf32> to vector<16x64xf32>
    %53 = vector.extract_strided_slice %26 {offsets = [17, 0], sizes = [1, 64], strides = [1, 1]} : vector<20x64xf32> to vector<1x64xf32>
    %54 = vector.shape_cast %53 : vector<1x64xf32> to vector<64xf32>
    %55 = vector.shape_cast %54 : vector<64xf32> to vector<1x64xf32>
    %56 = vector.broadcast %55 : vector<1x64xf32> to vector<16x64xf32>
    %57 = arith.mulf %52, %56 : vector<16x64xf32>
    %58 = arith.addf %51, %57 : vector<16x64xf32>
    %59 = vector.extract_strided_slice %36 {offsets = [16, 0], sizes = [16, 64], strides = [1, 1]} : vector<35x64xf32> to vector<16x64xf32>
    %60 = vector.extract_strided_slice %26 {offsets = [16, 0], sizes = [1, 64], strides = [1, 1]} : vector<20x64xf32> to vector<1x64xf32>
    %61 = vector.shape_cast %60 : vector<1x64xf32> to vector<64xf32>
    %62 = vector.shape_cast %61 : vector<64xf32> to vector<1x64xf32>
    %63 = vector.broadcast %62 : vector<1x64xf32> to vector<16x64xf32>
    %64 = arith.mulf %59, %63 : vector<16x64xf32>
    %65 = arith.addf %58, %64 : vector<16x64xf32>
    %66 = vector.extract_strided_slice %36 {offsets = [15, 0], sizes = [16, 64], strides = [1, 1]} : vector<35x64xf32> to vector<16x64xf32>
    %67 = vector.extract_strided_slice %26 {offsets = [15, 0], sizes = [1, 64], strides = [1, 1]} : vector<20x64xf32> to vector<1x64xf32>
    %68 = vector.shape_cast %67 : vector<1x64xf32> to vector<64xf32>
    %69 = vector.shape_cast %68 : vector<64xf32> to vector<1x64xf32>
    %70 = vector.broadcast %69 : vector<1x64xf32> to vector<16x64xf32>
    %71 = arith.mulf %66, %70 : vector<16x64xf32>
    %72 = arith.addf %65, %71 : vector<16x64xf32>
    %73 = vector.extract_strided_slice %36 {offsets = [14, 0], sizes = [16, 64], strides = [1, 1]} : vector<35x64xf32> to vector<16x64xf32>
    %74 = vector.extract_strided_slice %26 {offsets = [14, 0], sizes = [1, 64], strides = [1, 1]} : vector<20x64xf32> to vector<1x64xf32>
    %75 = vector.shape_cast %74 : vector<1x64xf32> to vector<64xf32>
    %76 = vector.shape_cast %75 : vector<64xf32> to vector<1x64xf32>
    %77 = vector.broadcast %76 : vector<1x64xf32> to vector<16x64xf32>
    %78 = arith.mulf %73, %77 : vector<16x64xf32>
    %79 = arith.addf %72, %78 : vector<16x64xf32>
    %80 = vector.extract_strided_slice %36 {offsets = [13, 0], sizes = [16, 64], strides = [1, 1]} : vector<35x64xf32> to vector<16x64xf32>
    %81 = vector.extract_strided_slice %26 {offsets = [13, 0], sizes = [1, 64], strides = [1, 1]} : vector<20x64xf32> to vector<1x64xf32>
    %82 = vector.shape_cast %81 : vector<1x64xf32> to vector<64xf32>
    %83 = vector.shape_cast %82 : vector<64xf32> to vector<1x64xf32>
    %84 = vector.broadcast %83 : vector<1x64xf32> to vector<16x64xf32>
    %85 = arith.mulf %80, %84 : vector<16x64xf32>
    %86 = arith.addf %79, %85 : vector<16x64xf32>
    %87 = vector.extract_strided_slice %36 {offsets = [12, 0], sizes = [16, 64], strides = [1, 1]} : vector<35x64xf32> to vector<16x64xf32>
    %88 = vector.extract_strided_slice %26 {offsets = [12, 0], sizes = [1, 64], strides = [1, 1]} : vector<20x64xf32> to vector<1x64xf32>
    %89 = vector.shape_cast %88 : vector<1x64xf32> to vector<64xf32>
    %90 = vector.shape_cast %89 : vector<64xf32> to vector<1x64xf32>
    %91 = vector.broadcast %90 : vector<1x64xf32> to vector<16x64xf32>
    %92 = arith.mulf %87, %91 : vector<16x64xf32>
    %93 = arith.addf %86, %92 : vector<16x64xf32>
    %94 = vector.extract_strided_slice %36 {offsets = [11, 0], sizes = [16, 64], strides = [1, 1]} : vector<35x64xf32> to vector<16x64xf32>
    %95 = vector.extract_strided_slice %26 {offsets = [11, 0], sizes = [1, 64], strides = [1, 1]} : vector<20x64xf32> to vector<1x64xf32>
    %96 = vector.shape_cast %95 : vector<1x64xf32> to vector<64xf32>
    %97 = vector.shape_cast %96 : vector<64xf32> to vector<1x64xf32>
    %98 = vector.broadcast %97 : vector<1x64xf32> to vector<16x64xf32>
    %99 = arith.mulf %94, %98 : vector<16x64xf32>
    %100 = arith.addf %93, %99 : vector<16x64xf32>
    %101 = vector.extract_strided_slice %36 {offsets = [10, 0], sizes = [16, 64], strides = [1, 1]} : vector<35x64xf32> to vector<16x64xf32>
    %102 = vector.extract_strided_slice %26 {offsets = [10, 0], sizes = [1, 64], strides = [1, 1]} : vector<20x64xf32> to vector<1x64xf32>
    %103 = vector.shape_cast %102 : vector<1x64xf32> to vector<64xf32>
    %104 = vector.shape_cast %103 : vector<64xf32> to vector<1x64xf32>
    %105 = vector.broadcast %104 : vector<1x64xf32> to vector<16x64xf32>
    %106 = arith.mulf %101, %105 : vector<16x64xf32>
    %107 = arith.addf %100, %106 : vector<16x64xf32>
    %108 = vector.extract_strided_slice %36 {offsets = [9, 0], sizes = [16, 64], strides = [1, 1]} : vector<35x64xf32> to vector<16x64xf32>
    %109 = vector.extract_strided_slice %26 {offsets = [9, 0], sizes = [1, 64], strides = [1, 1]} : vector<20x64xf32> to vector<1x64xf32>
    %110 = vector.shape_cast %109 : vector<1x64xf32> to vector<64xf32>
    %111 = vector.shape_cast %110 : vector<64xf32> to vector<1x64xf32>
    %112 = vector.broadcast %111 : vector<1x64xf32> to vector<16x64xf32>
    %113 = arith.mulf %108, %112 : vector<16x64xf32>
    %114 = arith.addf %107, %113 : vector<16x64xf32>
    %115 = vector.extract_strided_slice %36 {offsets = [8, 0], sizes = [16, 64], strides = [1, 1]} : vector<35x64xf32> to vector<16x64xf32>
    %116 = vector.extract_strided_slice %26 {offsets = [8, 0], sizes = [1, 64], strides = [1, 1]} : vector<20x64xf32> to vector<1x64xf32>
    %117 = vector.shape_cast %116 : vector<1x64xf32> to vector<64xf32>
    %118 = vector.shape_cast %117 : vector<64xf32> to vector<1x64xf32>
    %119 = vector.broadcast %118 : vector<1x64xf32> to vector<16x64xf32>
    %120 = arith.mulf %115, %119 : vector<16x64xf32>
    %121 = arith.addf %114, %120 : vector<16x64xf32>
    %122 = vector.extract_strided_slice %36 {offsets = [7, 0], sizes = [16, 64], strides = [1, 1]} : vector<35x64xf32> to vector<16x64xf32>
    %123 = vector.extract_strided_slice %26 {offsets = [7, 0], sizes = [1, 64], strides = [1, 1]} : vector<20x64xf32> to vector<1x64xf32>
    %124 = vector.shape_cast %123 : vector<1x64xf32> to vector<64xf32>
    %125 = vector.shape_cast %124 : vector<64xf32> to vector<1x64xf32>
    %126 = vector.broadcast %125 : vector<1x64xf32> to vector<16x64xf32>
    %127 = arith.mulf %122, %126 : vector<16x64xf32>
    %128 = arith.addf %121, %127 : vector<16x64xf32>
    %129 = vector.extract_strided_slice %36 {offsets = [6, 0], sizes = [16, 64], strides = [1, 1]} : vector<35x64xf32> to vector<16x64xf32>
    %130 = vector.extract_strided_slice %26 {offsets = [6, 0], sizes = [1, 64], strides = [1, 1]} : vector<20x64xf32> to vector<1x64xf32>
    %131 = vector.shape_cast %130 : vector<1x64xf32> to vector<64xf32>
    %132 = vector.shape_cast %131 : vector<64xf32> to vector<1x64xf32>
    %133 = vector.broadcast %132 : vector<1x64xf32> to vector<16x64xf32>
    %134 = arith.mulf %129, %133 : vector<16x64xf32>
    %135 = arith.addf %128, %134 : vector<16x64xf32>
    %136 = vector.extract_strided_slice %36 {offsets = [5, 0], sizes = [16, 64], strides = [1, 1]} : vector<35x64xf32> to vector<16x64xf32>
    %137 = vector.extract_strided_slice %26 {offsets = [5, 0], sizes = [1, 64], strides = [1, 1]} : vector<20x64xf32> to vector<1x64xf32>
    %138 = vector.shape_cast %137 : vector<1x64xf32> to vector<64xf32>
    %139 = vector.shape_cast %138 : vector<64xf32> to vector<1x64xf32>
    %140 = vector.broadcast %139 : vector<1x64xf32> to vector<16x64xf32>
    %141 = arith.mulf %136, %140 : vector<16x64xf32>
    %142 = arith.addf %135, %141 : vector<16x64xf32>
    %143 = vector.extract_strided_slice %36 {offsets = [4, 0], sizes = [16, 64], strides = [1, 1]} : vector<35x64xf32> to vector<16x64xf32>
    %144 = vector.extract_strided_slice %26 {offsets = [4, 0], sizes = [1, 64], strides = [1, 1]} : vector<20x64xf32> to vector<1x64xf32>
    %145 = vector.shape_cast %144 : vector<1x64xf32> to vector<64xf32>
    %146 = vector.shape_cast %145 : vector<64xf32> to vector<1x64xf32>
    %147 = vector.broadcast %146 : vector<1x64xf32> to vector<16x64xf32>
    %148 = arith.mulf %143, %147 : vector<16x64xf32>
    %149 = arith.addf %142, %148 : vector<16x64xf32>
    %150 = arith.addf %18, %34 : vector<16x64xf32>
    %151 = arith.addf %150, %149 : vector<16x64xf32>
    %c1 = arith.constant 1 : index
    %c0_33 = arith.constant 0 : index
    %c0_34 = arith.constant 0 : index
    %152 = vector.load %arg7[%c1, %c0_33, %c0_34] : memref<2x64x64xbf16, #tpu.memory_space<vmem>>, vector<1x64x64xbf16>
    %153 = vector.shape_cast %152 : vector<1x64x64xbf16> to vector<64x64xbf16>
    %c1_35 = arith.constant 1 : index
    %c0_36 = arith.constant 0 : index
    %c0_37 = arith.constant 0 : index
    %154 = vector.load %arg8[%c1_35, %c0_36, %c0_37] : memref<2x1x64xf32, #tpu.memory_space<vmem>>, vector<1x1x64xf32>
    %155 = vector.shape_cast %154 : vector<1x1x64xf32> to vector<1x64xf32>
    %c1_38 = arith.constant 1 : index
    %c0_39 = arith.constant 0 : index
    %c0_40 = arith.constant 0 : index
    %156 = vector.load %arg9[%c1_38, %c0_39, %c0_40] : memref<2x64x64xbf16, #tpu.memory_space<vmem>>, vector<1x64x64xbf16>
    %157 = vector.shape_cast %156 : vector<1x64x64xbf16> to vector<64x64xbf16>
    %c1_41 = arith.constant 1 : index
    %c0_42 = arith.constant 0 : index
    %c0_43 = arith.constant 0 : index
    %158 = vector.load %arg10[%c1_41, %c0_42, %c0_43] : memref<2x20x64xf32, #tpu.memory_space<vmem>>, vector<1x20x64xf32>
    %159 = vector.shape_cast %158 : vector<1x20x64xf32> to vector<20x64xf32>
    %160 = arith.truncf %151 : vector<16x64xf32> to vector<16x64xbf16>
    %cst_44 = arith.constant dense<0.000000e+00> : vector<16x64xf32>
    %161 = tpu.matmul %160, %153, %cst_44 {dimension_numbers = #tpu.dot_dimension_numbers<[1], [0], [0], [1], [0, 0, 1, 1], [], []>} : vector<16x64xbf16>, vector<64x64xbf16>, vector<16x64xf32> -> vector<16x64xf32>
    %162 = vector.broadcast %155 : vector<1x64xf32> to vector<16x64xf32>
    %163 = arith.addf %161, %162 : vector<16x64xf32>
    %cst_45 = arith.constant 0.000000e+00 : f32
    %164 = vector.broadcast %cst_45 : f32 to vector<16x64xf32>
    %165 = arith.maximumf %163, %164 : vector<16x64xf32>
    %166 = arith.truncf %165 : vector<16x64xf32> to vector<16x64xbf16>
    %cst_46 = arith.constant dense<0.000000e+00> : vector<16x64xf32>
    %167 = tpu.matmul %166, %157, %cst_46 {dimension_numbers = #tpu.dot_dimension_numbers<[1], [0], [0], [1], [0, 0, 1, 1], [], []>} : vector<16x64xbf16>, vector<64x64xbf16>, vector<16x64xf32> -> vector<16x64xf32>
    %cst_47 = arith.constant 0.000000e+00 : f32
    %168 = vector.broadcast %cst_47 : f32 to vector<19x64xf32>
    %169 = tpu.concatenate %168, %167 in 0 : vector<19x64xf32>, vector<16x64xf32> -> vector<35x64xf32>
    %cst_48 = arith.constant 0.000000e+00 : f32
    %170 = vector.broadcast %cst_48 : f32 to vector<16x64xf32>
    %171 = vector.extract_strided_slice %169 {offsets = [19, 0], sizes = [16, 64], strides = [1, 1]} : vector<35x64xf32> to vector<16x64xf32>
    %172 = vector.extract_strided_slice %159 {offsets = [19, 0], sizes = [1, 64], strides = [1, 1]} : vector<20x64xf32> to vector<1x64xf32>
    %173 = vector.shape_cast %172 : vector<1x64xf32> to vector<64xf32>
    %174 = vector.shape_cast %173 : vector<64xf32> to vector<1x64xf32>
    %175 = vector.broadcast %174 : vector<1x64xf32> to vector<16x64xf32>
    %176 = arith.mulf %171, %175 : vector<16x64xf32>
    %177 = arith.addf %170, %176 : vector<16x64xf32>
    %178 = vector.extract_strided_slice %169 {offsets = [18, 0], sizes = [16, 64], strides = [1, 1]} : vector<35x64xf32> to vector<16x64xf32>
    %179 = vector.extract_strided_slice %159 {offsets = [18, 0], sizes = [1, 64], strides = [1, 1]} : vector<20x64xf32> to vector<1x64xf32>
    %180 = vector.shape_cast %179 : vector<1x64xf32> to vector<64xf32>
    %181 = vector.shape_cast %180 : vector<64xf32> to vector<1x64xf32>
    %182 = vector.broadcast %181 : vector<1x64xf32> to vector<16x64xf32>
    %183 = arith.mulf %178, %182 : vector<16x64xf32>
    %184 = arith.addf %177, %183 : vector<16x64xf32>
    %185 = vector.extract_strided_slice %169 {offsets = [17, 0], sizes = [16, 64], strides = [1, 1]} : vector<35x64xf32> to vector<16x64xf32>
    %186 = vector.extract_strided_slice %159 {offsets = [17, 0], sizes = [1, 64], strides = [1, 1]} : vector<20x64xf32> to vector<1x64xf32>
    %187 = vector.shape_cast %186 : vector<1x64xf32> to vector<64xf32>
    %188 = vector.shape_cast %187 : vector<64xf32> to vector<1x64xf32>
    %189 = vector.broadcast %188 : vector<1x64xf32> to vector<16x64xf32>
    %190 = arith.mulf %185, %189 : vector<16x64xf32>
    %191 = arith.addf %184, %190 : vector<16x64xf32>
    %192 = vector.extract_strided_slice %169 {offsets = [16, 0], sizes = [16, 64], strides = [1, 1]} : vector<35x64xf32> to vector<16x64xf32>
    %193 = vector.extract_strided_slice %159 {offsets = [16, 0], sizes = [1, 64], strides = [1, 1]} : vector<20x64xf32> to vector<1x64xf32>
    %194 = vector.shape_cast %193 : vector<1x64xf32> to vector<64xf32>
    %195 = vector.shape_cast %194 : vector<64xf32> to vector<1x64xf32>
    %196 = vector.broadcast %195 : vector<1x64xf32> to vector<16x64xf32>
    %197 = arith.mulf %192, %196 : vector<16x64xf32>
    %198 = arith.addf %191, %197 : vector<16x64xf32>
    %199 = vector.extract_strided_slice %169 {offsets = [15, 0], sizes = [16, 64], strides = [1, 1]} : vector<35x64xf32> to vector<16x64xf32>
    %200 = vector.extract_strided_slice %159 {offsets = [15, 0], sizes = [1, 64], strides = [1, 1]} : vector<20x64xf32> to vector<1x64xf32>
    %201 = vector.shape_cast %200 : vector<1x64xf32> to vector<64xf32>
    %202 = vector.shape_cast %201 : vector<64xf32> to vector<1x64xf32>
    %203 = vector.broadcast %202 : vector<1x64xf32> to vector<16x64xf32>
    %204 = arith.mulf %199, %203 : vector<16x64xf32>
    %205 = arith.addf %198, %204 : vector<16x64xf32>
    %206 = vector.extract_strided_slice %169 {offsets = [14, 0], sizes = [16, 64], strides = [1, 1]} : vector<35x64xf32> to vector<16x64xf32>
    %207 = vector.extract_strided_slice %159 {offsets = [14, 0], sizes = [1, 64], strides = [1, 1]} : vector<20x64xf32> to vector<1x64xf32>
    %208 = vector.shape_cast %207 : vector<1x64xf32> to vector<64xf32>
    %209 = vector.shape_cast %208 : vector<64xf32> to vector<1x64xf32>
    %210 = vector.broadcast %209 : vector<1x64xf32> to vector<16x64xf32>
    %211 = arith.mulf %206, %210 : vector<16x64xf32>
    %212 = arith.addf %205, %211 : vector<16x64xf32>
    %213 = vector.extract_strided_slice %169 {offsets = [13, 0], sizes = [16, 64], strides = [1, 1]} : vector<35x64xf32> to vector<16x64xf32>
    %214 = vector.extract_strided_slice %159 {offsets = [13, 0], sizes = [1, 64], strides = [1, 1]} : vector<20x64xf32> to vector<1x64xf32>
    %215 = vector.shape_cast %214 : vector<1x64xf32> to vector<64xf32>
    %216 = vector.shape_cast %215 : vector<64xf32> to vector<1x64xf32>
    %217 = vector.broadcast %216 : vector<1x64xf32> to vector<16x64xf32>
    %218 = arith.mulf %213, %217 : vector<16x64xf32>
    %219 = arith.addf %212, %218 : vector<16x64xf32>
    %220 = vector.extract_strided_slice %169 {offsets = [12, 0], sizes = [16, 64], strides = [1, 1]} : vector<35x64xf32> to vector<16x64xf32>
    %221 = vector.extract_strided_slice %159 {offsets = [12, 0], sizes = [1, 64], strides = [1, 1]} : vector<20x64xf32> to vector<1x64xf32>
    %222 = vector.shape_cast %221 : vector<1x64xf32> to vector<64xf32>
    %223 = vector.shape_cast %222 : vector<64xf32> to vector<1x64xf32>
    %224 = vector.broadcast %223 : vector<1x64xf32> to vector<16x64xf32>
    %225 = arith.mulf %220, %224 : vector<16x64xf32>
    %226 = arith.addf %219, %225 : vector<16x64xf32>
    %227 = vector.extract_strided_slice %169 {offsets = [11, 0], sizes = [16, 64], strides = [1, 1]} : vector<35x64xf32> to vector<16x64xf32>
    %228 = vector.extract_strided_slice %159 {offsets = [11, 0], sizes = [1, 64], strides = [1, 1]} : vector<20x64xf32> to vector<1x64xf32>
    %229 = vector.shape_cast %228 : vector<1x64xf32> to vector<64xf32>
    %230 = vector.shape_cast %229 : vector<64xf32> to vector<1x64xf32>
    %231 = vector.broadcast %230 : vector<1x64xf32> to vector<16x64xf32>
    %232 = arith.mulf %227, %231 : vector<16x64xf32>
    %233 = arith.addf %226, %232 : vector<16x64xf32>
    %234 = vector.extract_strided_slice %169 {offsets = [10, 0], sizes = [16, 64], strides = [1, 1]} : vector<35x64xf32> to vector<16x64xf32>
    %235 = vector.extract_strided_slice %159 {offsets = [10, 0], sizes = [1, 64], strides = [1, 1]} : vector<20x64xf32> to vector<1x64xf32>
    %236 = vector.shape_cast %235 : vector<1x64xf32> to vector<64xf32>
    %237 = vector.shape_cast %236 : vector<64xf32> to vector<1x64xf32>
    %238 = vector.broadcast %237 : vector<1x64xf32> to vector<16x64xf32>
    %239 = arith.mulf %234, %238 : vector<16x64xf32>
    %240 = arith.addf %233, %239 : vector<16x64xf32>
    %241 = vector.extract_strided_slice %169 {offsets = [9, 0], sizes = [16, 64], strides = [1, 1]} : vector<35x64xf32> to vector<16x64xf32>
    %242 = vector.extract_strided_slice %159 {offsets = [9, 0], sizes = [1, 64], strides = [1, 1]} : vector<20x64xf32> to vector<1x64xf32>
    %243 = vector.shape_cast %242 : vector<1x64xf32> to vector<64xf32>
    %244 = vector.shape_cast %243 : vector<64xf32> to vector<1x64xf32>
    %245 = vector.broadcast %244 : vector<1x64xf32> to vector<16x64xf32>
    %246 = arith.mulf %241, %245 : vector<16x64xf32>
    %247 = arith.addf %240, %246 : vector<16x64xf32>
    %248 = vector.extract_strided_slice %169 {offsets = [8, 0], sizes = [16, 64], strides = [1, 1]} : vector<35x64xf32> to vector<16x64xf32>
    %249 = vector.extract_strided_slice %159 {offsets = [8, 0], sizes = [1, 64], strides = [1, 1]} : vector<20x64xf32> to vector<1x64xf32>
    %250 = vector.shape_cast %249 : vector<1x64xf32> to vector<64xf32>
    %251 = vector.shape_cast %250 : vector<64xf32> to vector<1x64xf32>
    %252 = vector.broadcast %251 : vector<1x64xf32> to vector<16x64xf32>
    %253 = arith.mulf %248, %252 : vector<16x64xf32>
    %254 = arith.addf %247, %253 : vector<16x64xf32>
    %255 = vector.extract_strided_slice %169 {offsets = [7, 0], sizes = [16, 64], strides = [1, 1]} : vector<35x64xf32> to vector<16x64xf32>
    %256 = vector.extract_strided_slice %159 {offsets = [7, 0], sizes = [1, 64], strides = [1, 1]} : vector<20x64xf32> to vector<1x64xf32>
    %257 = vector.shape_cast %256 : vector<1x64xf32> to vector<64xf32>
    %258 = vector.shape_cast %257 : vector<64xf32> to vector<1x64xf32>
    %259 = vector.broadcast %258 : vector<1x64xf32> to vector<16x64xf32>
    %260 = arith.mulf %255, %259 : vector<16x64xf32>
    %261 = arith.addf %254, %260 : vector<16x64xf32>
    %262 = vector.extract_strided_slice %169 {offsets = [6, 0], sizes = [16, 64], strides = [1, 1]} : vector<35x64xf32> to vector<16x64xf32>
    %263 = vector.extract_strided_slice %159 {offsets = [6, 0], sizes = [1, 64], strides = [1, 1]} : vector<20x64xf32> to vector<1x64xf32>
    %264 = vector.shape_cast %263 : vector<1x64xf32> to vector<64xf32>
    %265 = vector.shape_cast %264 : vector<64xf32> to vector<1x64xf32>
    %266 = vector.broadcast %265 : vector<1x64xf32> to vector<16x64xf32>
    %267 = arith.mulf %262, %266 : vector<16x64xf32>
    %268 = arith.addf %261, %267 : vector<16x64xf32>
    %269 = vector.extract_strided_slice %169 {offsets = [5, 0], sizes = [16, 64], strides = [1, 1]} : vector<35x64xf32> to vector<16x64xf32>
    %270 = vector.extract_strided_slice %159 {offsets = [5, 0], sizes = [1, 64], strides = [1, 1]} : vector<20x64xf32> to vector<1x64xf32>
    %271 = vector.shape_cast %270 : vector<1x64xf32> to vector<64xf32>
    %272 = vector.shape_cast %271 : vector<64xf32> to vector<1x64xf32>
    %273 = vector.broadcast %272 : vector<1x64xf32> to vector<16x64xf32>
    %274 = arith.mulf %269, %273 : vector<16x64xf32>
    %275 = arith.addf %268, %274 : vector<16x64xf32>
    %276 = vector.extract_strided_slice %169 {offsets = [4, 0], sizes = [16, 64], strides = [1, 1]} : vector<35x64xf32> to vector<16x64xf32>
    %277 = vector.extract_strided_slice %159 {offsets = [4, 0], sizes = [1, 64], strides = [1, 1]} : vector<20x64xf32> to vector<1x64xf32>
    %278 = vector.shape_cast %277 : vector<1x64xf32> to vector<64xf32>
    %279 = vector.shape_cast %278 : vector<64xf32> to vector<1x64xf32>
    %280 = vector.broadcast %279 : vector<1x64xf32> to vector<16x64xf32>
    %281 = arith.mulf %276, %280 : vector<16x64xf32>
    %282 = arith.addf %275, %281 : vector<16x64xf32>
    %283 = arith.addf %151, %167 : vector<16x64xf32>
    %284 = arith.addf %283, %282 : vector<16x64xf32>
    %285 = arith.truncf %284 : vector<16x64xf32> to vector<16x64xbf16>
    %c0_49 = arith.constant 0 : index
    %c0_50 = arith.constant 0 : index
    %286 = vector.load %arg11[%c0_49, %c0_50] : memref<64x64xbf16, #tpu.memory_space<vmem>>, vector<64x64xbf16>
    %cst_51 = arith.constant dense<0.000000e+00> : vector<16x64xf32>
    %287 = tpu.matmul %285, %286, %cst_51 {dimension_numbers = #tpu.dot_dimension_numbers<[1], [0], [0], [1], [0, 0, 1, 1], [], []>} : vector<16x64xbf16>, vector<64x64xbf16>, vector<16x64xf32> -> vector<16x64xf32>
    %c0_52 = arith.constant 0 : index
    %c0_53 = arith.constant 0 : index
    %288 = vector.load %arg12[%c0_52, %c0_53] : memref<1x64xf32, #tpu.memory_space<vmem>>, vector<1x64xf32>
    %289 = vector.broadcast %288 : vector<1x64xf32> to vector<16x64xf32>
    %290 = arith.addf %287, %289 : vector<16x64xf32>
    %291 = arith.negf %290 : vector<16x64xf32>
    %292 = math.exp %291 : vector<16x64xf32>
    %cst_54 = arith.constant 1.000000e+00 : f32
    %293 = vector.broadcast %cst_54 : f32 to vector<16x64xf32>
    %294 = arith.addf %293, %292 : vector<16x64xf32>
    %295 = arith.divf %293, %294 : vector<16x64xf32>
    %c0_55 = arith.constant 0 : index
    %c0_56 = arith.constant 0 : index
    %c0_57 = arith.constant 0 : index
    %296 = vector.load %arg13[%c0_55, %c0_56, %c0_57] : memref<1x16x64xf32, #tpu.memory_space<vmem>>, vector<1x16x64xf32>
    %297 = vector.shape_cast %296 : vector<1x16x64xf32> to vector<16x64xf32>
    %298 = vector.shape_cast %295 : vector<16x64xf32> to vector<1x16x64xf32>
    tpu.vector_store %arg13[%c0_55, %c0_56, %c0_57], %298 {strides = array<i32>} : memref<1x16x64xf32, #tpu.memory_space<vmem>>, vector<1x16x64xf32>,
    return
  }
  func.func @transform_0(%arg0: i32) -> (i32, i32, i32) {
    %c0_i32 = arith.constant 0 : i32
    %c0_i32_0 = arith.constant 0 : i32
    %c0_i32_1 = arith.constant 0 : i32
    return %arg0, %c0_i32, %c0_i32_0 : i32, i32, i32
  }
  func.func @transform_1(%arg0: i32) -> (i32, i32, i32) {
    %c0_i32 = arith.constant 0 : i32
    %c0_i32_0 = arith.constant 0 : i32
    %c0_i32_1 = arith.constant 0 : i32
    return %arg0, %c0_i32, %c0_i32_0 : i32, i32, i32
  }
  func.func @transform_2(%arg0: i32) -> (i32, i32, i32) {
    %c0_i32 = arith.constant 0 : i32
    %c0_i32_0 = arith.constant 0 : i32
    %c0_i32_1 = arith.constant 0 : i32
    return %arg0, %c0_i32, %c0_i32_0 : i32, i32, i32
  }
  func.func @transform_3(%arg0: i32) -> (i32, i32) {
    %c0_i32 = arith.constant 0 : i32
    %c0_i32_0 = arith.constant 0 : i32
    %c0_i32_1 = arith.constant 0 : i32
    return %c0_i32, %c0_i32_0 : i32, i32
  }
  func.func @transform_4(%arg0: i32) -> (i32, i32) {
    %c0_i32 = arith.constant 0 : i32
    %c0_i32_0 = arith.constant 0 : i32
    %c0_i32_1 = arith.constant 0 : i32
    return %c0_i32, %c0_i32_0 : i32, i32
  }
  func.func @transform_5(%arg0: i32) -> (i32, i32) {
    %c0_i32 = arith.constant 0 : i32
    %c0_i32_0 = arith.constant 0 : i32
    %c0_i32_1 = arith.constant 0 : i32
    return %c0_i32, %c0_i32_0 : i32, i32
  }
  func.func @transform_6(%arg0: i32) -> (i32, i32, i32) {
    %c0_i32 = arith.constant 0 : i32
    %c0_i32_0 = arith.constant 0 : i32
    %c0_i32_1 = arith.constant 0 : i32
    %c0_i32_2 = arith.constant 0 : i32
    return %c0_i32, %c0_i32_0, %c0_i32_1 : i32, i32, i32
  }
  func.func @transform_7(%arg0: i32) -> (i32, i32, i32) {
    %c0_i32 = arith.constant 0 : i32
    %c0_i32_0 = arith.constant 0 : i32
    %c0_i32_1 = arith.constant 0 : i32
    %c0_i32_2 = arith.constant 0 : i32
    return %c0_i32, %c0_i32_0, %c0_i32_1 : i32, i32, i32
  }
  func.func @transform_8(%arg0: i32) -> (i32, i32, i32) {
    %c0_i32 = arith.constant 0 : i32
    %c0_i32_0 = arith.constant 0 : i32
    %c0_i32_1 = arith.constant 0 : i32
    %c0_i32_2 = arith.constant 0 : i32
    return %c0_i32, %c0_i32_0, %c0_i32_1 : i32, i32, i32
  }
  func.func @transform_9(%arg0: i32) -> (i32, i32, i32) {
    %c0_i32 = arith.constant 0 : i32
    %c0_i32_0 = arith.constant 0 : i32
    %c0_i32_1 = arith.constant 0 : i32
    %c0_i32_2 = arith.constant 0 : i32
    return %c0_i32, %c0_i32_0, %c0_i32_1 : i32, i32, i32
  }
  func.func @transform_10(%arg0: i32) -> (i32, i32) {
    %c0_i32 = arith.constant 0 : i32
    %c0_i32_0 = arith.constant 0 : i32
    %c0_i32_1 = arith.constant 0 : i32
    return %c0_i32, %c0_i32_0 : i32, i32
  }
  func.func @transform_11(%arg0: i32) -> (i32, i32) {
    %c0_i32 = arith.constant 0 : i32
    %c0_i32_0 = arith.constant 0 : i32
    %c0_i32_1 = arith.constant 0 : i32
    return %c0_i32, %c0_i32_0 : i32, i32
  }
  func.func @transform_12(%arg0: i32) -> (i32, i32, i32) {
    %c0_i32 = arith.constant 0 : i32
    %c0_i32_0 = arith.constant 0 : i32
    %c0_i32_1 = arith.constant 0 : i32
    return %arg0, %c0_i32, %c0_i32_0 : i32, i32, i32
  }
}

module attributes {stable_mosaic.version = 11 : i64} {
  func.func @_stage1_kernel(%arg0: i32, %arg1: memref<1x16x64xf32, #tpu.memory_space<vmem>>, %arg2: memref<64x64xbf16, #tpu.memory_space<vmem>>, %arg3: memref<1x64xf32, #tpu.memory_space<vmem>>, %arg4: memref<2x64x64xbf16, #tpu.memory_space<vmem>>, %arg5: memref<2x1x64xf32, #tpu.memory_space<vmem>>, %arg6: memref<2x64x64xbf16, #tpu.memory_space<vmem>>, %arg7: memref<2x20x64xf32, #tpu.memory_space<vmem>>, %arg8: memref<64x384xbf16, #tpu.memory_space<vmem>>, %arg9: memref<1x384xf32, #tpu.memory_space<vmem>>, %arg10: memref<1x16x384xf32, #tpu.memory_space<vmem>>) attributes {dimension_semantics = [#tpu.dimension_semantics<parallel>], iteration_bounds = array<i64: 2>, scalar_prefetch = 0 : i64, scratch_operands = 0 : i64, tpu.core_type = #tpu.core_type<tc>, window_params = [{transform_indices = @transform_0, window_bounds = array<i64: 1, 16, 64>}, {pipeline_mode = #tpu.pipeline_mode<synchronous>, transform_indices = @transform_1, window_bounds = array<i64: 64, 64>}, {pipeline_mode = #tpu.pipeline_mode<synchronous>, transform_indices = @transform_2, window_bounds = array<i64: 1, 64>}, {pipeline_mode = #tpu.pipeline_mode<synchronous>, transform_indices = @transform_3, window_bounds = array<i64: 2, 64, 64>}, {pipeline_mode = #tpu.pipeline_mode<synchronous>, transform_indices = @transform_4, window_bounds = array<i64: 2, 1, 64>}, {pipeline_mode = #tpu.pipeline_mode<synchronous>, transform_indices = @transform_5, window_bounds = array<i64: 2, 64, 64>}, {pipeline_mode = #tpu.pipeline_mode<synchronous>, transform_indices = @transform_6, window_bounds = array<i64: 2, 20, 64>}, {pipeline_mode = #tpu.pipeline_mode<synchronous>, transform_indices = @transform_7, window_bounds = array<i64: 64, 384>}, {pipeline_mode = #tpu.pipeline_mode<synchronous>, transform_indices = @transform_8, window_bounds = array<i64: 1, 384>}, {transform_indices = @transform_9, window_bounds = array<i64: 1, 16, 384>}]} {
    %c0 = arith.constant 0 : index
    %c0_0 = arith.constant 0 : index
    %c0_1 = arith.constant 0 : index
    %0 = vector.load %arg1[%c0, %c0_0, %c0_1] : memref<1x16x64xf32, #tpu.memory_space<vmem>>, vector<1x16x64xf32>
    %1 = vector.shape_cast %0 : vector<1x16x64xf32> to vector<16x64xf32>
    %2 = arith.truncf %1 : vector<16x64xf32> to vector<16x64xbf16>
    %c0_2 = arith.constant 0 : index
    %c0_3 = arith.constant 0 : index
    %3 = vector.load %arg2[%c0_2, %c0_3] : memref<64x64xbf16, #tpu.memory_space<vmem>>, vector<64x64xbf16>
    %cst = arith.constant dense<0.000000e+00> : vector<16x64xf32>
    %4 = tpu.matmul %2, %3, %cst {dimension_numbers = #tpu.dot_dimension_numbers<[1], [0], [0], [1], [0, 0, 1, 1], [], []>} : vector<16x64xbf16>, vector<64x64xbf16>, vector<16x64xf32> -> vector<16x64xf32>
    %c0_4 = arith.constant 0 : index
    %c0_5 = arith.constant 0 : index
    %5 = vector.load %arg3[%c0_4, %c0_5] : memref<1x64xf32, #tpu.memory_space<vmem>>, vector<1x64xf32>
    %6 = vector.broadcast %5 : vector<1x64xf32> to vector<16x64xf32>
    %7 = arith.addf %4, %6 : vector<16x64xf32>
    %cst_6 = arith.constant 0.000000e+00 : f32
    %8 = vector.broadcast %cst_6 : f32 to vector<16x64xf32>
    %9 = arith.maximumf %7, %8 : vector<16x64xf32>
    %c0_7 = arith.constant 0 : index
    %c0_8 = arith.constant 0 : index
    %c0_9 = arith.constant 0 : index
    %10 = vector.load %arg4[%c0_7, %c0_8, %c0_9] : memref<2x64x64xbf16, #tpu.memory_space<vmem>>, vector<1x64x64xbf16>
    %11 = vector.shape_cast %10 : vector<1x64x64xbf16> to vector<64x64xbf16>
    %c0_10 = arith.constant 0 : index
    %c0_11 = arith.constant 0 : index
    %c0_12 = arith.constant 0 : index
    %12 = vector.load %arg5[%c0_10, %c0_11, %c0_12] : memref<2x1x64xf32, #tpu.memory_space<vmem>>, vector<1x1x64xf32>
    %13 = vector.shape_cast %12 : vector<1x1x64xf32> to vector<1x64xf32>
    %c0_13 = arith.constant 0 : index
    %c0_14 = arith.constant 0 : index
    %c0_15 = arith.constant 0 : index
    %14 = vector.load %arg6[%c0_13, %c0_14, %c0_15] : memref<2x64x64xbf16, #tpu.memory_space<vmem>>, vector<1x64x64xbf16>
    %15 = vector.shape_cast %14 : vector<1x64x64xbf16> to vector<64x64xbf16>
    %c0_16 = arith.constant 0 : index
    %c0_17 = arith.constant 0 : index
    %c0_18 = arith.constant 0 : index
    %16 = vector.load %arg7[%c0_16, %c0_17, %c0_18] : memref<2x20x64xf32, #tpu.memory_space<vmem>>, vector<1x20x64xf32>
    %17 = vector.shape_cast %16 : vector<1x20x64xf32> to vector<20x64xf32>
    %18 = arith.truncf %9 : vector<16x64xf32> to vector<16x64xbf16>
    %cst_19 = arith.constant dense<0.000000e+00> : vector<16x64xf32>
    %19 = tpu.matmul %18, %11, %cst_19 {dimension_numbers = #tpu.dot_dimension_numbers<[1], [0], [0], [1], [0, 0, 1, 1], [], []>} : vector<16x64xbf16>, vector<64x64xbf16>, vector<16x64xf32> -> vector<16x64xf32>
    %20 = vector.broadcast %13 : vector<1x64xf32> to vector<16x64xf32>
    %21 = arith.addf %19, %20 : vector<16x64xf32>
    %cst_20 = arith.constant 0.000000e+00 : f32
    %22 = vector.broadcast %cst_20 : f32 to vector<16x64xf32>
    %23 = arith.maximumf %21, %22 : vector<16x64xf32>
    %24 = arith.truncf %23 : vector<16x64xf32> to vector<16x64xbf16>
    %cst_21 = arith.constant dense<0.000000e+00> : vector<16x64xf32>
    %25 = tpu.matmul %24, %15, %cst_21 {dimension_numbers = #tpu.dot_dimension_numbers<[1], [0], [0], [1], [0, 0, 1, 1], [], []>} : vector<16x64xbf16>, vector<64x64xbf16>, vector<16x64xf32> -> vector<16x64xf32>
    %cst_22 = arith.constant 0.000000e+00 : f32
    %26 = vector.broadcast %cst_22 : f32 to vector<19x64xf32>
    %27 = tpu.concatenate %26, %25 in 0 : vector<19x64xf32>, vector<16x64xf32> -> vector<35x64xf32>
    %cst_23 = arith.constant 0.000000e+00 : f32
    %28 = vector.broadcast %cst_23 : f32 to vector<16x64xf32>
    %29 = vector.extract_strided_slice %27 {offsets = [19, 0], sizes = [16, 64], strides = [1, 1]} : vector<35x64xf32> to vector<16x64xf32>
    %30 = vector.extract_strided_slice %17 {offsets = [19, 0], sizes = [1, 64], strides = [1, 1]} : vector<20x64xf32> to vector<1x64xf32>
    %31 = vector.shape_cast %30 : vector<1x64xf32> to vector<64xf32>
    %32 = vector.shape_cast %31 : vector<64xf32> to vector<1x64xf32>
    %33 = vector.broadcast %32 : vector<1x64xf32> to vector<16x64xf32>
    %34 = arith.mulf %29, %33 : vector<16x64xf32>
    %35 = arith.addf %28, %34 : vector<16x64xf32>
    %36 = vector.extract_strided_slice %27 {offsets = [18, 0], sizes = [16, 64], strides = [1, 1]} : vector<35x64xf32> to vector<16x64xf32>
    %37 = vector.extract_strided_slice %17 {offsets = [18, 0], sizes = [1, 64], strides = [1, 1]} : vector<20x64xf32> to vector<1x64xf32>
    %38 = vector.shape_cast %37 : vector<1x64xf32> to vector<64xf32>
    %39 = vector.shape_cast %38 : vector<64xf32> to vector<1x64xf32>
    %40 = vector.broadcast %39 : vector<1x64xf32> to vector<16x64xf32>
    %41 = arith.mulf %36, %40 : vector<16x64xf32>
    %42 = arith.addf %35, %41 : vector<16x64xf32>
    %43 = vector.extract_strided_slice %27 {offsets = [17, 0], sizes = [16, 64], strides = [1, 1]} : vector<35x64xf32> to vector<16x64xf32>
    %44 = vector.extract_strided_slice %17 {offsets = [17, 0], sizes = [1, 64], strides = [1, 1]} : vector<20x64xf32> to vector<1x64xf32>
    %45 = vector.shape_cast %44 : vector<1x64xf32> to vector<64xf32>
    %46 = vector.shape_cast %45 : vector<64xf32> to vector<1x64xf32>
    %47 = vector.broadcast %46 : vector<1x64xf32> to vector<16x64xf32>
    %48 = arith.mulf %43, %47 : vector<16x64xf32>
    %49 = arith.addf %42, %48 : vector<16x64xf32>
    %50 = vector.extract_strided_slice %27 {offsets = [16, 0], sizes = [16, 64], strides = [1, 1]} : vector<35x64xf32> to vector<16x64xf32>
    %51 = vector.extract_strided_slice %17 {offsets = [16, 0], sizes = [1, 64], strides = [1, 1]} : vector<20x64xf32> to vector<1x64xf32>
    %52 = vector.shape_cast %51 : vector<1x64xf32> to vector<64xf32>
    %53 = vector.shape_cast %52 : vector<64xf32> to vector<1x64xf32>
    %54 = vector.broadcast %53 : vector<1x64xf32> to vector<16x64xf32>
    %55 = arith.mulf %50, %54 : vector<16x64xf32>
    %56 = arith.addf %49, %55 : vector<16x64xf32>
    %57 = vector.extract_strided_slice %27 {offsets = [15, 0], sizes = [16, 64], strides = [1, 1]} : vector<35x64xf32> to vector<16x64xf32>
    %58 = vector.extract_strided_slice %17 {offsets = [15, 0], sizes = [1, 64], strides = [1, 1]} : vector<20x64xf32> to vector<1x64xf32>
    %59 = vector.shape_cast %58 : vector<1x64xf32> to vector<64xf32>
    %60 = vector.shape_cast %59 : vector<64xf32> to vector<1x64xf32>
    %61 = vector.broadcast %60 : vector<1x64xf32> to vector<16x64xf32>
    %62 = arith.mulf %57, %61 : vector<16x64xf32>
    %63 = arith.addf %56, %62 : vector<16x64xf32>
    %64 = vector.extract_strided_slice %27 {offsets = [14, 0], sizes = [16, 64], strides = [1, 1]} : vector<35x64xf32> to vector<16x64xf32>
    %65 = vector.extract_strided_slice %17 {offsets = [14, 0], sizes = [1, 64], strides = [1, 1]} : vector<20x64xf32> to vector<1x64xf32>
    %66 = vector.shape_cast %65 : vector<1x64xf32> to vector<64xf32>
    %67 = vector.shape_cast %66 : vector<64xf32> to vector<1x64xf32>
    %68 = vector.broadcast %67 : vector<1x64xf32> to vector<16x64xf32>
    %69 = arith.mulf %64, %68 : vector<16x64xf32>
    %70 = arith.addf %63, %69 : vector<16x64xf32>
    %71 = vector.extract_strided_slice %27 {offsets = [13, 0], sizes = [16, 64], strides = [1, 1]} : vector<35x64xf32> to vector<16x64xf32>
    %72 = vector.extract_strided_slice %17 {offsets = [13, 0], sizes = [1, 64], strides = [1, 1]} : vector<20x64xf32> to vector<1x64xf32>
    %73 = vector.shape_cast %72 : vector<1x64xf32> to vector<64xf32>
    %74 = vector.shape_cast %73 : vector<64xf32> to vector<1x64xf32>
    %75 = vector.broadcast %74 : vector<1x64xf32> to vector<16x64xf32>
    %76 = arith.mulf %71, %75 : vector<16x64xf32>
    %77 = arith.addf %70, %76 : vector<16x64xf32>
    %78 = vector.extract_strided_slice %27 {offsets = [12, 0], sizes = [16, 64], strides = [1, 1]} : vector<35x64xf32> to vector<16x64xf32>
    %79 = vector.extract_strided_slice %17 {offsets = [12, 0], sizes = [1, 64], strides = [1, 1]} : vector<20x64xf32> to vector<1x64xf32>
    %80 = vector.shape_cast %79 : vector<1x64xf32> to vector<64xf32>
    %81 = vector.shape_cast %80 : vector<64xf32> to vector<1x64xf32>
    %82 = vector.broadcast %81 : vector<1x64xf32> to vector<16x64xf32>
    %83 = arith.mulf %78, %82 : vector<16x64xf32>
    %84 = arith.addf %77, %83 : vector<16x64xf32>
    %85 = vector.extract_strided_slice %27 {offsets = [11, 0], sizes = [16, 64], strides = [1, 1]} : vector<35x64xf32> to vector<16x64xf32>
    %86 = vector.extract_strided_slice %17 {offsets = [11, 0], sizes = [1, 64], strides = [1, 1]} : vector<20x64xf32> to vector<1x64xf32>
    %87 = vector.shape_cast %86 : vector<1x64xf32> to vector<64xf32>
    %88 = vector.shape_cast %87 : vector<64xf32> to vector<1x64xf32>
    %89 = vector.broadcast %88 : vector<1x64xf32> to vector<16x64xf32>
    %90 = arith.mulf %85, %89 : vector<16x64xf32>
    %91 = arith.addf %84, %90 : vector<16x64xf32>
    %92 = vector.extract_strided_slice %27 {offsets = [10, 0], sizes = [16, 64], strides = [1, 1]} : vector<35x64xf32> to vector<16x64xf32>
    %93 = vector.extract_strided_slice %17 {offsets = [10, 0], sizes = [1, 64], strides = [1, 1]} : vector<20x64xf32> to vector<1x64xf32>
    %94 = vector.shape_cast %93 : vector<1x64xf32> to vector<64xf32>
    %95 = vector.shape_cast %94 : vector<64xf32> to vector<1x64xf32>
    %96 = vector.broadcast %95 : vector<1x64xf32> to vector<16x64xf32>
    %97 = arith.mulf %92, %96 : vector<16x64xf32>
    %98 = arith.addf %91, %97 : vector<16x64xf32>
    %99 = vector.extract_strided_slice %27 {offsets = [9, 0], sizes = [16, 64], strides = [1, 1]} : vector<35x64xf32> to vector<16x64xf32>
    %100 = vector.extract_strided_slice %17 {offsets = [9, 0], sizes = [1, 64], strides = [1, 1]} : vector<20x64xf32> to vector<1x64xf32>
    %101 = vector.shape_cast %100 : vector<1x64xf32> to vector<64xf32>
    %102 = vector.shape_cast %101 : vector<64xf32> to vector<1x64xf32>
    %103 = vector.broadcast %102 : vector<1x64xf32> to vector<16x64xf32>
    %104 = arith.mulf %99, %103 : vector<16x64xf32>
    %105 = arith.addf %98, %104 : vector<16x64xf32>
    %106 = vector.extract_strided_slice %27 {offsets = [8, 0], sizes = [16, 64], strides = [1, 1]} : vector<35x64xf32> to vector<16x64xf32>
    %107 = vector.extract_strided_slice %17 {offsets = [8, 0], sizes = [1, 64], strides = [1, 1]} : vector<20x64xf32> to vector<1x64xf32>
    %108 = vector.shape_cast %107 : vector<1x64xf32> to vector<64xf32>
    %109 = vector.shape_cast %108 : vector<64xf32> to vector<1x64xf32>
    %110 = vector.broadcast %109 : vector<1x64xf32> to vector<16x64xf32>
    %111 = arith.mulf %106, %110 : vector<16x64xf32>
    %112 = arith.addf %105, %111 : vector<16x64xf32>
    %113 = vector.extract_strided_slice %27 {offsets = [7, 0], sizes = [16, 64], strides = [1, 1]} : vector<35x64xf32> to vector<16x64xf32>
    %114 = vector.extract_strided_slice %17 {offsets = [7, 0], sizes = [1, 64], strides = [1, 1]} : vector<20x64xf32> to vector<1x64xf32>
    %115 = vector.shape_cast %114 : vector<1x64xf32> to vector<64xf32>
    %116 = vector.shape_cast %115 : vector<64xf32> to vector<1x64xf32>
    %117 = vector.broadcast %116 : vector<1x64xf32> to vector<16x64xf32>
    %118 = arith.mulf %113, %117 : vector<16x64xf32>
    %119 = arith.addf %112, %118 : vector<16x64xf32>
    %120 = vector.extract_strided_slice %27 {offsets = [6, 0], sizes = [16, 64], strides = [1, 1]} : vector<35x64xf32> to vector<16x64xf32>
    %121 = vector.extract_strided_slice %17 {offsets = [6, 0], sizes = [1, 64], strides = [1, 1]} : vector<20x64xf32> to vector<1x64xf32>
    %122 = vector.shape_cast %121 : vector<1x64xf32> to vector<64xf32>
    %123 = vector.shape_cast %122 : vector<64xf32> to vector<1x64xf32>
    %124 = vector.broadcast %123 : vector<1x64xf32> to vector<16x64xf32>
    %125 = arith.mulf %120, %124 : vector<16x64xf32>
    %126 = arith.addf %119, %125 : vector<16x64xf32>
    %127 = vector.extract_strided_slice %27 {offsets = [5, 0], sizes = [16, 64], strides = [1, 1]} : vector<35x64xf32> to vector<16x64xf32>
    %128 = vector.extract_strided_slice %17 {offsets = [5, 0], sizes = [1, 64], strides = [1, 1]} : vector<20x64xf32> to vector<1x64xf32>
    %129 = vector.shape_cast %128 : vector<1x64xf32> to vector<64xf32>
    %130 = vector.shape_cast %129 : vector<64xf32> to vector<1x64xf32>
    %131 = vector.broadcast %130 : vector<1x64xf32> to vector<16x64xf32>
    %132 = arith.mulf %127, %131 : vector<16x64xf32>
    %133 = arith.addf %126, %132 : vector<16x64xf32>
    %134 = vector.extract_strided_slice %27 {offsets = [4, 0], sizes = [16, 64], strides = [1, 1]} : vector<35x64xf32> to vector<16x64xf32>
    %135 = vector.extract_strided_slice %17 {offsets = [4, 0], sizes = [1, 64], strides = [1, 1]} : vector<20x64xf32> to vector<1x64xf32>
    %136 = vector.shape_cast %135 : vector<1x64xf32> to vector<64xf32>
    %137 = vector.shape_cast %136 : vector<64xf32> to vector<1x64xf32>
    %138 = vector.broadcast %137 : vector<1x64xf32> to vector<16x64xf32>
    %139 = arith.mulf %134, %138 : vector<16x64xf32>
    %140 = arith.addf %133, %139 : vector<16x64xf32>
    %141 = arith.addf %9, %25 : vector<16x64xf32>
    %142 = arith.addf %141, %140 : vector<16x64xf32>
    %c1 = arith.constant 1 : index
    %c0_24 = arith.constant 0 : index
    %c0_25 = arith.constant 0 : index
    %143 = vector.load %arg4[%c1, %c0_24, %c0_25] : memref<2x64x64xbf16, #tpu.memory_space<vmem>>, vector<1x64x64xbf16>
    %144 = vector.shape_cast %143 : vector<1x64x64xbf16> to vector<64x64xbf16>
    %c1_26 = arith.constant 1 : index
    %c0_27 = arith.constant 0 : index
    %c0_28 = arith.constant 0 : index
    %145 = vector.load %arg5[%c1_26, %c0_27, %c0_28] : memref<2x1x64xf32, #tpu.memory_space<vmem>>, vector<1x1x64xf32>
    %146 = vector.shape_cast %145 : vector<1x1x64xf32> to vector<1x64xf32>
    %c1_29 = arith.constant 1 : index
    %c0_30 = arith.constant 0 : index
    %c0_31 = arith.constant 0 : index
    %147 = vector.load %arg6[%c1_29, %c0_30, %c0_31] : memref<2x64x64xbf16, #tpu.memory_space<vmem>>, vector<1x64x64xbf16>
    %148 = vector.shape_cast %147 : vector<1x64x64xbf16> to vector<64x64xbf16>
    %c1_32 = arith.constant 1 : index
    %c0_33 = arith.constant 0 : index
    %c0_34 = arith.constant 0 : index
    %149 = vector.load %arg7[%c1_32, %c0_33, %c0_34] : memref<2x20x64xf32, #tpu.memory_space<vmem>>, vector<1x20x64xf32>
    %150 = vector.shape_cast %149 : vector<1x20x64xf32> to vector<20x64xf32>
    %151 = arith.truncf %142 : vector<16x64xf32> to vector<16x64xbf16>
    %cst_35 = arith.constant dense<0.000000e+00> : vector<16x64xf32>
    %152 = tpu.matmul %151, %144, %cst_35 {dimension_numbers = #tpu.dot_dimension_numbers<[1], [0], [0], [1], [0, 0, 1, 1], [], []>} : vector<16x64xbf16>, vector<64x64xbf16>, vector<16x64xf32> -> vector<16x64xf32>
    %153 = vector.broadcast %146 : vector<1x64xf32> to vector<16x64xf32>
    %154 = arith.addf %152, %153 : vector<16x64xf32>
    %cst_36 = arith.constant 0.000000e+00 : f32
    %155 = vector.broadcast %cst_36 : f32 to vector<16x64xf32>
    %156 = arith.maximumf %154, %155 : vector<16x64xf32>
    %157 = arith.truncf %156 : vector<16x64xf32> to vector<16x64xbf16>
    %cst_37 = arith.constant dense<0.000000e+00> : vector<16x64xf32>
    %158 = tpu.matmul %157, %148, %cst_37 {dimension_numbers = #tpu.dot_dimension_numbers<[1], [0], [0], [1], [0, 0, 1, 1], [], []>} : vector<16x64xbf16>, vector<64x64xbf16>, vector<16x64xf32> -> vector<16x64xf32>
    %cst_38 = arith.constant 0.000000e+00 : f32
    %159 = vector.broadcast %cst_38 : f32 to vector<19x64xf32>
    %160 = tpu.concatenate %159, %158 in 0 : vector<19x64xf32>, vector<16x64xf32> -> vector<35x64xf32>
    %cst_39 = arith.constant 0.000000e+00 : f32
    %161 = vector.broadcast %cst_39 : f32 to vector<16x64xf32>
    %162 = vector.extract_strided_slice %160 {offsets = [19, 0], sizes = [16, 64], strides = [1, 1]} : vector<35x64xf32> to vector<16x64xf32>
    %163 = vector.extract_strided_slice %150 {offsets = [19, 0], sizes = [1, 64], strides = [1, 1]} : vector<20x64xf32> to vector<1x64xf32>
    %164 = vector.shape_cast %163 : vector<1x64xf32> to vector<64xf32>
    %165 = vector.shape_cast %164 : vector<64xf32> to vector<1x64xf32>
    %166 = vector.broadcast %165 : vector<1x64xf32> to vector<16x64xf32>
    %167 = arith.mulf %162, %166 : vector<16x64xf32>
    %168 = arith.addf %161, %167 : vector<16x64xf32>
    %169 = vector.extract_strided_slice %160 {offsets = [18, 0], sizes = [16, 64], strides = [1, 1]} : vector<35x64xf32> to vector<16x64xf32>
    %170 = vector.extract_strided_slice %150 {offsets = [18, 0], sizes = [1, 64], strides = [1, 1]} : vector<20x64xf32> to vector<1x64xf32>
    %171 = vector.shape_cast %170 : vector<1x64xf32> to vector<64xf32>
    %172 = vector.shape_cast %171 : vector<64xf32> to vector<1x64xf32>
    %173 = vector.broadcast %172 : vector<1x64xf32> to vector<16x64xf32>
    %174 = arith.mulf %169, %173 : vector<16x64xf32>
    %175 = arith.addf %168, %174 : vector<16x64xf32>
    %176 = vector.extract_strided_slice %160 {offsets = [17, 0], sizes = [16, 64], strides = [1, 1]} : vector<35x64xf32> to vector<16x64xf32>
    %177 = vector.extract_strided_slice %150 {offsets = [17, 0], sizes = [1, 64], strides = [1, 1]} : vector<20x64xf32> to vector<1x64xf32>
    %178 = vector.shape_cast %177 : vector<1x64xf32> to vector<64xf32>
    %179 = vector.shape_cast %178 : vector<64xf32> to vector<1x64xf32>
    %180 = vector.broadcast %179 : vector<1x64xf32> to vector<16x64xf32>
    %181 = arith.mulf %176, %180 : vector<16x64xf32>
    %182 = arith.addf %175, %181 : vector<16x64xf32>
    %183 = vector.extract_strided_slice %160 {offsets = [16, 0], sizes = [16, 64], strides = [1, 1]} : vector<35x64xf32> to vector<16x64xf32>
    %184 = vector.extract_strided_slice %150 {offsets = [16, 0], sizes = [1, 64], strides = [1, 1]} : vector<20x64xf32> to vector<1x64xf32>
    %185 = vector.shape_cast %184 : vector<1x64xf32> to vector<64xf32>
    %186 = vector.shape_cast %185 : vector<64xf32> to vector<1x64xf32>
    %187 = vector.broadcast %186 : vector<1x64xf32> to vector<16x64xf32>
    %188 = arith.mulf %183, %187 : vector<16x64xf32>
    %189 = arith.addf %182, %188 : vector<16x64xf32>
    %190 = vector.extract_strided_slice %160 {offsets = [15, 0], sizes = [16, 64], strides = [1, 1]} : vector<35x64xf32> to vector<16x64xf32>
    %191 = vector.extract_strided_slice %150 {offsets = [15, 0], sizes = [1, 64], strides = [1, 1]} : vector<20x64xf32> to vector<1x64xf32>
    %192 = vector.shape_cast %191 : vector<1x64xf32> to vector<64xf32>
    %193 = vector.shape_cast %192 : vector<64xf32> to vector<1x64xf32>
    %194 = vector.broadcast %193 : vector<1x64xf32> to vector<16x64xf32>
    %195 = arith.mulf %190, %194 : vector<16x64xf32>
    %196 = arith.addf %189, %195 : vector<16x64xf32>
    %197 = vector.extract_strided_slice %160 {offsets = [14, 0], sizes = [16, 64], strides = [1, 1]} : vector<35x64xf32> to vector<16x64xf32>
    %198 = vector.extract_strided_slice %150 {offsets = [14, 0], sizes = [1, 64], strides = [1, 1]} : vector<20x64xf32> to vector<1x64xf32>
    %199 = vector.shape_cast %198 : vector<1x64xf32> to vector<64xf32>
    %200 = vector.shape_cast %199 : vector<64xf32> to vector<1x64xf32>
    %201 = vector.broadcast %200 : vector<1x64xf32> to vector<16x64xf32>
    %202 = arith.mulf %197, %201 : vector<16x64xf32>
    %203 = arith.addf %196, %202 : vector<16x64xf32>
    %204 = vector.extract_strided_slice %160 {offsets = [13, 0], sizes = [16, 64], strides = [1, 1]} : vector<35x64xf32> to vector<16x64xf32>
    %205 = vector.extract_strided_slice %150 {offsets = [13, 0], sizes = [1, 64], strides = [1, 1]} : vector<20x64xf32> to vector<1x64xf32>
    %206 = vector.shape_cast %205 : vector<1x64xf32> to vector<64xf32>
    %207 = vector.shape_cast %206 : vector<64xf32> to vector<1x64xf32>
    %208 = vector.broadcast %207 : vector<1x64xf32> to vector<16x64xf32>
    %209 = arith.mulf %204, %208 : vector<16x64xf32>
    %210 = arith.addf %203, %209 : vector<16x64xf32>
    %211 = vector.extract_strided_slice %160 {offsets = [12, 0], sizes = [16, 64], strides = [1, 1]} : vector<35x64xf32> to vector<16x64xf32>
    %212 = vector.extract_strided_slice %150 {offsets = [12, 0], sizes = [1, 64], strides = [1, 1]} : vector<20x64xf32> to vector<1x64xf32>
    %213 = vector.shape_cast %212 : vector<1x64xf32> to vector<64xf32>
    %214 = vector.shape_cast %213 : vector<64xf32> to vector<1x64xf32>
    %215 = vector.broadcast %214 : vector<1x64xf32> to vector<16x64xf32>
    %216 = arith.mulf %211, %215 : vector<16x64xf32>
    %217 = arith.addf %210, %216 : vector<16x64xf32>
    %218 = vector.extract_strided_slice %160 {offsets = [11, 0], sizes = [16, 64], strides = [1, 1]} : vector<35x64xf32> to vector<16x64xf32>
    %219 = vector.extract_strided_slice %150 {offsets = [11, 0], sizes = [1, 64], strides = [1, 1]} : vector<20x64xf32> to vector<1x64xf32>
    %220 = vector.shape_cast %219 : vector<1x64xf32> to vector<64xf32>
    %221 = vector.shape_cast %220 : vector<64xf32> to vector<1x64xf32>
    %222 = vector.broadcast %221 : vector<1x64xf32> to vector<16x64xf32>
    %223 = arith.mulf %218, %222 : vector<16x64xf32>
    %224 = arith.addf %217, %223 : vector<16x64xf32>
    %225 = vector.extract_strided_slice %160 {offsets = [10, 0], sizes = [16, 64], strides = [1, 1]} : vector<35x64xf32> to vector<16x64xf32>
    %226 = vector.extract_strided_slice %150 {offsets = [10, 0], sizes = [1, 64], strides = [1, 1]} : vector<20x64xf32> to vector<1x64xf32>
    %227 = vector.shape_cast %226 : vector<1x64xf32> to vector<64xf32>
    %228 = vector.shape_cast %227 : vector<64xf32> to vector<1x64xf32>
    %229 = vector.broadcast %228 : vector<1x64xf32> to vector<16x64xf32>
    %230 = arith.mulf %225, %229 : vector<16x64xf32>
    %231 = arith.addf %224, %230 : vector<16x64xf32>
    %232 = vector.extract_strided_slice %160 {offsets = [9, 0], sizes = [16, 64], strides = [1, 1]} : vector<35x64xf32> to vector<16x64xf32>
    %233 = vector.extract_strided_slice %150 {offsets = [9, 0], sizes = [1, 64], strides = [1, 1]} : vector<20x64xf32> to vector<1x64xf32>
    %234 = vector.shape_cast %233 : vector<1x64xf32> to vector<64xf32>
    %235 = vector.shape_cast %234 : vector<64xf32> to vector<1x64xf32>
    %236 = vector.broadcast %235 : vector<1x64xf32> to vector<16x64xf32>
    %237 = arith.mulf %232, %236 : vector<16x64xf32>
    %238 = arith.addf %231, %237 : vector<16x64xf32>
    %239 = vector.extract_strided_slice %160 {offsets = [8, 0], sizes = [16, 64], strides = [1, 1]} : vector<35x64xf32> to vector<16x64xf32>
    %240 = vector.extract_strided_slice %150 {offsets = [8, 0], sizes = [1, 64], strides = [1, 1]} : vector<20x64xf32> to vector<1x64xf32>
    %241 = vector.shape_cast %240 : vector<1x64xf32> to vector<64xf32>
    %242 = vector.shape_cast %241 : vector<64xf32> to vector<1x64xf32>
    %243 = vector.broadcast %242 : vector<1x64xf32> to vector<16x64xf32>
    %244 = arith.mulf %239, %243 : vector<16x64xf32>
    %245 = arith.addf %238, %244 : vector<16x64xf32>
    %246 = vector.extract_strided_slice %160 {offsets = [7, 0], sizes = [16, 64], strides = [1, 1]} : vector<35x64xf32> to vector<16x64xf32>
    %247 = vector.extract_strided_slice %150 {offsets = [7, 0], sizes = [1, 64], strides = [1, 1]} : vector<20x64xf32> to vector<1x64xf32>
    %248 = vector.shape_cast %247 : vector<1x64xf32> to vector<64xf32>
    %249 = vector.shape_cast %248 : vector<64xf32> to vector<1x64xf32>
    %250 = vector.broadcast %249 : vector<1x64xf32> to vector<16x64xf32>
    %251 = arith.mulf %246, %250 : vector<16x64xf32>
    %252 = arith.addf %245, %251 : vector<16x64xf32>
    %253 = vector.extract_strided_slice %160 {offsets = [6, 0], sizes = [16, 64], strides = [1, 1]} : vector<35x64xf32> to vector<16x64xf32>
    %254 = vector.extract_strided_slice %150 {offsets = [6, 0], sizes = [1, 64], strides = [1, 1]} : vector<20x64xf32> to vector<1x64xf32>
    %255 = vector.shape_cast %254 : vector<1x64xf32> to vector<64xf32>
    %256 = vector.shape_cast %255 : vector<64xf32> to vector<1x64xf32>
    %257 = vector.broadcast %256 : vector<1x64xf32> to vector<16x64xf32>
    %258 = arith.mulf %253, %257 : vector<16x64xf32>
    %259 = arith.addf %252, %258 : vector<16x64xf32>
    %260 = vector.extract_strided_slice %160 {offsets = [5, 0], sizes = [16, 64], strides = [1, 1]} : vector<35x64xf32> to vector<16x64xf32>
    %261 = vector.extract_strided_slice %150 {offsets = [5, 0], sizes = [1, 64], strides = [1, 1]} : vector<20x64xf32> to vector<1x64xf32>
    %262 = vector.shape_cast %261 : vector<1x64xf32> to vector<64xf32>
    %263 = vector.shape_cast %262 : vector<64xf32> to vector<1x64xf32>
    %264 = vector.broadcast %263 : vector<1x64xf32> to vector<16x64xf32>
    %265 = arith.mulf %260, %264 : vector<16x64xf32>
    %266 = arith.addf %259, %265 : vector<16x64xf32>
    %267 = vector.extract_strided_slice %160 {offsets = [4, 0], sizes = [16, 64], strides = [1, 1]} : vector<35x64xf32> to vector<16x64xf32>
    %268 = vector.extract_strided_slice %150 {offsets = [4, 0], sizes = [1, 64], strides = [1, 1]} : vector<20x64xf32> to vector<1x64xf32>
    %269 = vector.shape_cast %268 : vector<1x64xf32> to vector<64xf32>
    %270 = vector.shape_cast %269 : vector<64xf32> to vector<1x64xf32>
    %271 = vector.broadcast %270 : vector<1x64xf32> to vector<16x64xf32>
    %272 = arith.mulf %267, %271 : vector<16x64xf32>
    %273 = arith.addf %266, %272 : vector<16x64xf32>
    %274 = arith.addf %142, %158 : vector<16x64xf32>
    %275 = arith.addf %274, %273 : vector<16x64xf32>
    %276 = arith.truncf %275 : vector<16x64xf32> to vector<16x64xbf16>
    %c0_40 = arith.constant 0 : index
    %c0_41 = arith.constant 0 : index
    %277 = vector.load %arg8[%c0_40, %c0_41] : memref<64x384xbf16, #tpu.memory_space<vmem>>, vector<64x384xbf16>
    %cst_42 = arith.constant dense<0.000000e+00> : vector<16x384xf32>
    %278 = tpu.matmul %276, %277, %cst_42 {dimension_numbers = #tpu.dot_dimension_numbers<[1], [0], [0], [1], [0, 0, 1, 1], [], []>} : vector<16x64xbf16>, vector<64x384xbf16>, vector<16x384xf32> -> vector<16x384xf32>
    %c0_43 = arith.constant 0 : index
    %c0_44 = arith.constant 0 : index
    %279 = vector.load %arg9[%c0_43, %c0_44] : memref<1x384xf32, #tpu.memory_space<vmem>>, vector<1x384xf32>
    %280 = vector.broadcast %279 : vector<1x384xf32> to vector<16x384xf32>
    %281 = arith.addf %278, %280 : vector<16x384xf32>
    %282 = arith.negf %281 : vector<16x384xf32>
    %283 = math.exp %282 : vector<16x384xf32>
    %cst_45 = arith.constant 1.000000e+00 : f32
    %284 = vector.broadcast %cst_45 : f32 to vector<16x384xf32>
    %285 = arith.addf %284, %283 : vector<16x384xf32>
    %286 = arith.divf %284, %285 : vector<16x384xf32>
    %c0_46 = arith.constant 0 : index
    %c0_47 = arith.constant 0 : index
    %c0_48 = arith.constant 0 : index
    %287 = vector.load %arg10[%c0_46, %c0_47, %c0_48] : memref<1x16x384xf32, #tpu.memory_space<vmem>>, vector<1x16x384xf32>
    %288 = vector.shape_cast %287 : vector<1x16x384xf32> to vector<16x384xf32>
    %289 = vector.shape_cast %286 : vector<16x384xf32> to vector<1x16x384xf32>
    tpu.vector_store %arg10[%c0_46, %c0_47, %c0_48], %289 {strides = array<i32>} : memref<1x16x384xf32, #tpu.memory_space<vmem>>, vector<1x16x384xf32>,
    return
  }
  func.func @transform_0(%arg0: i32) -> (i32, i32, i32) {
    %c0_i32 = arith.constant 0 : i32
    %c0_i32_0 = arith.constant 0 : i32
    %c0_i32_1 = arith.constant 0 : i32
    return %arg0, %c0_i32, %c0_i32_0 : i32, i32, i32
  }
  func.func @transform_1(%arg0: i32) -> (i32, i32) {
    %c0_i32 = arith.constant 0 : i32
    %c0_i32_0 = arith.constant 0 : i32
    %c0_i32_1 = arith.constant 0 : i32
    return %c0_i32, %c0_i32_0 : i32, i32
  }
  func.func @transform_2(%arg0: i32) -> (i32, i32) {
    %c0_i32 = arith.constant 0 : i32
    %c0_i32_0 = arith.constant 0 : i32
    %c0_i32_1 = arith.constant 0 : i32
    return %c0_i32, %c0_i32_0 : i32, i32
  }
  func.func @transform_3(%arg0: i32) -> (i32, i32, i32) {
    %c0_i32 = arith.constant 0 : i32
    %c0_i32_0 = arith.constant 0 : i32
    %c0_i32_1 = arith.constant 0 : i32
    %c0_i32_2 = arith.constant 0 : i32
    return %c0_i32, %c0_i32_0, %c0_i32_1 : i32, i32, i32
  }
  func.func @transform_4(%arg0: i32) -> (i32, i32, i32) {
    %c0_i32 = arith.constant 0 : i32
    %c0_i32_0 = arith.constant 0 : i32
    %c0_i32_1 = arith.constant 0 : i32
    %c0_i32_2 = arith.constant 0 : i32
    return %c0_i32, %c0_i32_0, %c0_i32_1 : i32, i32, i32
  }
  func.func @transform_5(%arg0: i32) -> (i32, i32, i32) {
    %c0_i32 = arith.constant 0 : i32
    %c0_i32_0 = arith.constant 0 : i32
    %c0_i32_1 = arith.constant 0 : i32
    %c0_i32_2 = arith.constant 0 : i32
    return %c0_i32, %c0_i32_0, %c0_i32_1 : i32, i32, i32
  }
  func.func @transform_6(%arg0: i32) -> (i32, i32, i32) {
    %c0_i32 = arith.constant 0 : i32
    %c0_i32_0 = arith.constant 0 : i32
    %c0_i32_1 = arith.constant 0 : i32
    %c0_i32_2 = arith.constant 0 : i32
    return %c0_i32, %c0_i32_0, %c0_i32_1 : i32, i32, i32
  }
  func.func @transform_7(%arg0: i32) -> (i32, i32) {
    %c0_i32 = arith.constant 0 : i32
    %c0_i32_0 = arith.constant 0 : i32
    %c0_i32_1 = arith.constant 0 : i32
    return %c0_i32, %c0_i32_0 : i32, i32
  }
  func.func @transform_8(%arg0: i32) -> (i32, i32) {
    %c0_i32 = arith.constant 0 : i32
    %c0_i32_0 = arith.constant 0 : i32
    %c0_i32_1 = arith.constant 0 : i32
    return %c0_i32, %c0_i32_0 : i32, i32
  }
  func.func @transform_9(%arg0: i32) -> (i32, i32, i32) {
    %c0_i32 = arith.constant 0 : i32
    %c0_i32_0 = arith.constant 0 : i32
    %c0_i32_1 = arith.constant 0 : i32
    return %arg0, %c0_i32, %c0_i32_0 : i32, i32, i32
  }
}

</mosaic_0001>

<bundles_post_ra>
// kernel: _lambda_.4
= control target key start
LH: loop header
LB: loop body
LE: loop exit
PB: predicated region body
PF: predicated region fallthrough
CT: control target
= control target key end

     0   :  { %s3021_s12 = smov 0   ;;  %s3836_s0 = inlined_call_operand.vmem [shape: f32[2,17,320], index: 0, kind: input, shape index: {}]   ;;  %s3837_s1 = inlined_call_operand.vmem [shape: bf16[320,768], index: 1, kind: input, shape index: {}]   ;;  %s3838_s2 = inlined_call_operand.vmem [shape: bf16[320,768], index: 2, kind: input, shape index: {}]   ;;  %s3839_s3 = inlined_call_operand.vmem [shape: f32[2,16,384], index: 3, kind: output, shape index: {}]  }
   0x1 LB: > { %s2318_s13 = sadd.s32 4294967295, %s2998_s12   ;;  %p2322_p0 = scmp.ge.s32.totalorder %s2998_s12, 1  ;;  %s2998_s12 = sphi %s3021_s12, %s13_s12  }
   0x2   : > { %p137_p1 = scmp.lt.s32.totalorder %s2998_s12, 3 }
   0x4   : > { %p138_p2 = pnand %p2322_p0, %p137_p1 }
   0x5   : > { %v2620_v0 = vld [vmem:[%s3838_s2 + $0x4] ss:$24 sps:$4 sm:$0xff] (!%p138_p2)   ;;  %v2622_v1 = vld [vmem:[%s3838_s2 + $0x14] ss:$24 sps:$4 sm:$0xff] (!%p138_p2)   ;;  %v2624_v2 = vld [vmem:[%s3838_s2] ss:$24 sps:$4 sm:$0xff] (!%p138_p2)  }
   0x6   : > { %141 = sbr.rel (%p138_p2) target bundleno = 483 (0x1e3), region = 32  ;;  %1079 = vmatprep.subr.bf16.mxu1 (!%p138_p2), %v2620_v0  ;;  %v2625_v3 = vld [vmem:[%s3838_s2 + $0x10] ss:$24 sps:$4 sm:$0xff] (!%p138_p2)   ;;  %1251 = vmatprep.subr.bf16.mxu0 (!%p138_p2), %v2622_v1  ;;  %v2626_v4 = vld [vmem:[%s3838_s2 + $0x34] ss:$24 sps:$4 sm:$0xff] (!%p138_p2)   ;;  %p161_p3 = scmp.lt.s32.totalorder (!%p138_p2), %s2318_s13, 1 }
   0x7   : > { %1080 = vmatpush1.bf16.msra.mxu1 (!%p138_p2), %v2624_v2  ;;  %1252 = vmatpush1.bf16.msra.mxu0 (!%p138_p2), %v2625_v3  ;;  %v2628_v5 = vld [vmem:[%s3838_s2 + $0x44] ss:$24 sps:$4 sm:$0xff] (!%p138_p2)   ;;  %v2630_v6 = vld [vmem:[%s3838_s2 + $0x30] ss:$24 sps:$4 sm:$0xff] (!%p138_p2)   ;;  %v2631_v7 = vld [vmem:[%s3838_s2 + $0x40] ss:$24 sps:$4 sm:$0xff] (!%p138_p2)  }
   0x8   : > { %1081 = vmatprep.subr.bf16.mxu1 (!%p138_p2), %v2626_v4  ;;  %1253 = vmatprep.subr.bf16.mxu0 (!%p138_p2), %v2628_v5  ;;  %v2632_v8 = vld [vmem:[%s3838_s2 + $0x64] ss:$24 sps:$4 sm:$0xff] (!%p138_p2)   ;;  %v2634_v9 = vld [vmem:[%s3838_s2 + $0x74] ss:$24 sps:$4 sm:$0xff] (!%p138_p2)   ;;  %v2636_v10 = vld [vmem:[%s3838_s2 + $0x60] ss:$24 sps:$4 sm:$0xff] (!%p138_p2)  }
   0x9   : > { %v2637_v11 = vld [vmem:[%s3838_s2 + $0x70] ss:$24 sps:$4 sm:$0xff] (!%p138_p2)   ;;  %v2638_v12 = vld [vmem:[%s3838_s2 + $0x94] ss:$24 sps:$4 sm:$0xff] (!%p138_p2)   ;;  %v2640_v13 = vld [vmem:[%s3838_s2 + $0xa4] ss:$24 sps:$4 sm:$0xff] (!%p138_p2)  }
   0xa   : > { %v2642_v14 = vld [vmem:[%s3838_s2 + $0x90] ss:$24 sps:$4 sm:$0xff] (!%p138_p2)   ;;  %v2643_v15 = vld [vmem:[%s3838_s2 + $0xa0] ss:$24 sps:$4 sm:$0xff] (!%p138_p2)   ;;  %v2644_v16 = vld [vmem:[%s3838_s2 + $0xc4] ss:$24 sps:$4 sm:$0xff] (!%p138_p2)  }
   0xb   : > { %1082 = vmatpush1.bf16.msra.mxu1 (!%p138_p2), %v2630_v6  ;;  %1254 = vmatpush1.bf16.msra.mxu0 (!%p138_p2), %v2631_v7  ;;  %v2646_v17 = vld [vmem:[%s3838_s2 + $0xd4] ss:$24 sps:$4 sm:$0xff] (!%p138_p2)   ;;  %v2648_v18 = vld [vmem:[%s3838_s2 + $0xc0] ss:$24 sps:$4 sm:$0xff] (!%p138_p2)   ;;  %v2649_v19 = vld [vmem:[%s3838_s2 + $0xd0] ss:$24 sps:$4 sm:$0xff] (!%p138_p2)  }
   0xc   : > { %1083 = vmatprep.subr.bf16.mxu1 (!%p138_p2), %v2632_v8  ;;  %1255 = vmatprep.subr.bf16.mxu0 (!%p138_p2), %v2634_v9  ;;  %v2650_v20 = vld [vmem:[%s3838_s2 + $0xf4] ss:$24 sps:$4 sm:$0xff] (!%p138_p2)   ;;  %v2652_v21 = vld [vmem:[%s3838_s2 + $0x104] ss:$24 sps:$4 sm:$0xff] (!%p138_p2)   ;;  %v2654_v22 = vld [vmem:[%s3838_s2 + $0xf0] ss:$24 sps:$4 sm:$0xff] (!%p138_p2)  }
   0xd   : > { %v2655_v23 = vld [vmem:[%s3838_s2 + $0x100] ss:$24 sps:$4 sm:$0xff]   ;;  %v2656_v24 = vld [vmem:[%s3838_s2 + $0x124] ss:$24 sps:$4 sm:$0xff]   ;;  %v2658_v25 = vld [vmem:[%s3838_s2 + $0x134] ss:$24 sps:$4 sm:$0xff]  }
   0xe   : > { %v2660_v26 = vld [vmem:[%s3838_s2 + $0x120] ss:$24 sps:$4 sm:$0xff]   ;;  %v2661_v27 = vld [vmem:[%s3838_s2 + $0x130] ss:$24 sps:$4 sm:$0xff]   ;;  %v2662_v28 = vld [vmem:[%s3838_s2 + $0x154] ss:$24 sps:$4 sm:$0xff]  }
   0xf   : > { %1084 = vmatpush1.bf16.msra.mxu1 %v2636_v10  ;;  %1256 = vmatpush1.bf16.msra.mxu0 %v2637_v11  ;;  %v2664_v29 = vld [vmem:[%s3838_s2 + $0x164] ss:$24 sps:$4 sm:$0xff]   ;;  %v2666_v30 = vld [vmem:[%s3838_s2 + $0x150] ss:$24 sps:$4 sm:$0xff]   ;;  %v2667_v31 = vld [vmem:[%s3838_s2 + $0x160] ss:$24 sps:$4 sm:$0xff]  }
  0x10   : > { %1085 = vmatprep.subr.bf16.mxu1 %v2638_v12  ;;  %1257 = vmatprep.subr.bf16.mxu0 %v2640_v13  ;;  %v2668_v32 = vld [vmem:[%s3838_s2 + $0x184] ss:$24 sps:$4 sm:$0xff]   ;;  %v2670_v33 = vld [vmem:[%s3838_s2 + $0x194] ss:$24 sps:$4 sm:$0xff]   ;;  %v2672_v34 = vld [vmem:[%s3838_s2 + $0x180] ss:$24 sps:$4 sm:$0xff]  }
  0x11   : > { %v2673_v35 = vld [vmem:[%s3838_s2 + $0x190] ss:$24 sps:$4 sm:$0xff]   ;;  %s3841_s13 = smov (!%p161_p3, %s2318_s13), 1  ;;  %v2674_v36 = vld [vmem:[%s3838_s2 + $0x1b4] ss:$24 sps:$4 sm:$0xff]   ;;  %vm1075_vm1 = vcmask 523264  }
  0x12   : > { %v2676_v37 = vld [vmem:[%s3838_s2 + $0x1c4] ss:$24 sps:$4 sm:$0xff]   ;;  %v2678_v38 = vld [vmem:[%s3838_s2 + $0x1b0] ss:$24 sps:$4 sm:$0xff]   ;;  %s2609_s17 = smul.u32 72, %s3841_s13 }
  0x13   : > { %1086 = vmatpush1.bf16.msra.mxu1 %v2642_v14  ;;  %1258 = vmatpush1.bf16.msra.mxu0 %v2643_v15  ;;  %v2679_v39 = vld [vmem:[%s3838_s2 + $0x1c0] ss:$24 sps:$4 sm:$0xff]   ;;  %v2680_v40 = vld [vmem:[%s3838_s2 + $0x1e4] ss:$24 sps:$4 sm:$0xff]   ;;  %v2682_v41 = vld [vmem:[%s3838_s2 + $0x1f4] ss:$24 sps:$4 sm:$0xff]  }
  0x14   : > { %1087 = vmatprep.subr.bf16.mxu1 %v2644_v16  ;;  %1259 = vmatprep.subr.bf16.mxu0 %v2646_v17  ;;  %v2684_v42 = vld [vmem:[%s3838_s2 + $0x1e0] ss:$24 sps:$4 sm:$0xff]   ;;  %v2685_v43 = vld [vmem:[%s3838_s2 + $0x1f0] ss:$24 sps:$4 sm:$0xff]   ;;  %s3171_s30 = scalar_lea.vmem %s3836_s0, %s2609_s17  ;;  %v2686_v44 = vld [vmem:[%s3838_s2 + $0x214] ss:$24 sps:$4 sm:$0xff]  }
  0x15   : > { %v2688_v45 = vld [vmem:[%s3838_s2 + $0x224] ss:$24 sps:$4 sm:$0xff]   ;;  %v2690_v46 = vld [vmem:[%s3838_s2 + $0x210] ss:$24 sps:$4 sm:$0xff]   ;;  %v179_v49 = vld [vmem:[%s3171_s30 + $0x38] sm:$0x1] }
  0x16   : > { %v173_v47 = vld [vmem:[%s3171_s30 + $0x8] sm:$0xff]  ;;  %v176_v48 = vld [vmem:[%s3171_s30 + $0x20] sm:$0xff]  ;;  %v188_v53 = vmul.f32 3.0517578e-05, %v179_v49  ;;  %v175_v61 = vld [vmem:[%s3171_s30 + $0x18] sm:$0xff]  ;;  %vm436_vm0 = vsmask.f32 7424 }
  0x17   : > { %1088 = vmatpush1.bf16.msra.mxu1 %v2648_v18  ;;  %1260 = vmatpush1.bf16.msra.mxu0 %v2649_v19  ;;  %v182_v50 = vmul.f32 3.0517578e-05, %v173_v47  ;;  %v2691_v51 = vld [vmem:[%s3838_s2 + $0x220] ss:$24 sps:$4 sm:$0xff]   ;;  %v185_v52 = vmul.f32 3.0517578e-05, %v176_v48  ;;  %v2692_v54 = vld [vmem:[%s3838_s2 + $0x244] ss:$24 sps:$4 sm:$0xff]  }
  0x18   : > { %1089 = vmatprep.subr.bf16.mxu1 %v2650_v20  ;;  %1261 = vmatprep.subr.bf16.mxu0 %v2652_v21  ;;  %v2694_v55 = vld [vmem:[%s3838_s2 + $0x254] ss:$24 sps:$4 sm:$0xff]   ;;  %v2696_v56 = vld [vmem:[%s3838_s2 + $0x240] ss:$24 sps:$4 sm:$0xff]   ;;  %v2697_v57 = vld [vmem:[%s3838_s2 + $0x250] ss:$24 sps:$4 sm:$0xff]   ;;  %v194_v59 = vpack.c.bf16 %v188_v53, %v188_v53 }
  0x19   : > { %v3200_v58 = vpack.c.bf16 %v185_v52, %v182_v50  ;;  %v172_v60 = vld [vmem:[%s3171_s30] sm:$0xff]  ;;  %v178_v62 = vld [vmem:[%s3171_s30 + $0x30] sm:$0x1]  ;;  %v184_v0 = vmul.f32 3.0517578e-05, %v175_v61  ;;  %v2698_v1 = vld [vmem:[%s3838_s2 + $0x274] ss:$24 sps:$4 sm:$0xff]  }
  0x1a   : > { %v181_v63 = vmul.f32 3.0517578e-05, %v172_v60  ;;  %v457_v4 = vshll.u32 %v194_v59, 16  ;;  %v187_v5 = vmul.f32 3.0517578e-05, %v178_v62  ;;  %v2700_v6 = vld [vmem:[%s3838_s2 + $0x284] ss:$24 sps:$4 sm:$0xff]   ;;  %v3000_v50 = vmov 0  }
  0x1b   : > { %1090 = vmatpush1.bf16.msra.mxu1 %v2654_v22  ;;  %1262 = vmatpush1.bf16.msra.mxu0 %v2655_v23  ;;  %v450_v2 = vshrl.u32 %v3200_v58, 16  ;;  %v452_v3 = vshll.u32 %v3200_v58, 16  ;;  %v2702_v10 = vld [vmem:[%s3838_s2 + $0x270] ss:$24 sps:$4 sm:$0xff]   ;;  %v2703_v11 = vld [vmem:[%s3838_s2 + $0x280] ss:$24 sps:$4 sm:$0xff]  }
  0x1c   : > { %1091 = vmatprep.subr.bf16.mxu1 %v2656_v24  ;;  %1263 = vmatprep.subr.bf16.mxu0 %v2658_v25  ;;  %v3213_v7 = vpack.c.bf16 %v184_v0, %v181_v63  ;;  %v459_v9 = vrot.slane %v457_v4, 1  ;;  %v193_v13 = vpack.c.bf16 %v187_v5, %v187_v5  ;;  %v2704_v15 = vld [vmem:[%s3838_s2 + $0x2a4] ss:$24 sps:$4 sm:$0xff]   ;;  %v2706_v16 = vld [vmem:[%s3838_s2 + $0x2b4] ss:$24 sps:$4 sm:$0xff]   ;;  %s2610_s24 = smul.u32 48, %s3841_s13 }
  0x1d   : > { %v454_v8 = vrot.slane %v452_v3, 1  ;;  %v2708_v17 = vld [vmem:[%s3838_s2 + $0x2a0] ss:$24 sps:$4 sm:$0xff]   ;;  %v2709_v18 = vld [vmem:[%s3838_s2 + $0x2b0] ss:$24 sps:$4 sm:$0xff]  }
  0x1e   : > { %v440_v14 = vshll.u32 %v3213_v7, 16  ;;  %v2710_v20 = vld [vmem:[%s3838_s2 + $0x2d4] ss:$24 sps:$4 sm:$0xff]   ;;  %v2712_v21 = vld [vmem:[%s3838_s2 + $0x2e4] ss:$24 sps:$4 sm:$0xff]   ;;  %v438_v22 = vshrl.u32 %v3213_v7, 16  ;;  %s3825_s27 = scalar_lea.vmem %s3839_s3, %s2610_s24 }
  0x1f   : > { %1092 = vmatpush1.bf16.msra.mxu1 %v2660_v26  ;;  %1264 = vmatpush1.bf16.msra.mxu0 %v2661_v27  ;;  %v455_v12 = vor.u32 %v454_v8, %v450_v2  ;;  %v445_v24 = vshll.u32 %v193_v13, 16  ;;  %v174_v25 = vld [vmem:[%s3171_s30 + $0x10] sm:$0xff]  ;;  %v177_v26 = vld [vmem:[%s3171_s30 + $0x28] sm:$0xff]  ;;  %v2728_v49 = vld [vmem:[%s3838_s2 + $0x360] ss:$24 sps:$4 sm:$0xff]  }
  0x20   : > { %1093 = vmatprep.subr.bf16.mxu1 %v2662_v28  ;;  %1265 = vmatprep.subr.bf16.mxu0 %v2664_v29  ;;  %v442_v23 = vrot.slane %v440_v14, 1  ;;  %v2714_v27 = vld [vmem:[%s3838_s2 + $0x2d0] ss:$24 sps:$4 sm:$0xff]   ;;  %v2715_v28 = vld [vmem:[%s3838_s2 + $0x2e0] ss:$24 sps:$4 sm:$0xff]  }
  0x21   : > { %v3235_v19 = vsel %vm436_vm0, %v455_v12, %v459_v9  ;;  %v2718_v29 = vld [vmem:[%s3838_s2 + $0x304] ss:$24 sps:$4 sm:$0xff]   ;;  %v2733_v48 = vld [vmem:[%s3838_s2 + $0x374] ss:$24 sps:$4 sm:$0xff]   ;;  %v2737_v59 = vld [vmem:[%s3838_s2 + $0x3a0] ss:$24 sps:$4 sm:$0xff]  }
  0x22   : > { %1111 = vmatprep.mubr.bf16.mxu1 %v3235_v19  ;;  %1283 = vmatprep.mubr.bf16.mxu0 %v3235_v19  ;;  %v2736_v52 = vld [vmem:[%s3838_s2 + $0x394] ss:$24 sps:$4 sm:$0xff]   ;;  %v2745_v63 = vld [vmem:[%s3837_s1 + $0x4] ss:$24 sps:$4 sm:$0xff]   ;;  %v2740_v0 = vld [vmem:[%s3838_s2 + $0x8] ss:$24 sps:$4 sm:$0xff]  }
  0x23   : > { %1094 = vmatpush1.bf16.msra.mxu1 %v2666_v30  ;;  %1266 = vmatpush1.bf16.msra.mxu0 %v2667_v31  ;;  %v2721_v30 = vld [vmem:[%s3838_s2 + $0x314] ss:$24 sps:$4 sm:$0xff]   ;;  %v443_v31 = vor.u32 %v442_v23, %v438_v22  ;;  %v2746_v5 = vld [vmem:[%s3838_s2 + $0x38] ss:$24 sps:$4 sm:$0xff]   ;;  %v2757_v9 = vld [vmem:[%s3837_s1 + $0x64] ss:$24 sps:$4 sm:$0xff]  }
  0x24   : > { %1095 = vmatprep.subr.bf16.mxu1 %v2668_v32  ;;  %1267 = vmatprep.subr.bf16.mxu0 %v2670_v33  ;;  %v447_v32 = vrot.slane %v445_v24, 1  ;;  %v183_v33 = vmul.f32 3.0517578e-05, %v174_v25  ;;  %v2742_v62 = vld [vmem:[%s3838_s2 + $0xc] ss:$24 sps:$4 sm:$0xff]   ;;  %v2748_v3 = vld [vmem:[%s3838_s2 + $0x3c] ss:$24 sps:$4 sm:$0xff]  }
  0x25   : > { %v2751_v4 = vld [vmem:[%s3837_s1 + $0x34] ss:$24 sps:$4 sm:$0xff]   ;;  %v2758_v14 = vld [vmem:[%s3838_s2 + $0x98] ss:$24 sps:$4 sm:$0xff]   ;;  %v2781_v25 = vld [vmem:[%s3837_s1 + $0x124] ss:$24 sps:$4 sm:$0xff]  }
  0x26   : > { %v2754_v8 = vld [vmem:[%s3838_s2 + $0x6c] ss:$24 sps:$4 sm:$0xff]   ;;  %v2760_v12 = vld [vmem:[%s3838_s2 + $0x9c] ss:$24 sps:$4 sm:$0xff]   ;;  %v2770_v22 = vld [vmem:[%s3838_s2 + $0xf8] ss:$24 sps:$4 sm:$0xff]  }
  0x27   : > { %1096 = vmatpush1.bf16.msra.mxu1 %v2672_v34  ;;  %1268 = vmatpush1.bf16.msra.mxu0 %v2673_v35  ;;  %v186_v34 = vmul.f32 3.0517578e-05, %v177_v26  ;;  %v180_v35 = vld [vmem:[%s3171_s30 + $0x40] sm:$0x1]  ;;  %v2763_v13 = vld [vmem:[%s3837_s1 + $0x94] ss:$24 sps:$4 sm:$0xff]  }
  0x28   : > { %1097 = vmatprep.subr.bf16.mxu1 %v2674_v36  ;;  %1269 = vmatprep.subr.bf16.mxu0 %v2676_v37  ;;  %v2716_v36 = vld [vmem:[%s3838_s2 + $0x300] ss:$24 sps:$4 sm:$0xff]   ;;  %v2719_v37 = vld [vmem:[%s3838_s2 + $0x310] ss:$24 sps:$4 sm:$0xff]   ;;  %v2778_v24 = vld [vmem:[%s3838_s2 + $0x12c] ss:$24 sps:$4 sm:$0xff]  }
  0x29   : > { %v2773_v23 = vld [vmem:[%s3837_s1 + $0xf0] ss:$24 sps:$4 sm:$0xff]  }
  0x2a   : > { %v2776_v26 = vld [vmem:[%s3838_s2 + $0x128] ss:$24 sps:$4 sm:$0xff]  }
  0x2b   : > { %1098 = vmatpush1.bf16.msra.mxu1 %v2678_v38  ;;  %1270 = vmatpush1.bf16.msra.mxu0 %v2679_v39  ;;  %v3268_v38 = vsel %vm436_vm0, %v443_v31, %v447_v32  ;;  %v2724_v39 = vld [vmem:[%s3838_s2 + $0x334] ss:$24 sps:$4 sm:$0xff]   ;;  %v2785_v31 = vld [vmem:[%s3837_s1 + $0x150] ss:$24 sps:$4 sm:$0xff]  }
  0x2c   : > { %1099 = vmatprep.subr.bf16.mxu1 %v2680_v40  ;;  %1271 = vmatprep.subr.bf16.mxu0 %v2682_v41  ;;  %v189_v40 = vmul.f32 3.0517578e-05, %v180_v35  ;;  %v3273_v41 = vpack.c.bf16 %v186_v34, %v183_v33  ;;  %v2790_v32 = vld [vmem:[%s3838_s2 + $0x18c] ss:$24 sps:$4 sm:$0xff]   ;;  %v2788_v34 = vld [vmem:[%s3838_s2 + $0x188] ss:$24 sps:$4 sm:$0xff]  }
  0x2d   : > { %v2793_v33 = vld [vmem:[%s3837_s1 + $0x184] ss:$24 sps:$4 sm:$0xff]   ;;  %v2791_v35 = vld [vmem:[%s3837_s1 + $0x180] ss:$24 sps:$4 sm:$0xff]  }
  0x2e   : > { %v464_v47 = vshll.u32 %v3273_v41, 16  ;;  %v462_v53 = vshrl.u32 %v3273_v41, 16 }
  0x2f   : > { %1100 = vmatpush1.bf16.msra.mxu1 %v2684_v42  ;;  %1272 = vmatpush1.bf16.msra.mxu0 %v2685_v43  ;;  %v2727_v42 = vld [vmem:[%s3838_s2 + $0x344] ss:$24 sps:$4 sm:$0xff]   ;;  %v2722_v43 = vld [vmem:[%s3838_s2 + $0x330] ss:$24 sps:$4 sm:$0xff]  }
  0x30   : > { %1101 = vmatprep.subr.bf16.mxu1 %v2686_v44  ;;  %1273 = vmatprep.subr.bf16.mxu0 %v2688_v45  ;;  %v2725_v44 = vld [vmem:[%s3838_s2 + $0x340] ss:$24 sps:$4 sm:$0xff]   ;;  %v2730_v45 = vld [vmem:[%s3838_s2 + $0x364] ss:$24 sps:$4 sm:$0xff]  }
  0x33   : > { %1102 = vmatpush1.bf16.msra.mxu1 %v2690_v46  ;;  %1274 = vmatpush1.bf16.msra.mxu0 %v2691_v51  ;;  %v195_v46 = vpack.c.bf16 %v189_v40, %v189_v40  ;;  %v2731_v51 = vld [vmem:[%s3838_s2 + $0x370] ss:$24 sps:$4 sm:$0xff]  }
  0x34   : > { %1103 = vmatprep.subr.bf16.mxu1 %v2692_v54  ;;  %1275 = vmatprep.subr.bf16.mxu0 %v2694_v55  ;;  %v466_v54 = vrot.slane %v464_v47, 1  ;;  %v2797_v40 = vld [vmem:[%s3837_s1 + $0x1b0] ss:$24 sps:$4 sm:$0xff]   ;;  %v2811_v47 = vld [vmem:[%s3837_s1 + $0x214] ss:$24 sps:$4 sm:$0xff]  }
  0x35   : > { %v469_v55 = vshll.u32 %v195_v46, 16  ;;  %v2808_v46 = vld [vmem:[%s3838_s2 + $0x21c] ss:$24 sps:$4 sm:$0xff]  }
  0x36   : > { %v467_v60 = vor.u32 %v466_v54, %v462_v53  ;;  %v2812_v53 = vld [vmem:[%s3838_s2 + $0x248] ss:$24 sps:$4 sm:$0xff]  }
  0x37   : > { %1104 = vmatpush1.bf16.msra.mxu1 %v2696_v56  ;;  %1276 = vmatpush1.bf16.msra.mxu0 %v2697_v57  ;;  %v2739_v56 = vld [vmem:[%s3838_s2 + $0x3a4] ss:$24 sps:$4 sm:$0xff]   ;;  %v2734_v57 = vld [vmem:[%s3838_s2 + $0x390] ss:$24 sps:$4 sm:$0xff]   ;;  %v471_v61 = vrot.slane %v469_v55, 1 }
  0x38   : > { %1105 = vmatprep.subr.bf16.mxu1 %v2698_v1  ;;  %1277 = vmatprep.subr.bf16.mxu0 %v2700_v6  ;;  %v2743_v1 = vld [vmem:[%s3837_s1] ss:$24 sps:$4 sm:$0xff]   ;;  %v2749_v6 = vld [vmem:[%s3837_s1 + $0x30] ss:$24 sps:$4 sm:$0xff]   ;;  %v2820_v55 = vld [vmem:[%s3838_s2 + $0x27c] ss:$24 sps:$4 sm:$0xff]  }
  0x39   : > { %v3327_v2 = vsel %vm436_vm0, %v467_v60, %v471_v61  ;;  %v2815_v54 = vld [vmem:[%s3837_s1 + $0x240] ss:$24 sps:$4 sm:$0xff]   ;;  %v2826_v60 = vld [vmem:[%s3838_s2 + $0x2ac] ss:$24 sps:$4 sm:$0xff]  }
  0x3a   : > { %v2829_v61 = vld [vmem:[%s3837_s1 + $0x2a4] ss:$24 sps:$4 sm:$0xff]  }
  0x3b   : > { %1106 = vmatpush1.bf16.msra.mxu1 %v2702_v10  ;;  %1278 = vmatpush1.bf16.msra.mxu0 %v2703_v11  ;;  %v2752_v10 = vld [vmem:[%s3838_s2 + $0x68] ss:$24 sps:$4 sm:$0xff]  }
  0x3c   : > { %1107 = vmatprep.subr.bf16.mxu1 %v2704_v15  ;;  %1279 = vmatprep.subr.bf16.mxu0 %v2706_v16  ;;  %v2755_v11 = vld [vmem:[%s3837_s1 + $0x60] ss:$24 sps:$4 sm:$0xff]   ;;  %v2761_v15 = vld [vmem:[%s3837_s1 + $0x90] ss:$24 sps:$4 sm:$0xff]   ;;  %v2766_v16 = vld [vmem:[%s3838_s2 + $0xcc] ss:$24 sps:$4 sm:$0xff]  }
  0x3f   : > { %1108 = vmatpush1.bf16.msra.mxu1 %v2708_v17  ;;  %1280 = vmatpush1.bf16.msra.mxu0 %v2709_v18  ;;  %v2769_v17 = vld [vmem:[%s3837_s1 + $0xc4] ss:$24 sps:$4 sm:$0xff]   ;;  %v2764_v18 = vld [vmem:[%s3838_s2 + $0xc8] ss:$24 sps:$4 sm:$0xff]  }
  0x40   : > { %1109 = vmatprep.subr.bf16.mxu1 %v2710_v20  ;;  %1281 = vmatprep.subr.bf16.mxu0 %v2712_v21  ;;  %v2772_v20 = vld [vmem:[%s3838_s2 + $0xfc] ss:$24 sps:$4 sm:$0xff]  }
  0x41   : > { %v2775_v21 = vld [vmem:[%s3837_s1 + $0xf4] ss:$24 sps:$4 sm:$0xff]  }
  0x43   : > { %1110 = vmatpush1.bf16.msra.mxu1 %v2714_v27  ;;  %1282 = vmatpush1.bf16.msra.mxu0 %v2715_v28  ;;  %v2779_v27 = vld [vmem:[%s3837_s1 + $0x120] ss:$24 sps:$4 sm:$0xff]   ;;  %v2784_v28 = vld [vmem:[%s3838_s2 + $0x15c] ss:$24 sps:$4 sm:$0xff]  }
  0x44   : > { %1122 = vmatprep.subr.bf16.mxu1 %v2718_v29  ;;  %1294 = vmatprep.subr.bf16.mxu0 %v2721_v30  ;;  %v2787_v29 = vld [vmem:[%s3837_s1 + $0x154] ss:$24 sps:$4 sm:$0xff]   ;;  %v2782_v30 = vld [vmem:[%s3838_s2 + $0x158] ss:$24 sps:$4 sm:$0xff]  }
  0x46   : > { %1112 = vmatmul.mubr.bf16.vlgmr.msra.gmra.mrb[0].mxu1 %v3268_v38  ;;  %1284 = vmatmul.mubr.bf16.vlgmr.msra.gmra.mrb[0].mxu0 %v3268_v38 }
  0x47   : > { %1123 = vmatpush1.bf16.msra.mxu1 %v2716_v36  ;;  %1295 = vmatpush1.bf16.msra.mxu0 %v2719_v37  ;;  %v2796_v36 = vld [vmem:[%s3838_s2 + $0x1bc] ss:$24 sps:$4 sm:$0xff]  }
  0x48   : > { %1124 = vmatprep.subr.bf16.mxu1 %v2724_v39  ;;  %1296 = vmatprep.subr.bf16.mxu0 %v2727_v42  ;;  %v2799_v37 = vld [vmem:[%s3837_s1 + $0x1b4] ss:$24 sps:$4 sm:$0xff]   ;;  %v2794_v39 = vld [vmem:[%s3838_s2 + $0x1b8] ss:$24 sps:$4 sm:$0xff]  }
  0x49   : > { %1154 = vmatprep.mubr.bf16.mxu1 %v3000_v50  ;;  %1326 = vmatprep.mubr.bf16.mxu0 %v3000_v50  ;;  %v2802_v42 = vld [vmem:[%s3838_s2 + $0x1ec] ss:$24 sps:$4 sm:$0xff]  }
  0x4b   : > { %1125 = vmatpush1.bf16.msra.mxu1 %v2722_v43  ;;  %1297 = vmatpush1.bf16.msra.mxu0 %v2725_v44  ;;  %v2805_v43 = vld [vmem:[%s3837_s1 + $0x1e4] ss:$24 sps:$4 sm:$0xff]   ;;  %v2800_v44 = vld [vmem:[%s3838_s2 + $0x1e8] ss:$24 sps:$4 sm:$0xff]  }
  0x4c   : > { %1126 = vmatprep.subr.bf16.mxu1 %v2730_v45  ;;  %1298 = vmatprep.subr.bf16.mxu0 %v2733_v48  ;;  %v2803_v45 = vld [vmem:[%s3837_s1 + $0x1e0] ss:$24 sps:$4 sm:$0xff]  }
  0x4d   : > { %v2806_v48 = vld [vmem:[%s3838_s2 + $0x218] ss:$24 sps:$4 sm:$0xff]  }
  0x4f   : > { %1127 = vmatpush1.bf16.msra.mxu1 %v2728_v49  ;;  %1299 = vmatpush1.bf16.msra.mxu0 %v2731_v51  ;;  %v2809_v49 = vld [vmem:[%s3837_s1 + $0x210] ss:$24 sps:$4 sm:$0xff]   ;;  %v2814_v51 = vld [vmem:[%s3838_s2 + $0x24c] ss:$24 sps:$4 sm:$0xff]  }
  0x50   : > { %1128 = vmatprep.subr.bf16.mxu1 %v2736_v52  ;;  %1300 = vmatprep.subr.bf16.mxu0 %v2739_v56  ;;  %v2817_v52 = vld [vmem:[%s3837_s1 + $0x244] ss:$24 sps:$4 sm:$0xff]   ;;  %v2823_v56 = vld [vmem:[%s3837_s1 + $0x274] ss:$24 sps:$4 sm:$0xff]  }
  0x53   : > { %1129 = vmatpush1.bf16.msra.mxu1 %v2734_v57  ;;  %1301 = vmatpush1.bf16.msra.mxu0 %v2737_v59  ;;  %v2818_v57 = vld [vmem:[%s3838_s2 + $0x278] ss:$24 sps:$4 sm:$0xff]  }
  0x54   : > { %1165 = vmatprep.subr.bf16.mxu1 %v2742_v62  ;;  %1939 = vmatprep.subr.bf16.mxu0 %v2745_v63  ;;  %v2821_v59 = vld [vmem:[%s3837_s1 + $0x270] ss:$24 sps:$4 sm:$0xff]   ;;  %v2827_v63 = vld [vmem:[%s3837_s1 + $0x2a0] ss:$24 sps:$4 sm:$0xff]  }
  0x55   : > { %v2824_v62 = vld [vmem:[%s3838_s2 + $0x2a8] ss:$24 sps:$4 sm:$0xff]  }
  0x56   : > { %2445 = vmatmul.mubr.msk.bf16.vlgmr.msra.gmra.mrb[0].mxu1 %vm1075_vm1, %v3327_v2  ;;  %2447 = vmatmul.mubr.msk.bf16.vlgmr.msra.gmra.mrb[0].mxu0 %vm1075_vm1, %v3327_v2 }
  0x57   : > { %1166 = vmatpush1.bf16.msra.mxu1 %v2740_v0  ;;  %1940 = vmatpush1.bf16.msra.mxu0 %v2743_v1  ;;  %v2832_v0 = vld [vmem:[%s3838_s2 + $0x2dc] ss:$24 sps:$4 sm:$0xff]  }
  0x58   : > { %1167 = vmatprep.subr.bf16.mxu1 %v2748_v3  ;;  %1941 = vmatprep.subr.bf16.mxu0 %v2751_v4  ;;  %v2835_v1 = vld [vmem:[%s3837_s1 + $0x2d4] ss:$24 sps:$4 sm:$0xff]   ;;  %v2830_v3 = vld [vmem:[%s3838_s2 + $0x2d8] ss:$24 sps:$4 sm:$0xff]  }
  0x59   : > { %1197 = vmatprep.mubr.bf16.mxu1 %v3235_v19  ;;  %1971 = vmatprep.mubr.bf16.mxu0 %v3200_v58  ;;  %v2767_v19 = vld [vmem:[%s3837_s1 + $0xc0] ss:$24 sps:$4 sm:$0xff]   ;;  %v2833_v4 = vld [vmem:[%s3837_s1 + $0x2d0] ss:$24 sps:$4 sm:$0xff]  }
  0x5b   : > { %1168 = vmatpush1.bf16.msra.mxu1 %v2746_v5  ;;  %1942 = vmatpush1.bf16.msra.mxu0 %v2749_v6  ;;  %v2838_v5 = vld [vmem:[%s3838_s2 + $0x30c] ss:$24 sps:$4 sm:$0xff]  }
  0x5c   : > { %1169 = vmatprep.subr.bf16.mxu1 %v2754_v8  ;;  %1943 = vmatprep.subr.bf16.mxu0 %v2757_v9  ;;  %v2841_v6 = vld [vmem:[%s3837_s1 + $0x304] ss:$24 sps:$4 sm:$0xff]   ;;  %v2836_v8 = vld [vmem:[%s3838_s2 + $0x308] ss:$24 sps:$4 sm:$0xff]  }
  0x5d   : > { %v2839_v9 = vld [vmem:[%s3837_s1 + $0x300] ss:$24 sps:$4 sm:$0xff]  }
  0x5f   : > { %1170 = vmatpush1.bf16.msra.mxu1 %v2752_v10  ;;  %1944 = vmatpush1.bf16.msra.mxu0 %v2755_v11  ;;  %v2844_v10 = vld [vmem:[%s3838_s2 + $0x33c] ss:$24 sps:$4 sm:$0xff]  }
  0x60   : > { %1171 = vmatprep.subr.bf16.mxu1 %v2760_v12  ;;  %1945 = vmatprep.subr.bf16.mxu0 %v2763_v13  ;;  %v2847_v11 = vld [vmem:[%s3837_s1 + $0x334] ss:$24 sps:$4 sm:$0xff]   ;;  %v2842_v12 = vld [vmem:[%s3838_s2 + $0x338] ss:$24 sps:$4 sm:$0xff]  }
  0x61   : > { %v2845_v13 = vld [vmem:[%s3837_s1 + $0x330] ss:$24 sps:$4 sm:$0xff]  }
  0x63   : > { %1172 = vmatpush1.bf16.msra.mxu1 %v2758_v14  ;;  %1946 = vmatpush1.bf16.msra.mxu0 %v2761_v15  ;;  %v2850_v14 = vld [vmem:[%s3838_s2 + $0x36c] ss:$24 sps:$4 sm:$0xff]   ;;  %v2848_v15 = vld [vmem:[%s3838_s2 + $0x368] ss:$24 sps:$4 sm:$0xff]  }
  0x64   : > { %1173 = vmatprep.subr.bf16.mxu1 %v2766_v16  ;;  %1947 = vmatprep.subr.bf16.mxu0 %v2769_v17  ;;  %v2851_v16 = vld [vmem:[%s3837_s1 + $0x360] ss:$24 sps:$4 sm:$0xff]   ;;  %v2856_v17 = vld [vmem:[%s3838_s2 + $0x39c] ss:$24 sps:$4 sm:$0xff]  }
  0x67   : > { %1174 = vmatpush1.bf16.msra.mxu1 %v2764_v18  ;;  %1948 = vmatpush1.bf16.msra.mxu0 %v2767_v19  ;;  %v2859_v18 = vld [vmem:[%s3837_s1 + $0x394] ss:$24 sps:$4 sm:$0xff]   ;;  %v2854_v19 = vld [vmem:[%s3838_s2 + $0x398] ss:$24 sps:$4 sm:$0xff]  }
  0x68   : > { %1175 = vmatprep.subr.bf16.mxu1 %v2772_v20  ;;  %1949 = vmatprep.subr.bf16.mxu0 %v2775_v21  ;;  %v2857_v20 = vld [vmem:[%s3837_s1 + $0x390] ss:$24 sps:$4 sm:$0xff]   ;;  %v2862_v21 = vld [vmem:[%s3837_s1 + $0xc] ss:$24 sps:$4 sm:$0xff]  }
  0x6b   : > { %1176 = vmatpush1.bf16.msra.mxu1 %v2770_v22  ;;  %1950 = vmatpush1.bf16.msra.mxu0 %v2773_v23  ;;  %v2865_v22 = vld [vmem:[%s3837_s1 + $0x14] ss:$24 sps:$4 sm:$0xff]   ;;  %v2860_v23 = vld [vmem:[%s3837_s1 + $0x8] ss:$24 sps:$4 sm:$0xff]  }
  0x6c   : > { %1177 = vmatprep.subr.bf16.mxu1 %v2778_v24  ;;  %1951 = vmatprep.subr.bf16.mxu0 %v2781_v25  ;;  %v2863_v24 = vld [vmem:[%s3837_s1 + $0x10] ss:$24 sps:$4 sm:$0xff]   ;;  %v2868_v25 = vld [vmem:[%s3837_s1 + $0x3c] ss:$24 sps:$4 sm:$0xff]  }
  0x6f   : > { %1178 = vmatpush1.bf16.msra.mxu1 %v2776_v26  ;;  %1952 = vmatpush1.bf16.msra.mxu0 %v2779_v27  ;;  %v2871_v26 = vld [vmem:[%s3837_s1 + $0x44] ss:$24 sps:$4 sm:$0xff]   ;;  %v2866_v27 = vld [vmem:[%s3837_s1 + $0x38] ss:$24 sps:$4 sm:$0xff]  }
  0x70   : > { %1179 = vmatprep.subr.bf16.mxu1 %v2784_v28  ;;  %1953 = vmatprep.subr.bf16.mxu0 %v2787_v29  ;;  %v2869_v28 = vld [vmem:[%s3837_s1 + $0x40] ss:$24 sps:$4 sm:$0xff]   ;;  %v2874_v29 = vld [vmem:[%s3837_s1 + $0x6c] ss:$24 sps:$4 sm:$0xff]  }
  0x73   : > { %1180 = vmatpush1.bf16.msra.mxu1 %v2782_v30  ;;  %1954 = vmatpush1.bf16.msra.mxu0 %v2785_v31  ;;  %v2872_v30 = vld [vmem:[%s3837_s1 + $0x68] ss:$24 sps:$4 sm:$0xff]  }
  0x74   : > { %1181 = vmatprep.subr.bf16.mxu1 %v2790_v32  ;;  %1955 = vmatprep.subr.bf16.mxu0 %v2793_v33  ;;  %v2875_v31 = vld [vmem:[%s3837_s1 + $0x70] ss:$24 sps:$4 sm:$0xff]   ;;  %v2880_v32 = vld [vmem:[%s3837_s1 + $0x9c] ss:$24 sps:$4 sm:$0xff]  }
  0x75   : > { %v2878_v33 = vld [vmem:[%s3837_s1 + $0x98] ss:$24 sps:$4 sm:$0xff]  }
  0x77   : > { %1182 = vmatpush1.bf16.msra.mxu1 %v2788_v34  ;;  %1956 = vmatpush1.bf16.msra.mxu0 %v2791_v35  ;;  %v2881_v34 = vld [vmem:[%s3837_s1 + $0xa0] ss:$24 sps:$4 sm:$0xff]   ;;  %v2886_v35 = vld [vmem:[%s3837_s1 + $0xcc] ss:$24 sps:$4 sm:$0xff]  }
  0x78   : > { %1183 = vmatprep.subr.bf16.mxu1 %v2796_v36  ;;  %1957 = vmatprep.subr.bf16.mxu0 %v2799_v37  ;;  %v2889_v36 = vld [vmem:[%s3837_s1 + $0xd4] ss:$24 sps:$4 sm:$0xff]   ;;  %v2884_v37 = vld [vmem:[%s3837_s1 + $0xc8] ss:$24 sps:$4 sm:$0xff]  }
  0x7b   : > { %1184 = vmatpush1.bf16.msra.mxu1 %v2794_v39  ;;  %1958 = vmatpush1.bf16.msra.mxu0 %v2797_v40  ;;  %v2887_v39 = vld [vmem:[%s3837_s1 + $0xd0] ss:$24 sps:$4 sm:$0xff]   ;;  %v2892_v40 = vld [vmem:[%s3837_s1 + $0xfc] ss:$24 sps:$4 sm:$0xff]  }
  0x7c   : > { %1185 = vmatprep.subr.bf16.mxu1 %v2802_v42  ;;  %1959 = vmatprep.subr.bf16.mxu0 %v2805_v43  ;;  %v2895_v42 = vld [vmem:[%s3837_s1 + $0x104] ss:$24 sps:$4 sm:$0xff]   ;;  %v2890_v43 = vld [vmem:[%s3837_s1 + $0xf8] ss:$24 sps:$4 sm:$0xff]  }
  0x7f   : > { %1186 = vmatpush1.bf16.msra.mxu1 %v2800_v44  ;;  %1960 = vmatpush1.bf16.msra.mxu0 %v2803_v45  ;;  %v2893_v44 = vld [vmem:[%s3837_s1 + $0x100] ss:$24 sps:$4 sm:$0xff]   ;;  %v2898_v45 = vld [vmem:[%s3837_s1 + $0x12c] ss:$24 sps:$4 sm:$0xff]  }
  0x80   : > { %1187 = vmatprep.subr.bf16.mxu1 %v2808_v46  ;;  %1961 = vmatprep.subr.bf16.mxu0 %v2811_v47  ;;  %v2901_v46 = vld [vmem:[%s3837_s1 + $0x134] ss:$24 sps:$4 sm:$0xff]   ;;  %v2896_v47 = vld [vmem:[%s3837_s1 + $0x128] ss:$24 sps:$4 sm:$0xff]  }
  0x83   : > { %1188 = vmatpush1.bf16.msra.mxu1 %v2806_v48  ;;  %1962 = vmatpush1.bf16.msra.mxu0 %v2809_v49  ;;  %v2899_v48 = vld [vmem:[%s3837_s1 + $0x130] ss:$24 sps:$4 sm:$0xff]   ;;  %v2904_v49 = vld [vmem:[%s3837_s1 + $0x15c] ss:$24 sps:$4 sm:$0xff]  }
  0x84   : > { %1189 = vmatprep.subr.bf16.mxu1 %v2814_v51  ;;  %1963 = vmatprep.subr.bf16.mxu0 %v2817_v52  ;;  %v2907_v51 = vld [vmem:[%s3837_s1 + $0x164] ss:$24 sps:$4 sm:$0xff]   ;;  %v2902_v52 = vld [vmem:[%s3837_s1 + $0x158] ss:$24 sps:$4 sm:$0xff]  }
  0x87   : > { %1190 = vmatpush1.bf16.msra.mxu1 %v2812_v53  ;;  %1964 = vmatpush1.bf16.msra.mxu0 %v2815_v54  ;;  %v2905_v53 = vld [vmem:[%s3837_s1 + $0x160] ss:$24 sps:$4 sm:$0xff]   ;;  %v2910_v54 = vld [vmem:[%s3837_s1 + $0x18c] ss:$24 sps:$4 sm:$0xff]  }
  0x88   : > { %1191 = vmatprep.subr.bf16.mxu1 %v2820_v55  ;;  %1965 = vmatprep.subr.bf16.mxu0 %v2823_v56  ;;  %v2913_v55 = vld [vmem:[%s3837_s1 + $0x194] ss:$24 sps:$4 sm:$0xff]   ;;  %v2908_v56 = vld [vmem:[%s3837_s1 + $0x188] ss:$24 sps:$4 sm:$0xff]  }
  0x8b   : > { %1192 = vmatpush1.bf16.msra.mxu1 %v2818_v57  ;;  %1966 = vmatpush1.bf16.msra.mxu0 %v2821_v59  ;;  %v2911_v57 = vld [vmem:[%s3837_s1 + $0x190] ss:$24 sps:$4 sm:$0xff]   ;;  %v2916_v59 = vld [vmem:[%s3837_s1 + $0x1bc] ss:$24 sps:$4 sm:$0xff]  }
  0x8c   : > { %1193 = vmatprep.subr.bf16.mxu1 %v2826_v60  ;;  %1967 = vmatprep.subr.bf16.mxu0 %v2829_v61  ;;  %v2919_v60 = vld [vmem:[%s3837_s1 + $0x1c4] ss:$24 sps:$4 sm:$0xff]   ;;  %v2914_v61 = vld [vmem:[%s3837_s1 + $0x1b8] ss:$24 sps:$4 sm:$0xff]  }
  0x8f   : > { %1194 = vmatpush1.bf16.msra.mxu1 %v2824_v62  ;;  %1968 = vmatpush1.bf16.msra.mxu0 %v2827_v63  ;;  %v2917_v62 = vld [vmem:[%s3837_s1 + $0x1c0] ss:$24 sps:$4 sm:$0xff]   ;;  %v2922_v63 = vld [vmem:[%s3837_s1 + $0x1ec] ss:$24 sps:$4 sm:$0xff]  }
  0x90   : > { %1195 = vmatprep.subr.bf16.mxu1 %v2832_v0  ;;  %1969 = vmatprep.subr.bf16.mxu0 %v2835_v1  ;;  %v2925_v0 = vld [vmem:[%s3837_s1 + $0x1f4] ss:$24 sps:$4 sm:$0xff]   ;;  %v2920_v1 = vld [vmem:[%s3837_s1 + $0x1e8] ss:$24 sps:$4 sm:$0xff]  }
  0x93   : > { %1196 = vmatpush1.bf16.msra.mxu1 %v2830_v3  ;;  %1970 = vmatpush1.bf16.msra.mxu0 %v2833_v4  ;;  %v2923_v3 = vld [vmem:[%s3837_s1 + $0x1f0] ss:$24 sps:$4 sm:$0xff]   ;;  %v2928_v4 = vld [vmem:[%s3837_s1 + $0x21c] ss:$24 sps:$4 sm:$0xff]  }
  0x94   : > { %1208 = vmatprep.subr.bf16.mxu1 %v2838_v5  ;;  %1982 = vmatprep.subr.bf16.mxu0 %v2841_v6  ;;  %v2931_v5 = vld [vmem:[%s3837_s1 + $0x224] ss:$24 sps:$4 sm:$0xff]   ;;  %v2926_v6 = vld [vmem:[%s3837_s1 + $0x218] ss:$24 sps:$4 sm:$0xff]  }
  0x96   : > { %1198 = vmatmul.mubr.bf16.vlgmr.msra.gmra.mrb[4].mxu1 %v3268_v38  ;;  %1972 = vmatmul.mubr.bf16.vlgmr.msra.gmra.mrb[4].mxu0 %v3213_v7  ;;  %v2853_v38 = vld [vmem:[%s3837_s1 + $0x364] ss:$24 sps:$4 sm:$0xff]  }
  0x97   : > { %1209 = vmatpush1.bf16.msra.mxu1 %v2836_v8  ;;  %1983 = vmatpush1.bf16.msra.mxu0 %v2839_v9  ;;  %v2929_v8 = vld [vmem:[%s3837_s1 + $0x220] ss:$24 sps:$4 sm:$0xff]   ;;  %v2934_v9 = vld [vmem:[%s3837_s1 + $0x24c] ss:$24 sps:$4 sm:$0xff]  }
  0x98   : > { %1210 = vmatprep.subr.bf16.mxu1 %v2844_v10  ;;  %1984 = vmatprep.subr.bf16.mxu0 %v2847_v11  ;;  %v2937_v10 = vld [vmem:[%s3837_s1 + $0x254] ss:$24 sps:$4 sm:$0xff]   ;;  %v2932_v11 = vld [vmem:[%s3837_s1 + $0x248] ss:$24 sps:$4 sm:$0xff]  }
  0x99   : > { %2014 = vmatprep.mubr.bf16.mxu0 %v3000_v50  ;;  %1240 = vmatprep.mubr.bf16.mxu1 %v3000_v50 }
  0x9b   : > { %1211 = vmatpush1.bf16.msra.mxu1 %v2842_v12  ;;  %1985 = vmatpush1.bf16.msra.mxu0 %v2845_v13  ;;  %v2935_v12 = vld [vmem:[%s3837_s1 + $0x250] ss:$24 sps:$4 sm:$0xff]   ;;  %v2940_v13 = vld [vmem:[%s3837_s1 + $0x27c] ss:$24 sps:$4 sm:$0xff]  }
  0x9c   : > { %1212 = vmatprep.subr.bf16.mxu1 %v2850_v14  ;;  %1986 = vmatprep.subr.bf16.mxu0 %v2853_v38  ;;  %v2943_v14 = vld [vmem:[%s3837_s1 + $0x284] ss:$24 sps:$4 sm:$0xff]   ;;  %v2938_v38 = vld [vmem:[%s3837_s1 + $0x278] ss:$24 sps:$4 sm:$0xff]  }
  0x9f   : > { %1213 = vmatpush1.bf16.msra.mxu1 %v2848_v15  ;;  %1987 = vmatpush1.bf16.msra.mxu0 %v2851_v16  ;;  %v2941_v15 = vld [vmem:[%s3837_s1 + $0x280] ss:$24 sps:$4 sm:$0xff]   ;;  %v2946_v16 = vld [vmem:[%s3837_s1 + $0x2ac] ss:$24 sps:$4 sm:$0xff]  }
  0xa0   : > { %1214 = vmatprep.subr.bf16.mxu1 %v2856_v17  ;;  %1988 = vmatprep.subr.bf16.mxu0 %v2859_v18  ;;  %v2949_v17 = vld [vmem:[%s3837_s1 + $0x2b4] ss:$24 sps:$4 sm:$0xff]   ;;  %v2944_v18 = vld [vmem:[%s3837_s1 + $0x2a8] ss:$24 sps:$4 sm:$0xff]  }
  0xa3   : > { %1215 = vmatpush1.bf16.msra.mxu1 %v2854_v19  ;;  %1989 = vmatpush1.bf16.msra.mxu0 %v2857_v20  ;;  %v2947_v19 = vld [vmem:[%s3837_s1 + $0x2b0] ss:$24 sps:$4 sm:$0xff]   ;;  %v2952_v20 = vld [vmem:[%s3837_s1 + $0x2dc] ss:$24 sps:$4 sm:$0xff]  }
  0xa4   : > { %2025 = vmatprep.subr.bf16.mxu1 %v2862_v21  ;;  %2111 = vmatprep.subr.bf16.mxu0 %v2865_v22  ;;  %v2955_v21 = vld [vmem:[%s3837_s1 + $0x2e4] ss:$24 sps:$4 sm:$0xff]   ;;  %v2950_v22 = vld [vmem:[%s3837_s1 + $0x2d8] ss:$24 sps:$4 sm:$0xff]  }
  0xa6   : > { %2568 = vmatmul.mubr.msk.bf16.vlgmr.msra.gmra.mrb[4].mxu0 %vm1075_vm1, %v3273_v41  ;;  %2446 = vmatmul.mubr.msk.bf16.vlgmr.msra.gmra.mrb[4].mxu1 %vm1075_vm1, %v3327_v2  ;;  %v2877_v2 = vld [vmem:[%s3837_s1 + $0x74] ss:$24 sps:$4 sm:$0xff]  }
  0xa7   : > { %2026 = vmatpush1.bf16.msra.mxu1 %v2860_v23  ;;  %2112 = vmatpush1.bf16.msra.mxu0 %v2863_v24  ;;  %v2953_v23 = vld [vmem:[%s3837_s1 + $0x2e0] ss:$24 sps:$4 sm:$0xff]   ;;  %v2958_v24 = vld [vmem:[%s3837_s1 + $0x30c] ss:$24 sps:$4 sm:$0xff]  }
  0xa8   : > { %2027 = vmatprep.subr.bf16.mxu1 %v2868_v25  ;;  %2113 = vmatprep.subr.bf16.mxu0 %v2871_v26  ;;  %v2961_v25 = vld [vmem:[%s3837_s1 + $0x314] ss:$24 sps:$4 sm:$0xff]   ;;  %v2956_v26 = vld [vmem:[%s3837_s1 + $0x308] ss:$24 sps:$4 sm:$0xff]  }
  0xa9   : > { %2057 = vmatprep.mubr.bf16.mxu1 %v3200_v58  ;;  %2143 = vmatprep.mubr.bf16.mxu0 %v3200_v58  ;;  %v2883_v58 = vld [vmem:[%s3837_s1 + $0xa4] ss:$24 sps:$4 sm:$0xff]  }
  0xab   : > { %2028 = vmatpush1.bf16.msra.mxu1 %v2866_v27  ;;  %2114 = vmatpush1.bf16.msra.mxu0 %v2869_v28  ;;  %v2959_v27 = vld [vmem:[%s3837_s1 + $0x310] ss:$24 sps:$4 sm:$0xff]   ;;  %v2964_v28 = vld [vmem:[%s3837_s1 + $0x33c] ss:$24 sps:$4 sm:$0xff]  }
  0xac   : > { %2029 = vmatprep.subr.bf16.mxu1 %v2874_v29  ;;  %2115 = vmatprep.subr.bf16.mxu0 %v2877_v2  ;;  %v2967_v29 = vld [vmem:[%s3837_s1 + $0x344] ss:$24 sps:$4 sm:$0xff]   ;;  %v2962_v2 = vld [vmem:[%s3837_s1 + $0x338] ss:$24 sps:$4 sm:$0xff]  }
  0xaf   : > { %2030 = vmatpush1.bf16.msra.mxu1 %v2872_v30  ;;  %2116 = vmatpush1.bf16.msra.mxu0 %v2875_v31  ;;  %v2965_v30 = vld [vmem:[%s3837_s1 + $0x340] ss:$24 sps:$4 sm:$0xff]   ;;  %v2970_v31 = vld [vmem:[%s3837_s1 + $0x36c] ss:$24 sps:$4 sm:$0xff]  }
  0xb0   : > { %2031 = vmatprep.subr.bf16.mxu1 %v2880_v32  ;;  %2117 = vmatprep.subr.bf16.mxu0 %v2883_v58  ;;  %v2968_v32 = vld [vmem:[%s3837_s1 + $0x368] ss:$24 sps:$4 sm:$0xff]  }
  0xb1   : > { %v2971_v58 = vld [vmem:[%s3837_s1 + $0x370] ss:$24 sps:$4 sm:$0xff]  }
  0xb3   : > { %2032 = vmatpush1.bf16.msra.mxu1 %v2878_v33  ;;  %2118 = vmatpush1.bf16.msra.mxu0 %v2881_v34  ;;  %v2976_v33 = vld [vmem:[%s3837_s1 + $0x39c] ss:$24 sps:$4 sm:$0xff]   ;;  %v2974_v34 = vld [vmem:[%s3837_s1 + $0x398] ss:$24 sps:$4 sm:$0xff]  }
  0xb4   : > { %2033 = vmatprep.subr.bf16.mxu1 %v2886_v35  ;;  %2119 = vmatprep.subr.bf16.mxu0 %v2889_v36  ;;  %v2977_v35 = vld [vmem:[%s3837_s1 + $0x3a0] ss:$24 sps:$4 sm:$0xff]  }
  0xb7   : > { %2034 = vmatpush1.bf16.msra.mxu1 %v2884_v37  ;;  %2120 = vmatpush1.bf16.msra.mxu0 %v2887_v39 }
  0xb8   : > { %2035 = vmatprep.subr.bf16.mxu1 %v2892_v40  ;;  %2121 = vmatprep.subr.bf16.mxu0 %v2895_v42 }
  0xbb   : > { %2036 = vmatpush1.bf16.msra.mxu1 %v2890_v43  ;;  %2122 = vmatpush1.bf16.msra.mxu0 %v2893_v44 }
  0xbc   : > { %2037 = vmatprep.subr.bf16.mxu1 %v2898_v45  ;;  %2123 = vmatprep.subr.bf16.mxu0 %v2901_v46 }
  0xbf   : > { %2038 = vmatpush1.bf16.msra.mxu1 %v2896_v47  ;;  %2124 = vmatpush1.bf16.msra.mxu0 %v2899_v48 }
  0xc0   : > { %2039 = vmatprep.subr.bf16.mxu1 %v2904_v49  ;;  %2125 = vmatprep.subr.bf16.mxu0 %v2907_v51 }
  0xc3   : > { %2040 = vmatpush1.bf16.msra.mxu1 %v2902_v52  ;;  %2126 = vmatpush1.bf16.msra.mxu0 %v2905_v53 }
  0xc4   : > { %2041 = vmatprep.subr.bf16.mxu1 %v2910_v54  ;;  %2127 = vmatprep.subr.bf16.mxu0 %v2913_v55 }
  0xc7   : > { %2042 = vmatpush1.bf16.msra.mxu1 %v2908_v56  ;;  %2128 = vmatpush1.bf16.msra.mxu0 %v2911_v57 }
  0xc8   : > { %2043 = vmatprep.subr.bf16.mxu1 %v2916_v59  ;;  %2129 = vmatprep.subr.bf16.mxu0 %v2919_v60 }
  0xcb   : > { %2044 = vmatpush1.bf16.msra.mxu1 %v2914_v61  ;;  %2130 = vmatpush1.bf16.msra.mxu0 %v2917_v62 }
  0xcc   : > { %2045 = vmatprep.subr.bf16.mxu1 %v2922_v63  ;;  %2131 = vmatprep.subr.bf16.mxu0 %v2925_v0 }
  0xcf   : > { %2046 = vmatpush1.bf16.msra.mxu1 %v2920_v1  ;;  %2132 = vmatpush1.bf16.msra.mxu0 %v2923_v3 }
  0xd0   : > { %2047 = vmatprep.subr.bf16.mxu1 %v2928_v4  ;;  %2133 = vmatprep.subr.bf16.mxu0 %v2931_v5 }
  0xd3   : > { %2048 = vmatpush1.bf16.msra.mxu1 %v2926_v6  ;;  %2134 = vmatpush1.bf16.msra.mxu0 %v2929_v8 }
  0xd4   : > { %2049 = vmatprep.subr.bf16.mxu1 %v2934_v9  ;;  %2135 = vmatprep.subr.bf16.mxu0 %v2937_v10 }
  0xd7   : > { %2050 = vmatpush1.bf16.msra.mxu1 %v2932_v11  ;;  %2136 = vmatpush1.bf16.msra.mxu0 %v2935_v12 }
  0xd8   : > { %2051 = vmatprep.subr.bf16.mxu1 %v2940_v13  ;;  %2137 = vmatprep.subr.bf16.mxu0 %v2943_v14 }
  0xdb   : > { %2052 = vmatpush1.bf16.msra.mxu1 %v2938_v38  ;;  %2138 = vmatpush1.bf16.msra.mxu0 %v2941_v15 }
  0xdc   : > { %2053 = vmatprep.subr.bf16.mxu1 %v2946_v16  ;;  %2139 = vmatprep.subr.bf16.mxu0 %v2949_v17 }
  0xdf   : > { %2054 = vmatpush1.bf16.msra.mxu1 %v2944_v18  ;;  %2140 = vmatpush1.bf16.msra.mxu0 %v2947_v19 }
  0xe0   : > { %2055 = vmatprep.subr.bf16.mxu1 %v2952_v20  ;;  %2141 = vmatprep.subr.bf16.mxu0 %v2955_v21 }
  0xe3   : > { %2056 = vmatpush1.bf16.msra.mxu1 %v2950_v22  ;;  %2142 = vmatpush1.bf16.msra.mxu0 %v2953_v23 }
  0xe4   : > { %2068 = vmatprep.subr.bf16.mxu1 %v2958_v24  ;;  %2154 = vmatprep.subr.bf16.mxu0 %v2961_v25 }
  0xe6   : > { %2058 = vmatmul.mubr.bf16.vlgmr.msra.gmra.mrb[4].mxu1 %v3213_v7  ;;  %2144 = vmatmul.mubr.bf16.vlgmr.msra.gmra.mrb[0].mxu0 %v3213_v7  ;;  %v2973_v7 = vld [vmem:[%s3837_s1 + $0x374] ss:$24 sps:$4 sm:$0xff]  }
  0xe7   : > { %2069 = vmatpush1.bf16.msra.mxu1 %v2956_v26  ;;  %2155 = vmatpush1.bf16.msra.mxu0 %v2959_v27 }
  0xe8   : > { %2070 = vmatprep.subr.bf16.mxu1 %v2964_v28  ;;  %2156 = vmatprep.subr.bf16.mxu0 %v2967_v29 }
  0xe9   : > { %2100 = vmatprep.mubr.bf16.mxu1 %v3000_v50  ;;  %2186 = vmatprep.mubr.bf16.mxu0 %v3000_v50  ;;  %v2979_v50 = vld [vmem:[%s3837_s1 + $0x3a4] ss:$24 sps:$4 sm:$0xff]  }
  0xeb   : > { %2071 = vmatpush1.bf16.msra.mxu1 %v2962_v2  ;;  %2157 = vmatpush1.bf16.msra.mxu0 %v2965_v30 }
  0xec   : > { %2072 = vmatprep.subr.bf16.mxu1 %v2970_v31  ;;  %2158 = vmatprep.subr.bf16.mxu0 %v2973_v7 }
  0xef   : > { %2073 = vmatpush1.bf16.msra.mxu1 %v2968_v32  ;;  %2159 = vmatpush1.bf16.msra.mxu0 %v2971_v58 }
  0xf0   : > { %2074 = vmatprep.subr.bf16.mxu1 %v2976_v33  ;;  %2160 = vmatprep.subr.bf16.mxu0 %v2979_v50 }
  0xf3   : > { %2075 = vmatpush1.bf16.msra.mxu1 %v2974_v34  ;;  %2161 = vmatpush1.bf16.msra.mxu0 %v2977_v35 }
  0xf6   : > { %2569 = vmatmul.mubr.msk.bf16.vlgmr.msra.gmra.mrb[4].mxu1 %vm1075_vm1, %v3273_v41  ;;  %2570 = vmatmul.mubr.msk.bf16.vlgmr.msra.gmra.mrb[0].mxu0 %vm1075_vm1, %v3273_v41 }
 0x129   : > { %v1156_v36 = vpop.f32.mrb[0].mxu1 }
 0x12a   : > { %v1158_v37 = vpop.f32.mrb[1].mxu1 }
 0x12b   : > { %v1160_v39 = vpop.f32.mrb[2].mxu1 }
 0x12c   : > { %v1162_v40 = vpop.f32.mrb[3].mxu1 }
 0x179   : > { %v2016_v42 = vpop.f32.mrb[4].mxu0 }
 0x17a   : > { %v2573_v43 = vadd.f32 %v2016_v42, %v1156_v36  ;;  %v2018_v44 = vpop.f32.mrb[5].mxu0 }
 0x17b   : > { %v2574_v45 = vadd.f32 %v2018_v44, %v1158_v37  ;;  %v2020_v46 = vpop.f32.mrb[6].mxu0 }
 0x17c   : > { %v2575_v47 = vadd.f32 %v2020_v46, %v1160_v39  ;;  %v2022_v48 = vpop.f32.mrb[7].mxu0  ;;  %v2197_v41 = vmul.f32 %v2573_v43, %v2573_v43 }
 0x17d   : > { %v2576_v49 = vadd.f32 %v2022_v48, %v1162_v40  ;;  %v2198_v53 = vmul.f32 %v2574_v45, %v2574_v45 }
 0x17e   : > { %v2200_v10 = vmul.f32 %v2575_v47, %v2575_v47 }
 0x17f   : > { %v2201_v11 = vmul.f32 %v2576_v49, %v2576_v49 }
 0x1c9   : > { %v2102_v51 = vpop.f32.mrb[4].mxu1  ;;  %v2188_v52 = vpop.f32.mrb[0].mxu0 }
 0x1ca   : > { %v2199_v54 = vmul.f32 %v2102_v51, %v2102_v51  ;;  %v2204_v55 = vmul.f32 %v2188_v52, %v2188_v52  ;;  %v2104_v56 = vpop.f32.mrb[5].mxu1  ;;  %v2190_v57 = vpop.f32.mrb[1].mxu0 }
 0x1cb   : > { %v2203_v59 = vmul.f32 %v2104_v56, %v2104_v56  ;;  %v2205_v60 = vmul.f32 %v2190_v57, %v2190_v57  ;;  %v2106_v61 = vpop.f32.mrb[6].mxu1  ;;  %v2192_v62 = vpop.f32.mrb[2].mxu0 }
 0x1cc   : > { %v2210_v63 = vadd.f32 %v2204_v55, %v2198_v53  ;;  %v2202_v0 = vmul.f32 %v2106_v61, %v2106_v61  ;;  %v2207_v1 = vmul.f32 %v2192_v62, %v2192_v62  ;;  %v2108_v3 = vpop.f32.mrb[7].mxu1  ;;  %v2194_v4 = vpop.f32.mrb[3].mxu0 }
 0x1cd   : > { %v2209_v5 = vadd.f32 %v2203_v59, %v2197_v41  ;;  %v2211_v6 = vadd.f32 %v2205_v60, %v2199_v54  ;;  %v2206_v8 = vmul.f32 %v2108_v3, %v2108_v3  ;;  %v2208_v9 = vmul.f32 %v2194_v4, %v2194_v4 }
 0x1ce   : > { %2980 = vrsqrt.f32 %v2210_v63  ;;  %v2213_v12 = vadd.f32 %v2207_v1, %v2201_v11  ;;  %vm2224_vm2 = vcmp.eq.f32.partialorder %v2210_v63, inf  ;;  %vm2226_vm3 = vcmp.eq.f32.partialorder %v2210_v63, 0.0 }
 0x1cf   : > { %2982 = vrsqrt.f32 %v2209_v5  ;;  %v2212_v13 = vadd.f32 %v2206_v8, %v2200_v10  ;;  %v2214_v14 = vadd.f32 %v2208_v9, %v2202_v0  ;;  %v2227_v18 = vand.u32 2147483648, %v2210_v63 }
 0x1d0   : > { %2984 = vrsqrt.f32 %v2211_v6  ;;  %vm2217_vm4 = vcmp.eq.f32.partialorder %v2209_v5, inf  ;;  %vm2219_vm5 = vcmp.eq.f32.partialorder %v2209_v5, 0.0  ;;  %v2220_v21 = vand.u32 2147483648, %v2209_v5 }
 0x1d1   : > { %2986 = vrsqrt.f32 %v2213_v12  ;;  %vm2231_vm6 = vcmp.eq.f32.partialorder %v2211_v6, inf  ;;  %v2234_v25 = vand.u32 2147483648, %v2211_v6  ;;  %vm2233_vm7 = vcmp.eq.f32.partialorder %v2211_v6, 0.0 }
 0x1d2   : > { %2988 = vrsqrt.f32 %v2212_v13  ;;  %vm2245_vm8 = vcmp.eq.f32.partialorder %v2213_v12, inf  ;;  %vm2247_vm9 = vcmp.eq.f32.partialorder %v2213_v12, 0.0  ;;  %v2248_v7 = vand.u32 2147483648, %v2213_v12 }
 0x1d3   : > { %2990 = vrsqrt.f32 %v2214_v14  ;;  %vm2238_vm10 = vcmp.eq.f32.partialorder %v2212_v13, inf  ;;  %vm2240_vm11 = vcmp.eq.f32.partialorder %v2212_v13, 0.0  ;;  %v2241_v33 = vand.u32 2147483648, %v2212_v13 }
 0x1d4   : > { %vm2252_vm12 = vcmp.eq.f32.partialorder %v2214_v14, inf  ;;  %v2255_v36 = vand.u32 2147483648, %v2214_v14  ;;  %vm2254_vm13 = vcmp.eq.f32.partialorder %v2214_v14, 0.0 }
 0x1d8   : > { %v2981_v38 = vpop.eup %2980 }
 0x1d9   : > { %v2983_v15 = vpop.eup %2982  ;;  %v2223_v16 = vmul.f32 %v2981_v38, %v2210_v63 }
 0x1da   : > { %v2985_v17 = vpop.eup %2984  ;;  %v2216_v19 = vmul.f32 %v2983_v15, %v2209_v5 }
 0x1db   : > { %v2225_v20 = vsel %vm2224_vm2, %v2210_v63, %v2223_v16  ;;  %v2230_v22 = vmul.f32 %v2985_v17, %v2211_v6  ;;  %v2987_v26 = vpop.eup %2986 }
 0x1dc   : > { %v2228_v23 = vsel %vm2226_vm3, %v2227_v18, %v2225_v20  ;;  %v2218_v24 = vsel %vm2217_vm4, %v2209_v5, %v2216_v19  ;;  %v2989_v29 = vpop.eup %2988  ;;  %v2244_v30 = vmul.f32 %v2987_v26, %v2213_v12 }
 0x1dd   : > { %2258 = vst [vmem:[%s3825_s27 + $0x8] sm:$0xff] %v2228_v23  ;;  %v2221_v27 = vsel %vm2219_vm5, %v2220_v21, %v2218_v24  ;;  %v2232_v28 = vsel %vm2231_vm6, %v2211_v6, %v2230_v22  ;;  %v2991_v31 = vpop.eup %2990  ;;  %v2237_v32 = vmul.f32 %v2989_v29, %v2212_v13 }
 0x1de   : > { %2257 = vst [vmem:[%s3825_s27] sm:$0xff] %v2221_v27  ;;  %v2235_v2 = vsel %vm2233_vm7, %v2234_v25, %v2232_v28  ;;  %v2246_v58 = vsel %vm2245_vm8, %v2213_v12, %v2244_v30  ;;  %v2251_v50 = vmul.f32 %v2991_v31, %v2214_v14 }
 0x1df   : > { %2259 = vst [vmem:[%s3825_s27 + $0x10] sm:$0xff] %v2235_v2  ;;  %v2249_v34 = vsel %vm2247_vm9, %v2248_v7, %v2246_v58  ;;  %v2239_v35 = vsel %vm2238_vm10, %v2212_v13, %v2237_v32 }
 0x1e0   : > { %2261 = vst [vmem:[%s3825_s27 + $0x20] sm:$0xff] %v2249_v34  ;;  %v2242_v37 = vsel %vm2240_vm11, %v2241_v33, %v2239_v35  ;;  %v2253_v39 = vsel %vm2252_vm12, %v2214_v14, %v2251_v50 }
 0x1e1   : > { %2260 = vst [vmem:[%s3825_s27 + $0x18] sm:$0xff] %v2242_v37  ;;  %v2256_v40 = vsel %vm2254_vm13, %v2255_v36, %v2253_v39 }
 0x1e2   : > { %2262 = vst [vmem:[%s3825_s27 + $0x28] sm:$0xff] %v2256_v40 }
 0x1e3 PF: > { %s13_s12 = sadd.s32 1, %s2998_s12  }
 0x1e4   : > { %p10_p4 = scmp.ge.s32.totalorder %s13_s12, 4  }
 0x1e6   :  { %12 = sbr.rel (!%p10_p4) target bundleno = 1 (0x1), region = 62 }

// kernel: _lambda_.5
= control target key start
LH: loop header
LB: loop body
LE: loop exit
PB: predicated region body
PF: predicated region fallthrough
CT: control target
= control target key end

     0   :  { %17 = vsyncpa [#allocation3], 0  ;;  %s3252_s0 = inlined_call_operand.vmem [shape: f32[2,16,384], index: 0, kind: input, shape index: {}]   ;;  %s3253_s1 = inlined_call_operand.vmem [shape: f32[2,16,384], index: 1, kind: input, shape index: {}]   ;;  %s3254_s2 = inlined_call_operand.vmem [shape: f32[2,16,64], index: 2, kind: input, shape index: {}]   ;;  %s3255_s3 = inlined_call_operand.vmem [shape: bf16[384,64], index: 3, kind: input, shape index: {}]   ;;  %s3256_s4 = inlined_call_operand.vmem [shape: bf16[64,64], index: 4, kind: input, shape index: {}]   ;;  %s3257_s5 = inlined_call_operand.vmem [shape: f32[1,64], index: 5, kind: input, shape index: {}]   ;;  %s3258_s6 = inlined_call_operand.vmem [shape: bf16[2,64,64], index: 6, kind: input, shape index: {}]   ;;  %s3259_s7 = inlined_call_operand.vmem [shape: f32[2,1,64], index: 7, kind: input, shape index: {}]   ;;  %s3260_s8 = inlined_call_operand.vmem [shape: bf16[2,64,64], index: 8, kind: input, shape index: {}]   ;;  %s3261_s9 = inlined_call_operand.vmem [shape: f32[2,20,64], index: 9, kind: input, shape index: {}]   ;;  %s3262_s10 = inlined_call_operand.vmem [shape: bf16[64,64], index: 10, kind: input, shape index: {}]   ;;  %s3263_s11 = inlined_call_operand.vmem [shape: f32[1,64], index: 11, kind: input, shape index: {}]   ;;  %s3264_s12 = inlined_call_operand.hbm [shape: f32[2,16,64], index: 12, kind: output, shape index: {}]  }
   0x1   :  { %19 = vsyncpa [#allocation3 + $0x1], 0  ;;  %s2497_s21 = smov 0   ;;  %s2499_s22 = smov 0  }
   0x2   :  { %s2501_s23 = smov 0   ;;  %s2503_s24 = smov 0  }
   0x3 LB: > { %3273 = sst [smem:[#allocation5_spill]] %s2421_s23  ;;  %s2518_s25 = sadd.s32 4294967295, %s2425_s24   ;;  %s2425_s24 = sphi %s2503_s24, %s3292_s24   ;;  %s2421_s23 = sphi %s2501_s23, %s3294_s23   ;;  %s2417_s22 = sphi %s2499_s22, %s3296_s22   ;;  %s2413_s21 = sphi %s2497_s21, %s3295_s21  }
   0x4   : > { %s2014_s26 = sadd.s32 4294967294, %s2425_s24   ;;  %s2522_s27 = sadd.s32 1, %s2425_s24  }
   0x5   : > { %3274 = sst [smem:[#allocation6_spill]] %s2522_s27  ;;  %s299_s28 = sadd.s32 1, %s2421_s23 }
   0x6   : > { %s296_s29 = ssub.s32 %s2425_s24, %s2522_s27  ;;  %p309_p0 = scmp.ne.s32.totalorder %s2421_s23, %s2417_s22 }
   0x7   : > { %p297_p1 = scmp.eq.s32.totalorder %s296_s29, 0  ;;  %p310_p2 = scmp.eq.s32.totalorder %s2518_s25, 1 }
   0x8   : > { %p315_p3 = scmp.ne.s32.totalorder %s2417_s22, %s2413_s21  ;;  %p316_p4 = scmp.eq.s32.totalorder %s2014_s26, 1 }
   0x9   : > { %s2533_s30 = scalar_select %p297_p1, %s2421_s23, %s299_s28  }
   0xa   : > { %p2535_p5 = por %p310_p2, %p309_p0  ;;  %p2539_p6 = por %p316_p4, %p315_p3 }
   0xb   : > { %3275 = sst [smem:[#allocation7_spill]] %s2533_s30  ;;  %p2017_p7 = scmp.ge.s32.totalorder %s2425_s24, 1 }
   0xc   : > { %s3277_s14 = scalar_select %p2539_p6, 1, 0 }
   0xd   : > { %p385_p8 = scmp.lt.s32.totalorder %s2425_s24, 3 }
   0xe   : > { %3278 = sst [smem:[#allocation8_spill]] %s3277_s14 }
   0xf   : > { %p386_p9 = pnand %p2017_p7, %p385_p8 }
  0x10   : > { %v2307_v0 = vld [vmem:[%s3256_s4] sm:$0xff] (!%p386_p9)   ;;  %v3269_v1 = vmov (!%p386_p9), 0.0   ;;  %vm2428_vm0 = vmmov (!%p386_p9), 0   ;;  %p437_p10 = scmp.lt.s32.totalorder (!%p386_p9), %s2518_s25, 1  ;;  %v2310_v4 = vld [vmem:[%s3256_s4 + $0x8] sm:$0xff] (!%p386_p9)   ;;  %v2313_v7 = vld [vmem:[%s3256_s4 + $0x10] sm:$0xff] (!%p386_p9)  }
  0x11   : > { %389 = sbr.rel (%p386_p9) target bundleno = 1506 (0x5e2), region = 68  ;;  %2171 = vmatprep.subr.bf16.mxu0 (!%p386_p9), %v3269_v1  ;;  %v2308_v2 = vld [vmem:[%s3255_s3 + $0x40] sm:$0xff] (!%p386_p9)   ;;  %2179 = vmatprep.mubr.msk.bf16.mxu0 (!%p386_p9), %vm2428_vm0, %v3269_v1  ;;  %v2311_v5 = vld [vmem:[%s3255_s3 + $0x48] sm:$0xff] (!%p386_p9)   ;;  %v2314_v8 = vld [vmem:[%s3255_s3 + $0x50] sm:$0xff] (!%p386_p9)   ;;  %vm557_vm1 = vcmask (!%p386_p9), 523264   ;;  %vm1007_vm2 = vcmask (!%p386_p9), 1042432  }
  0x12   : > { %2172 = vmatpush3.bf16.msra.mxu0 (!%p386_p9), %v2307_v0  ;;  %v2309_v3 = vld [vmem:[%s3255_s3] sm:$0xff] (!%p386_p9)   ;;  %2115 = vmatprep.subr.bf16.mxu1 (!%p386_p9), %v2308_v2  ;;  %v2312_v6 = vld [vmem:[%s3255_s3 + $0x8] sm:$0xff] (!%p386_p9)   ;;  %v2315_v9 = vld [vmem:[%s3255_s3 + $0x10] sm:$0xff] (!%p386_p9)   ;;  %vm1035_vm3 = vcmask (!%p386_p9), 1040384   ;;  %vm1057_vm4 = vcmask (!%p386_p9), 1041408   ;;  %vm1096_vm5 = vcmask (!%p386_p9), 1043456  }
  0x13   : > { %2173 = vmatprep.subr.bf16.mxu0 (!%p386_p9), %v3269_v1  ;;  %2116 = vmatpush3.bf16.msra.mxu1 (!%p386_p9), %v2309_v3  ;;  %v2316_v10 = vld [vmem:[%s3256_s4 + $0x18] sm:$0xff] (!%p386_p9)   ;;  %v2319_v16 = vld [vmem:[%s3255_s3 + $0x60] sm:$0xff] (!%p386_p9)   ;;  %v2322_v19 = vld [vmem:[%s3255_s3 + $0x68] sm:$0xff] (!%p386_p9)   ;;  %vm1118_vm6 = vcmask (!%p386_p9), 1044480   ;;  %vm1140_vm7 = vcmask (!%p386_p9), 1045504   ;;  %vm1162_vm8 = vcmask (!%p386_p9), 1046528  }
  0x14   : > { %2117 = vmatprep.subr.bf16.mxu1 (!%p386_p9), %v2311_v5  ;;  %v2317_v11 = vld [vmem:[%s3255_s3 + $0x58] sm:$0xff] (!%p386_p9)   ;;  %v2320_v17 = vld [vmem:[%s3255_s3 + $0x80] sm:$0xff] (!%p386_p9)   ;;  %v2323_v20 = vld [vmem:[%s3255_s3 + $0x88] sm:$0xff] (!%p386_p9)   ;;  %s434_s26 = sand.u32 (!%p386_p9), 1, %s2417_s22  }
  0x15   : > { %v2318_v12 = vld [vmem:[%s3255_s3 + $0x18] sm:$0xff] (!%p386_p9)   ;;  %v2321_v18 = vld [vmem:[%s3255_s3 + $0x20] sm:$0xff] (!%p386_p9)   ;;  %v2324_v21 = vld [vmem:[%s3255_s3 + $0x28] sm:$0xff] (!%p386_p9)   ;;  %s2018_s30 = sshll.u32 (!%p386_p9), %s434_s26, 4 }
  0x16   : > { %2174 = vmatpush3.bf16.msra.mxu0 (!%p386_p9), %v2310_v4  ;;  %v2325_v22 = vld [vmem:[%s3255_s3 + $0x70] sm:$0xff] (!%p386_p9)   ;;  %v2328_v25 = vld [vmem:[%s3255_s3 + $0x78] sm:$0xff] (!%p386_p9)   ;;  %v2331_v41 = vld [vmem:[%s3255_s3 + $0xa0] sm:$0xff] (!%p386_p9)   ;;  %s436_s23 = scalar_lea.vmem (!%p386_p9), [#allocation2], %s2018_s30 }
  0x17   : > { %2175 = vmatprep.subr.bf16.mxu0 (!%p386_p9), %v3269_v1  ;;  %2118 = vmatpush3.bf16.msra.mxu1 (!%p386_p9), %v2312_v6  ;;  %v2326_v23 = vld [vmem:[%s3255_s3 + $0x90] sm:$0xff] (!%p386_p9)   ;;  %v2329_v26 = vld [vmem:[%s3255_s3 + $0x98] sm:$0xff] (!%p386_p9)   ;;  %v2332_v43 = vld [vmem:[%s3255_s3 + $0xa8] sm:$0xff] (!%p386_p9)   ;;  %s1928_s27 = sshll.u32 (!%p386_p9), %s436_s23, 4  ;;  %s3207_s27 = int_to_ptr.vmem [resolvable:$true] %s1928_s27 }
  0x18   : > { %s2566_s16 = scalar_select %p437_p10, %s2518_s25, 1  ;;  %2119 = vmatprep.subr.bf16.mxu1 %v2314_v8  ;;  %v2327_v24 = vld [vmem:[%s3255_s3 + $0x30] sm:$0xff]   ;;  %v2330_v38 = vld [vmem:[%s3255_s3 + $0x38] sm:$0xff]   ;;  %v2335_v53 = vld [vmem:[%s3258_s6] sm:$0xff]  }
  0x19   : > { %v2333_v44 = vld [vmem:[%s3255_s3 + $0xb0] sm:$0xff]   ;;  %v2334_v49 = vld [vmem:[%s3255_s3 + $0xb8] sm:$0xff]   ;;  %v2336_v54 = vld [vmem:[%s3258_s6 + $0x8] sm:$0xff]  }
  0x1a   : > { %s2108_s29 = sshll.u32 %s2566_s16, 4  ;;  %2176 = vmatpush3.bf16.msra.mxu0 %v2313_v7  ;;  %s2263_s17 = smul.u32 48, %s2566_s16  ;;  %v2337_v55 = vld [vmem:[%s3258_s6 + $0x10] sm:$0xff]   ;;  %v2338_v56 = vld [vmem:[%s3258_s6 + $0x18] sm:$0xff]   ;;  %v2339_v57 = vld [vmem:[%s3260_s8] sm:$0xff]  }
  0x1b   : > { %s451_s20 = scalar_lea.vmem %s3254_s2, %s2108_s29  ;;  %2177 = vmatprep.subr.bf16.mxu0 %v3269_v1  ;;  %2120 = vmatpush3.bf16.msra.mxu1 %v2315_v9  ;;  %v2340_v58 = vld [vmem:[%s3260_s8 + $0x8] sm:$0xff]   ;;  %v2052_v9 = vld [vmem:[%s3257_s5] ss:$0 sm:$0xff]  ;;  %s2109_s16 = sshll.u32 %s2518_s25, 8 }
  0x1c   : > { %v522_v13 = vld [vmem:[%s451_s20] sm:$0xff]  ;;  %v523_v14 = vld [vmem:[%s451_s20 + $0x8] sm:$0xff]  ;;  %2121 = vmatprep.subr.bf16.mxu1 %v2317_v11  ;;  %s2628_s18 = scalar_lea.vmem %s3252_s0, %s2263_s17  ;;  %s2636_s28 = scalar_lea.vmem %s3253_s1, %s2263_s17 }
  0x1d   : > { %v524_v15 = vpack.c.bf16 %v523_v14, %v522_v13  ;;  %v454_v27 = vld [vmem:[%s2628_s18 + $0x8] sm:$0xff]  ;;  %v457_v28 = vld [vmem:[%s2628_s18 + $0x20] sm:$0xff]  ;;  %v456_v34 = vld [vmem:[%s2628_s18 + $0x18] sm:$0xff]  ;;  %s3205_s14 = scalar_lea.hbm %s3264_s12, %s2109_s16  ;;  %s3211_s17 = scalar_lea.sflag [#allocation3], %s434_s26 }
  0x1e   : > { %2178 = vmatpush3.bf16.msra.mxu0 %v2316_v10  ;;  %v460_v29 = vld [vmem:[%s2636_s28 + $0x8] sm:$0xff]  ;;  %v463_v30 = vld [vmem:[%s2636_s28 + $0x20] sm:$0xff]  ;;  %v462_v36 = vld [vmem:[%s2636_s28 + $0x18] sm:$0xff]  ;;  %s2363_s25 = scalar_lea.vmem %s3207_s27, 256  ;;  %s2429_s29 = smov [#allocation2]  }
  0x1f   : > { %2183 = vmatprep.subr.bf16.mxu0 %v3269_v1  ;;  %2122 = vmatpush3.bf16.msra.mxu1 %v2318_v12  ;;  %v466_v31 = vmul.f32 %v460_v29, %v454_v27  ;;  %v469_v32 = vmul.f32 %v463_v30, %v457_v28  ;;  %v453_v33 = vld [vmem:[%s2628_s18] sm:$0xff]  ;;  %v468_v40 = vmul.f32 %v462_v36, %v456_v34  ;;  %v455_v45 = vld [vmem:[%s2628_s18 + $0x10] sm:$0xff]  ;;  %v458_v46 = vld [vmem:[%s2628_s18 + $0x28] sm:$0xff]  ;;  %p2364_p11 = scmp.ne.s32.totalorder %s3207_s27, %s2363_s25  ;;  %s2367_s15 = sshll.u32 %s2429_s29, 4  ;;  %s2368_s15 = int_to_ptr.vmem [resolvable:$false] %s2367_s15 }
  0x20   : > { %2123 = vmatprep.subr.bf16.mxu1 %v2319_v16  ;;  %v459_v35 = vld [vmem:[%s2636_s28] sm:$0xff]  ;;  %v461_v47 = vld [vmem:[%s2636_s28 + $0x10] sm:$0xff]  ;;  %v464_v48 = vld [vmem:[%s2636_s28 + $0x28] sm:$0xff]  ;;  %s2369_s19 = scalar_lea.vmem %s2368_s15, 512  ;;  %p2370_p0 = scmp.lt.s32.totalorder %s3207_s27, %s2368_s15 }
  0x21   : > { %2180 = vmatmul.mubr.msk.bf16.vlgmr.msra.gmra.mrb[0].mxu0 %vm557_vm1, %v524_v15  ;;  %v465_v37 = vmul.f32 %v459_v35, %v453_v33  ;;  %v472_v39 = vpack.c.bf16 %v469_v32, %v466_v31  ;;  %v467_v50 = vmul.f32 %v461_v47, %v455_v45  ;;  %v470_v51 = vmul.f32 %v464_v48, %v458_v46  ;;  %v2343_v32 = vld [vmem:[%s3258_s6 + $0x20] sm:$0xff]   ;;  %v2344_v33 = vld [vmem:[%s3258_s6 + $0x28] sm:$0xff]   ;;  %v2345_v36 = vld [vmem:[%s3258_s6 + $0x30] sm:$0xff]   ;;  %p2365_p12 = pnand %p2364_p11, %p2535_p5  ;;  %p2371_p1 = scmp.lt.s32.totalorder %s2369_s19, %s2363_s25 }
  0x22   : > { %2184 = vmatpush3.bf16.msra.mxu0 %v2320_v17  ;;  %2199 = vmatprep.mubr.msk.bf16.mxu0 %vm2428_vm0, %v3269_v1  ;;  %v2347_v34 = vld [vmem:[%s3260_s8 + $0x20] sm:$0xff]   ;;  %v2348_v35 = vld [vmem:[%s3260_s8 + $0x28] sm:$0xff]  }
  0x23   : > { %2185 = vmatprep.subr.bf16.mxu0 %v3269_v1  ;;  %2124 = vmatpush3.bf16.msra.mxu1 %v2321_v18  ;;  %v471_v42 = vpack.c.bf16 %v468_v40, %v465_v37  ;;  %v473_v52 = vpack.c.bf16 %v470_v51, %v467_v50  ;;  %v2346_v37 = vld [vmem:[%s3258_s6 + $0x38] sm:$0xff]   ;;  %p2366_p13 = pneg %p2365_p12  ;;  %p2372_p2 = por %p2371_p1, %p2370_p0 }
  0x24   : > { %2125 = vmatprep.subr.bf16.mxu1 %v2322_v19  ;;  %778 = vmatprep.mubr.bf16.mxu1 %v472_v39 }
  0x25   : > { %p2373_p3 = pnand %p2372_p2, %p2366_p13 }
  0x26   : > { %2186 = vmatpush3.bf16.msra.mxu0 %v2323_v20  ;;  %v2341_v20 = vld [vmem:[%s3260_s8 + $0x10] sm:$0xff]  }
  0x27   : > { %2187 = vmatprep.subr.bf16.mxu0 %v3269_v1  ;;  %2126 = vmatpush3.bf16.msra.mxu1 %v2324_v21  ;;  %v2342_v21 = vld [vmem:[%s3260_s8 + $0x18] sm:$0xff]  }
  0x28   : > { %2127 = vmatprep.subr.bf16.mxu1 %v2325_v22  ;;  %v2053_v22 = vld [vmem:[%s3259_s7] ss:$0 sm:$0xff] }
  0x2a   : > { %2188 = vmatpush3.bf16.msra.mxu0 %v2326_v23 }
  0x2b   : > { %2189 = vmatprep.subr.bf16.mxu0 %v3269_v1  ;;  %2128 = vmatpush3.bf16.msra.mxu1 %v2327_v24 }
  0x2c   : > { %2129 = vmatprep.subr.bf16.mxu1 %v2328_v25 }
  0x2e   : > { %2190 = vmatpush3.bf16.msra.mxu0 %v2329_v26 }
  0x2f   : > { %2191 = vmatprep.subr.bf16.mxu0 %v3269_v1  ;;  %2130 = vmatpush3.bf16.msra.mxu1 %v2330_v38  ;;  %v1015_v38 = vlaneseq }
  0x30   : > { %2203 = vmatprep.subr.bf16.mxu1 %v3269_v1 }
  0x31   : > { %v1016_v39 = vshrl.u32 %v1015_v38, 7 }
  0x32   : > { %2192 = vmatpush3.bf16.msra.mxu0 %v2331_v41  ;;  %779 = vmatmul.mubr.bf16.vlgmr.msra.gmra.mrb[0].mxu1 %v471_v42  ;;  %v857_v42 = vld [vmem:[%s3261_s9 + $0x8] sm:$0xff] }
  0x33   : > { %2193 = vmatprep.subr.bf16.mxu0 %v3269_v1  ;;  %2211 = vmatprep.mubr.msk.bf16.mxu1 %vm2428_vm0, %v3269_v1  ;;  %v2761_v40 = vsub.s32 7, %v1016_v39  ;;  %v2763_v41 = vsub.s32 6, %v1016_v39  ;;  %v2772_v45 = vsub.s32 4, %v1016_v39  ;;  %v2774_v46 = vsub.s32 1, %v1016_v39 }
  0x34   : > { %2204 = vmatpush3.bf16.msra.mxu1 %v2335_v53  ;;  %v2776_v47 = vsub.s32 0, %v1016_v39 }
  0x35   : > { %2205 = vmatprep.subr.bf16.mxu1 %v3269_v1  ;;  %v2779_v48 = vrot.slane %v857_v42, %v2761_v40  ;;  %v2788_v51 = vrot.slane %v857_v42, %v2772_v45  ;;  %v2794_v53 = vrot.slane %v857_v42, %v2774_v46 }
  0x36   : > { %2194 = vmatpush3.bf16.msra.mxu0 %v2332_v43  ;;  %v2768_v43 = vsub.s32 2, %v1016_v39 }
  0x37   : > { %2195 = vmatprep.subr.bf16.mxu0 %v3269_v1 }
  0x38   : > { %2206 = vmatpush3.bf16.msra.mxu1 %v2336_v54  ;;  %v2797_v54 = vrot.slane %v857_v42, %v2776_v47 }
  0x39   : > { %2207 = vmatprep.subr.bf16.mxu1 %v3269_v1 }
  0x3a   : > { %2196 = vmatpush3.bf16.msra.mxu0 %v2333_v44  ;;  %v2770_v44 = vsub.s32 5, %v1016_v39 }
  0x3b   : > { %2197 = vmatprep.subr.bf16.mxu0 %v3269_v1 }
  0x3c   : > { %2208 = vmatpush3.bf16.msra.mxu1 %v2337_v55  ;;  %v2785_v50 = vrot.slane %v857_v42, %v2770_v44  ;;  %v2802_v55 = vld [vmem:[%s3261_s9] sm:$0xff] }
  0x3d   : > { %2209 = vmatprep.subr.bf16.mxu1 %v3269_v1 }
  0x3e   : > { %2198 = vmatpush3.bf16.msra.mxu0 %v2334_v49  ;;  %v2782_v49 = vrot.slane %v857_v42, %v2763_v41 }
  0x3f   : > { %2215 = vmatprep.subr.bf16.mxu0 %v3269_v1 }
  0x40   : > { %2210 = vmatpush3.bf16.msra.mxu1 %v2338_v56  ;;  %v2804_v56 = vsub.s32 3, %v1016_v39 }
  0x41   : > { %2200 = vmatmul.mubr.bf16.vlgmr.msra.gmra.mrb[4].mxu0 %v473_v52  ;;  %2227 = vmatprep.subr.bf16.mxu1 %v3269_v1  ;;  %v2791_v52 = vrot.slane %v857_v42, %v2768_v43 }
  0x42   : > { %2223 = vmatprep.mubr.msk.bf16.mxu0 %vm2428_vm0, %v3269_v1  ;;  %2216 = vmatpush3.bf16.msra.mxu0 %v2339_v57  ;;  %v858_v57 = vld [vmem:[%s3261_s9 + $0x10] sm:$0xf] }
  0x43   : > { %2217 = vmatprep.subr.bf16.mxu0 %v3269_v1 }
  0x46   : > { %2218 = vmatpush3.bf16.msra.mxu0 %v2340_v58  ;;  %v2810_v58 = vmul.f32 0.0, %v2779_v48 }
  0x47   : > { %2219 = vmatprep.subr.bf16.mxu0 %v3269_v1 }
  0x4a   : > { %2220 = vmatpush3.bf16.msra.mxu0 %v2341_v20 }
  0x4b   : > { %2221 = vmatprep.subr.bf16.mxu0 %v3269_v1 }
  0x4e   : > { %2222 = vmatpush3.bf16.msra.mxu0 %v2342_v21 }
  0x4f   : > { %2239 = vmatprep.subr.bf16.mxu0 %v3269_v1 }
  0xf4   : > { %v595_v59 = vpop.f32.mrb[0].mxu0 }
  0xf5   : > { %v2181_v60 = vpop.f32.mrb[1].mxu0 }
  0xf6   : > { %v598_v61 = vpop.f32.mrb[2].mxu0  ;;  %v2816_v60 = vmul.f32 0.0, %v2785_v50 }
  0xf7   : > { %v2182_v62 = vpop.f32.mrb[3].mxu0 }
  0xf8   : > { %v2822_v62 = vmul.f32 0.0, %v2791_v52 }
 0x105   : > { %v2131_v63 = vpop.f32.mrb[0].mxu1 }
 0x106   : > { %v2132_v0 = vpop.f32.mrb[1].mxu1 }
 0x107   : > { %v2133_v2 = vadd.f32 %v2132_v0, %v2131_v63  ;;  %v2134_v3 = vpop.f32.mrb[2].mxu1  ;;  %v2825_v63 = vmul.f32 0.0, %v2794_v53  ;;  %v2828_v0 = vmul.f32 0.0, %v2797_v54 }
 0x108   : > { %v2135_v4 = vpop.f32.mrb[3].mxu1 }
 0x109   : > { %v2136_v5 = vadd.f32 %v2135_v4, %v2134_v3  ;;  %v781_v6 = vadd.f32 %v2133_v2, %v595_v59  ;;  %v2813_v59 = vmul.f32 0.0, %v2782_v49  ;;  %v2832_v2 = vrot.slane %v2802_v55, %v2761_v40 }
 0x10a   : > { %v1018_v3 = vrot.slane %v858_v57, %v2804_v56  ;;  %v1028_v4 = vrot.slane %v858_v57, %v2768_v43 }
 0x10b   : > { %v784_v7 = vadd.f32 %v2136_v5, %v598_v61  ;;  %v2819_v61 = vmul.f32 0.0, %v2788_v51  ;;  %v1050_v5 = vrot.slane %v858_v57, %v2774_v46 }
 0x114   : > { %v821_v8 = vpop.f32.mrb[4].mxu0 }
 0x115   : > { %v822_v10 = vadd.f32 %v821_v8, %v781_v6  ;;  %v2201_v11 = vpop.f32.mrb[5].mxu0  ;;  %v2839_v6 = vrot.slane %v2802_v55, %v2763_v41  ;;  %v1072_v8 = vrot.slane %v858_v57, %v2776_v47 }
 0x116   : > { %v824_v12 = vpop.f32.mrb[6].mxu0  ;;  %v2847_v11 = vrot.slane %v857_v42, %v2804_v56 }
 0x117   : > { %v2710_v13 = vadd.f32 %v2052_v9, %v822_v10  ;;  %v825_v14 = vadd.f32 %v824_v12, %v784_v7  ;;  %v2202_v15 = vpop.f32.mrb[7].mxu0 }
 0x119   : > { %v2712_v16 = vadd.f32 %v2052_v9, %v825_v14  ;;  %v3272_v17 = vmax.f32 %v2710_v13, 0.0  ;;  %v1097_v9 = vrot.slane %v2810_v58, 4 }
 0x11b   : > { %v3271_v18 = vmax.f32 %v2712_v16, 0.0 }
 0x11d   : > { %v859_v19 = vpack.c.bf16 %v3271_v18, %v3272_v17 }
 0x11f   : > { %2212 = vmatmul.mubr.msk.bf16.vlgmr.msra.gmra.mrb[4].mxu1 %vm557_vm1, %v859_v19 }
 0x120   : > { %2235 = vmatprep.mubr.msk.bf16.mxu1 %vm2428_vm0, %v3269_v1  ;;  %2228 = vmatpush3.bf16.msra.mxu1 %v2343_v32 }
 0x121   : > { %2229 = vmatprep.subr.bf16.mxu1 %v3269_v1 }
 0x124   : > { %2230 = vmatpush3.bf16.msra.mxu1 %v2344_v33 }
 0x125   : > { %2231 = vmatprep.subr.bf16.mxu1 %v3269_v1 }
 0x128   : > { %2232 = vmatpush3.bf16.msra.mxu1 %v2345_v36 }
 0x129   : > { %2233 = vmatprep.subr.bf16.mxu1 %v3269_v1 }
 0x12c   : > { %2234 = vmatpush3.bf16.msra.mxu1 %v2346_v37 }
 0x12d   : > { %2251 = vmatprep.subr.bf16.mxu1 %v3269_v1 }
 0x1f2   : > { %v927_v23 = vpop.f32.mrb[4].mxu1 }
 0x1f3   : > { %v928_v24 = vadd.f32 %v2053_v22, %v927_v23  ;;  %v2213_v25 = vpop.f32.mrb[5].mxu1 }
 0x1f4   : > { %v930_v26 = vpop.f32.mrb[6].mxu1  ;;  %v2861_v25 = vmul.f32 0.0, %v2832_v2 }
 0x1f5   : > { %v931_v27 = vadd.f32 %v2053_v22, %v930_v26  ;;  %v2214_v28 = vpop.f32.mrb[7].mxu1  ;;  %v934_v29 = vmax.f32 %v928_v24, 0.0  ;;  %v2856_v22 = vmul.f32 0.0, %v2847_v11 }
 0x1f6   : > { %v2868_v28 = vmul.f32 0.0, %v2839_v6 }
 0x1f7   : > { %v935_v30 = vmax.f32 %v931_v27, 0.0 }
 0x1f9   : > { %v936_v31 = vpack.c.bf16 %v935_v30, %v934_v29  ;;  %v2872_v29 = vrot.slane %v2802_v55, %v2770_v44 }
 0x1fb   : > { %2224 = vmatmul.mubr.msk.bf16.vlgmr.msra.gmra.mrb[8].mxu0 %vm557_vm1, %v936_v31 }
 0x1fc   : > { %2247 = vmatprep.mubr.msk.bf16.mxu0 %vm2428_vm0, %v3269_v1  ;;  %2240 = vmatpush3.bf16.msra.mxu0 %v2347_v34 }
 0x1fd   : > { %2241 = vmatprep.subr.bf16.mxu0 %v3269_v1 }
 0x200   : > { %2242 = vmatpush3.bf16.msra.mxu0 %v2348_v35 }
 0x201   : > { %2243 = vmatprep.subr.bf16.mxu0 %v3269_v1 }
 0x2ce   : > { %v2841_v7 = vpop.f32.mrb[8].mxu0 }
 0x2cf   : > { %v1008_v12 = vrot.slane %v2841_v7, 5  ;;  %v2225_v14 = vpop.f32.mrb[9].mxu0 }
 0x2d0   : > { %v2853_v21 = vpop.f32.mrb[10].mxu0 }
 0x2d1   : > { %v2864_v26 = vsel %vm1007_vm2, 0.0, %v1008_v12  ;;  %v1009_v27 = vrot.slane %v2853_v21, 5  ;;  %v2226_v30 = vpop.f32.mrb[11].mxu0 }
 0x2d2   : > { %v1019_v31 = vmul.f32 %v1018_v3, %v2864_v26  ;;  %v1029_v32 = vmul.f32 %v1028_v4, %v2864_v26  ;;  %v1051_v33 = vmul.f32 %v1050_v5, %v2864_v26  ;;  %v1073_v34 = vmul.f32 %v1072_v8, %v2864_v26 }
 0x2d3   : > { %v2879_v35 = vsel %vm1007_vm2, %v1008_v12, %v1009_v27  ;;  %v1021_v36 = vmul.f32 %v1018_v3, %v1009_v27  ;;  %v1031_v37 = vmul.f32 %v1028_v4, %v1009_v27  ;;  %v1053_v38 = vmul.f32 %v1050_v5, %v1009_v27 }
 0x2d4   : > { %v1020_v39 = vmul.f32 %v1018_v3, %v2879_v35  ;;  %v1030_v42 = vmul.f32 %v1028_v4, %v2879_v35  ;;  %v1036_v57 = vrot.slane %v1029_v32, 7  ;;  %v1052_v14 = vmul.f32 %v1050_v5, %v2879_v35 }
 0x2d5   : > { %v1039_v30 = vrot.slane %v1031_v37, 7  ;;  %v1058_v1 = vrot.slane %v1051_v33, 6  ;;  %v1061_v18 = vrot.slane %v1053_v38, 6  ;;  %v1074_v17 = vmul.f32 %v1072_v8, %v2879_v35 }
 0x2d6   : > { %v1037_v24 = vrot.slane %v1030_v42, 7  ;;  %v1044_v23 = vadd.f32 %v1036_v57, %v1019_v31  ;;  %v1059_v12 = vrot.slane %v1052_v14, 6  ;;  %v1077_v20 = vrot.slane %v1073_v34, 5 }
 0x2d7   : > { %v1078_v19 = vrot.slane %v1074_v17, 5  ;;  %v1091_v27 = vmul.f32 %v2779_v48, %v2864_v26  ;;  %v1092_v3 = vmul.f32 %v2779_v48, %v2879_v35  ;;  %v1113_v4 = vmul.f32 %v2782_v49, %v2864_v26 }
 0x2d8   : > { %v1038_v5 = vsel %vm1035_vm3, %v1036_v57, %v1037_v24  ;;  %v1040_v8 = vsel %vm1035_vm3, %v1037_v24, %v1039_v30  ;;  %v1060_v32 = vsel %vm1057_vm4, %v1058_v1, %v1059_v12  ;;  %v1062_v31 = vsel %vm1057_vm4, %v1059_v12, %v1061_v18 }
 0x2d9   : > { %v1045_v33 = vadd.f32 %v1038_v5, %v1020_v39  ;;  %v1046_v17 = vadd.f32 %v1040_v8, %v1021_v36  ;;  %v1066_v34 = vadd.f32 %v1058_v1, %v1044_v23  ;;  %v1079_v37 = vsel %vm1007_vm2, %v1077_v20, %v1078_v19 }
 0x2da   : > { %v1098_v38 = vrot.slane %v1091_v27, 4  ;;  %v1100_v42 = vrot.slane %v1092_v3, 4  ;;  %v1114_v48 = vmul.f32 %v2782_v49, %v2879_v35  ;;  %v1120_v14 = vrot.slane %v1113_v4, 3 }
 0x2db   : > { %v1067_v15 = vadd.f32 %v1060_v32, %v1045_v33  ;;  %v1068_v10 = vadd.f32 %v1062_v31, %v1046_v17  ;;  %v1083_v57 = vadd.f32 %v1077_v20, %v1066_v34  ;;  %v1135_v24 = vmul.f32 %v2785_v50, %v2864_v26 }
 0x2dc   : > { %v1099_v18 = vsel %vm1096_vm5, %v1097_v9, %v1098_v38  ;;  %v1101_v1 = vsel %vm1096_vm5, %v1098_v38, %v1100_v42  ;;  %v3279_v23 = vrot.slane %v2813_v59, 3  ;;  %v1122_v39 = vrot.slane %v1114_v48, 3 }
 0x2dd   : > { %v1084_v30 = vadd.f32 %v1079_v37, %v1067_v15  ;;  %v1085_v49 = vadd.f32 %v1078_v19, %v1068_v10  ;;  %v1105_v12 = vadd.f32 %v1099_v18, %v1083_v57  ;;  %v1136_v20 = vmul.f32 %v2785_v50, %v2879_v35 }
 0x2de   : > { %v1121_v36 = vsel %vm1118_vm6, %v3279_v23, %v1120_v14  ;;  %v1123_v27 = vsel %vm1118_vm6, %v1120_v14, %v1122_v39  ;;  %v1142_v3 = vrot.slane %v1135_v24, 2  ;;  %v1157_v58 = vmul.f32 %v2788_v51, %v2864_v26 }
 0x2df   : > { %v1158_v9 = vmul.f32 %v2788_v51, %v2879_v35  ;;  %v1106_v4 = vadd.f32 %v1101_v1, %v1084_v30  ;;  %v1107_v59 = vadd.f32 %v1100_v42, %v1085_v49  ;;  %v1127_v5 = vadd.f32 %v1121_v36, %v1105_v12 }
 0x2e0   : > { %v1144_v8 = vrot.slane %v1136_v20, 2  ;;  %v3280_v15 = vrot.slane %v2816_v60, 2  ;;  %v1164_v19 = vrot.slane %v1157_v58, 1  ;;  %v1179_v50 = vmul.f32 %v2847_v11, %v2864_v26 }
 0x2e1   : > { %v1166_v32 = vrot.slane %v1158_v9, 1  ;;  %v1128_v31 = vadd.f32 %v1123_v27, %v1106_v4  ;;  %v1129_v33 = vadd.f32 %v1122_v39, %v1107_v59  ;;  %v3281_v51 = vrot.slane %v2819_v61, 1 }
 0x2e2   : > { %v1143_v10 = vsel %vm1140_vm7, %v3280_v15, %v1142_v3  ;;  %v1145_v17 = vsel %vm1140_vm7, %v1142_v3, %v1144_v8  ;;  %v1180_v60 = vmul.f32 %v2847_v11, %v2879_v35  ;;  %v1189_v42 = vmul.f32 %v2791_v52, %v2864_v26 }
 0x2e3   : > { %v1149_v34 = vadd.f32 %v1143_v10, %v1127_v5  ;;  %v1165_v37 = vsel %vm1162_vm8, %v3281_v51, %v1164_v19  ;;  %v1167_v38 = vsel %vm1162_vm8, %v1164_v19, %v1166_v32  ;;  %v1150_v48 = vadd.f32 %v1145_v17, %v1128_v31 }
 0x2e4   : > { %v1151_v14 = vadd.f32 %v1144_v8, %v1129_v33  ;;  %v1190_v24 = vmul.f32 %v2791_v52, %v2879_v35  ;;  %v1195_v18 = vrot.slane %v1189_v42, 7  ;;  %v1210_v61 = vmul.f32 %v2794_v53, %v2864_v26 }
 0x2e5   : > { %v1171_v57 = vadd.f32 %v1165_v37, %v1149_v34  ;;  %v1211_v1 = vmul.f32 %v2794_v53, %v2879_v35  ;;  %v1231_v23 = vmul.f32 %v2797_v54, %v2864_v26  ;;  %v1172_v11 = vadd.f32 %v1167_v38, %v1150_v48 }
 0x2e6   : > { %v1173_v36 = vadd.f32 %v1166_v32, %v1151_v14  ;;  %v1197_v30 = vrot.slane %v1190_v24, 7  ;;  %v1216_v49 = vrot.slane %v1210_v61, 6  ;;  %v1283_v20 = vmul.f32 0.0, %v2872_v29 }
 0x2e7   : > { %v1181_v39 = vadd.f32 %v2856_v22, %v1171_v57  ;;  %v1218_v12 = vrot.slane %v1211_v1, 6  ;;  %v1300_v52 = vrot.slane %v2802_v55, %v2772_v45  ;;  %v1182_v27 = vadd.f32 %v1179_v50, %v1172_v11 }
 0x2e8   : > { %v1183_v3 = vadd.f32 %v1180_v60, %v1173_v36  ;;  %v1198_v58 = vsel %vm1035_vm3, %v1195_v18, %v1197_v30  ;;  %v3282_v53 = vrot.slane %v2822_v62, 7  ;;  %v1235_v4 = vrot.slane %v1231_v23, 5 }
 0x2e9   : > { %v1219_v22 = vsel %vm1057_vm4, %v1216_v49, %v1218_v12  ;;  %v1248_v59 = vmul.f32 %v2832_v2, %v2864_v26  ;;  %v3284_v55 = vrot.slane %v2825_v63, 6  ;;  %v1266_v10 = vmul.f32 %v2839_v6, %v2864_v26 }
 0x2ea   : > { %v1202_v35 = vadd.f32 %v3282_v53, %v1181_v39  ;;  %v3283_v54 = vmov %v3282_v53  ;;  %v1204_v8 = vadd.f32 %v1198_v58, %v1183_v3  ;;  %v1251_v32 = vrot.slane %v2861_v25, 4 }
 0x2eb   : > { %v1196_v9 = vsel %vm1035_vm3, %v3283_v54, %v1195_v18  ;;  %v3285_v19 = vmov %v3284_v55  ;;  %v1253_v50 = vrot.slane %v1248_v59, 4  ;;  %v1284_v31 = vmul.f32 %v2872_v29, %v2864_v26 }
 0x2ec   : > { %v1203_v5 = vadd.f32 %v1196_v9, %v1182_v27  ;;  %v1223_v15 = vadd.f32 %v3284_v55, %v1202_v35  ;;  %v1217_v62 = vsel %vm1057_vm4, %v3285_v19, %v1216_v49  ;;  %v1225_v2 = vadd.f32 %v1219_v22, %v1204_v8 }
 0x2ed   : > { %v3286_v17 = vrot.slane %v2828_v0, 5  ;;  %v1301_v51 = vmul.f32 0.0, %v1300_v52  ;;  %v1269_v63 = vrot.slane %v2868_v28, 3  ;;  %v1271_v38 = vrot.slane %v1266_v10, 3 }
 0x2ee   : > { %v1224_v33 = vadd.f32 %v1217_v62, %v1203_v5  ;;  %v1302_v60 = vmul.f32 %v1300_v52, %v2864_v26  ;;  %v1242_v42 = vadd.f32 %v1235_v4, %v1225_v2  ;;  %v1254_v29 = vsel %vm1096_vm5, %v1251_v32, %v1253_v50  ;;  %v2351_v2 = vld [vmem:[%s3262_s10] sm:$0xff]  }
 0x2ef   : > { %v1240_v34 = vadd.f32 %v3286_v17, %v1223_v15  ;;  %v3287_v37 = vmov %v3286_v17  ;;  %v1287_v14 = vrot.slane %v1283_v20, 2  ;;  %v1289_v57 = vrot.slane %v1284_v31, 2  ;;  %v2352_v17 = vld [vmem:[%s3262_s10 + $0x8] sm:$0xff]  }
 0x2f0   : > { %v1236_v6 = vsel %vm1007_vm2, %v3287_v37, %v1235_v4  ;;  %v1260_v18 = vadd.f32 %v1253_v50, %v1242_v42  ;;  %v1272_v1 = vsel %vm1118_vm6, %v1269_v63, %v1271_v38  ;;  %v1305_v0 = vrot.slane %v1301_v51, 1  ;;  %v2354_v51 = vld [vmem:[%s3262_s10 + $0x18] sm:$0xff]   ;;  %v2082_v37 = vld [vmem:[%s3261_s9 + $0x20] sm:$0xff]  ;;  %v2083_v42 = vld [vmem:[%s3261_s9 + $0x28] sm:$0xf] }
 0x2f1   : > { %v1241_v25 = vadd.f32 %v1236_v6, %v1224_v33  ;;  %v1258_v48 = vadd.f32 %v1251_v32, %v1240_v34  ;;  %v1307_v23 = vrot.slane %v1302_v60, 1  ;;  %v1290_v39 = vsel %vm1140_vm7, %v1287_v14, %v1289_v57  ;;  %v2353_v34 = vld [vmem:[%s3262_s10 + $0x10] sm:$0xff]  }
 0x2f2   : > { %v1278_v36 = vadd.f32 %v1271_v38, %v1260_v18  ;;  %v3288_v53 = vmax.f32 %v2710_v13, 0.0  ;;  %v3289_v54 = vmax.f32 %v2712_v16, 0.0  ;;  %v3290_v13 = vmov 0.0   ;;  %v2349_v16 = vld [vmem:[%s3260_s8 + $0x30] sm:$0xff]  }
 0x2f3   : > { %v1259_v24 = vadd.f32 %v1254_v29, %v1241_v25  ;;  %v1276_v61 = vadd.f32 %v1269_v63, %v1258_v48  ;;  %v1308_v12 = vsel %vm1162_vm8, %v1305_v0, %v1307_v23  ;;  %2244 = vmatpush3.bf16.msra.mxu0 %v2349_v16  ;;  %v3017_v6 = vrot.slane %v2082_v37, %v2772_v45  ;;  %v2081_v48 = vld [vmem:[%s3261_s9 + $0x18] sm:$0xff] }
 0x2f4   : > { %v1296_v30 = vadd.f32 %v1289_v57, %v1278_v36  ;;  %v1315_v35 = vadd.f32 %v2841_v7, %v3288_v53  ;;  %v1316_v9 = vadd.f32 %v2853_v21, %v3289_v54  ;;  %v2350_v7 = vld [vmem:[%s3260_s8 + $0x38] sm:$0xff]   ;;  %2245 = vmatprep.subr.bf16.mxu0 %v3290_v13  ;;  %v2084_v21 = vld [vmem:[%s3259_s7 + $0x1] ss:$0 sm:$0xff]  ;;  %v1580_v63 = vrot.slane %v2082_v37, %v2761_v40 }
 0x2f5   : > { %v1277_v11 = vadd.f32 %v1272_v1, %v1259_v24  ;;  %v1294_v28 = vadd.f32 %v1287_v14, %v1276_v61  ;;  %v3021_v38 = vrot.slane %v2082_v37, %v2763_v41  ;;  %v3024_v60 = vrot.slane %v2082_v37, %v2768_v43 }
 0x2f6   : > { %v1314_v20 = vadd.f32 %v1307_v23, %v1296_v30  ;;  %v3027_v25 = vrot.slane %v2082_v37, %v2770_v44  ;;  %v3036_v29 = vmul.f32 0.0, %v3017_v6  ;;  %v3038_v14 = vmul.f32 0.0, %v1580_v63 }
 0x2f7   : > { %v1295_v26 = vadd.f32 %v1290_v39, %v1277_v11  ;;  %v1312_v49 = vadd.f32 %v1305_v0, %v1294_v28  ;;  %2246 = vmatpush3.bf16.msra.mxu0 %v2350_v7  ;;  %v3041_v57 = vmul.f32 0.0, %v3021_v38  ;;  %v1511_v24 = vrot.slane %v2083_v42, %v2804_v56 }
 0x2f8   : > { %v1323_v58 = vrot.slane %v1314_v20, 3  ;;  %v3045_v18 = vmul.f32 0.0, %v3027_v25  ;;  %v3048_v61 = vmul.f32 0.0, %v3024_v60  ;;  %v1521_v1 = vrot.slane %v2083_v42, %v2768_v43 }
 0x2f9   : > { %v1313_v52 = vadd.f32 %v1308_v12, %v1295_v26  ;;  %v1320_v27 = vrot.slane %v1312_v49, 3  ;;  %v3052_v0 = vrot.slane %v2082_v37, %v2774_v46  ;;  %v3055_v23 = vrot.slane %v2082_v37, %v2776_v47 }
 0x2fa   : > { %v3058_v11 = vrot.slane %v2081_v48, %v2761_v40  ;;  %v1542_v36 = vrot.slane %v2083_v42, %v2774_v46  ;;  %v3062_v28 = vrot.slane %v2082_v37, %v2804_v56  ;;  %v3065_v39 = vrot.slane %v2081_v48, %v2763_v41 }
 0x2fb   : > { %v1321_v3 = vrot.slane %v1313_v52, 3  ;;  %v3068_v26 = vrot.slane %v2081_v48, %v2770_v44  ;;  %v1563_v30 = vrot.slane %v2083_v42, %v2776_v47  ;;  %v1587_v49 = vrot.slane %v3038_v14, 4 }
 0x2fc   : > { %v1608_v40 = vrot.slane %v3041_v57, 3  ;;  %v1650_v12 = vrot.slane %v3036_v29, 1  ;;  %v1629_v52 = vrot.slane %v3045_v18, 2  ;;  %v3079_v41 = vmul.f32 0.0, %v3062_v28 }
 0x2fd   : > { %v1322_v22 = vsel %vm1118_vm6, %v1320_v27, %v1321_v3  ;;  %v1324_v4 = vsel %vm1118_vm6, %v1321_v3, %v1323_v58  ;;  %v1681_v44 = vrot.slane %v3048_v61, 7  ;;  %v3085_v47 = vmul.f32 0.0, %v3052_v0 }
 0x2fe   : > { %v2978_v59 = vadd.f32 %v1322_v22, %v1315_v35  ;;  %v2980_v5 = vadd.f32 %v1324_v4, %v1316_v9  ;;  %v3088_v27 = vmul.f32 0.0, %v3055_v23  ;;  %v3091_v3 = vmul.f32 0.0, %v3058_v11 }
 0x2ff   : > { %v3094_v58 = vrot.slane %v2081_v48, %v2772_v45  ;;  %v3101_v54 = vmul.f32 0.0, %v3065_v39  ;;  %v3104_v9 = vmul.f32 0.0, %v3068_v26 }
 0x300   : > { %v1353_v8 = vpack.c.bf16 %v2980_v5, %v2978_v59 }
 0x302   : > { %2236 = vmatmul.mubr.msk.bf16.vlgmr.msra.gmra.mrb[8].mxu1 %vm557_vm1, %v1353_v8 }
 0x303   : > { %2259 = vmatprep.mubr.msk.bf16.mxu1 %vm2428_vm0, %v3290_v13  ;;  %2252 = vmatpush3.bf16.msra.mxu1 %v2351_v2 }
 0x304   : > { %2253 = vmatprep.subr.bf16.mxu1 %v3290_v13 }
 0x307   : > { %2254 = vmatpush3.bf16.msra.mxu1 %v2352_v17 }
 0x308   : > { %2255 = vmatprep.subr.bf16.mxu1 %v3290_v13 }
 0x30b   : > { %2256 = vmatpush3.bf16.msra.mxu1 %v2353_v34 }
 0x30c   : > { %2257 = vmatprep.subr.bf16.mxu1 %v3290_v13 }
 0x30f   : > { %2258 = vmatpush3.bf16.msra.mxu1 %v2354_v51 }
 0x3d5   : > { %v1421_v55 = vpop.f32.mrb[8].mxu1 }
 0x3d6   : > { %v1422_v15 = vadd.f32 %v2084_v21, %v1421_v55  ;;  %v2237_v10 = vpop.f32.mrb[9].mxu1 }
 0x3d7   : > { %v1424_v19 = vpop.f32.mrb[10].mxu1 }
 0x3d8   : > { %v1425_v62 = vadd.f32 %v2084_v21, %v1424_v19  ;;  %v2238_v32 = vpop.f32.mrb[11].mxu1  ;;  %v1428_v50 = vmax.f32 %v1422_v15, 0.0 }
 0x3da   : > { %v1429_v31 = vmax.f32 %v1425_v62, 0.0 }
 0x3dc   : > { %v1430_v33 = vpack.c.bf16 %v1429_v31, %v1428_v50 }
 0x3de   : > { %2248 = vmatmul.mubr.msk.bf16.vlgmr.msra.gmra.mrb[12].mxu0 %vm557_vm1, %v1430_v33 }
 0x4b1   : > { %v3070_v43 = vpop.f32.mrb[12].mxu0 }
 0x4b2   : > { %v1501_v46 = vrot.slane %v3070_v43, 5  ;;  %v2249_v56 = vpop.f32.mrb[13].mxu0 }
 0x4b3   : > { %v3082_v20 = vpop.f32.mrb[14].mxu0 }
 0x4b4   : > { %v3097_v53 = vsel %vm1007_vm2, 0.0, %v1501_v46  ;;  %v1502_v35 = vrot.slane %v3082_v20, 5  ;;  %v2250_v22 = vpop.f32.mrb[15].mxu0 }
 0x4b5   : > { %v1512_v4 = vmul.f32 %v1511_v24, %v3097_v53  ;;  %v1522_v8 = vmul.f32 %v1521_v1, %v3097_v53  ;;  %v1543_v13 = vmul.f32 %v1542_v36, %v3097_v53  ;;  %v1564_v45 = vmul.f32 %v1563_v30, %v3097_v53 }
 0x4b6   : > { %v3111_v16 = vsel %vm1007_vm2, %v1501_v46, %v1502_v35  ;;  %v1514_v7 = vmul.f32 %v1511_v24, %v1502_v35  ;;  %v1524_v21 = vmul.f32 %v1521_v1, %v1502_v35  ;;  %v1545_v55 = vmul.f32 %v1542_v36, %v1502_v35 }
 0x4b7   : > { %v1513_v15 = vmul.f32 %v1511_v24, %v3111_v16  ;;  %v1523_v10 = vmul.f32 %v1521_v1, %v3111_v16  ;;  %v1528_v19 = vrot.slane %v1522_v8, 7  ;;  %v1544_v62 = vmul.f32 %v1542_v36, %v3111_v16 }
 0x4b8   : > { %v1531_v32 = vrot.slane %v1524_v21, 7  ;;  %v1549_v50 = vrot.slane %v1543_v13, 6  ;;  %v1552_v31 = vrot.slane %v1545_v55, 6  ;;  %v1565_v33 = vmul.f32 %v1563_v30, %v3111_v16 }
 0x4b9   : > { %v1529_v2 = vrot.slane %v1523_v10, 7  ;;  %v1536_v17 = vadd.f32 %v1528_v19, %v1512_v4  ;;  %v1550_v34 = vrot.slane %v1544_v62, 6  ;;  %v1568_v51 = vrot.slane %v1564_v45, 5 }
 0x4ba   : > { %v1569_v37 = vrot.slane %v1565_v33, 5  ;;  %v1582_v42 = vmul.f32 %v1580_v63, %v3097_v53  ;;  %v1583_v48 = vmul.f32 %v1580_v63, %v3111_v16  ;;  %v1603_v14 = vmul.f32 %v3021_v38, %v3097_v53 }
 0x4bb   : > { %v1530_v57 = vsel %vm1035_vm3, %v1528_v19, %v1529_v2  ;;  %v1532_v24 = vsel %vm1035_vm3, %v1529_v2, %v1531_v32  ;;  %v1551_v1 = vsel %vm1057_vm4, %v1549_v50, %v1550_v34  ;;  %v1553_v36 = vsel %vm1057_vm4, %v1550_v34, %v1552_v31 }
 0x4bc   : > { %v1537_v30 = vadd.f32 %v1530_v57, %v1513_v15  ;;  %v1538_v46 = vadd.f32 %v1532_v24, %v1514_v7  ;;  %v1557_v56 = vadd.f32 %v1549_v50, %v1536_v17  ;;  %v1570_v35 = vsel %vm1007_vm2, %v1568_v51, %v1569_v37 }
 0x4bd   : > { %v1588_v22 = vrot.slane %v1582_v42, 4  ;;  %v1590_v4 = vrot.slane %v1583_v48, 4  ;;  %v1604_v63 = vmul.f32 %v3021_v38, %v3111_v16  ;;  %v1609_v8 = vrot.slane %v1603_v14, 3 }
 0x4be   : > { %v1558_v13 = vadd.f32 %v1551_v1, %v1537_v30  ;;  %v1559_v45 = vadd.f32 %v1553_v36, %v1538_v46  ;;  %v1574_v21 = vadd.f32 %v1568_v51, %v1557_v56  ;;  %v1624_v55 = vmul.f32 %v3027_v25, %v3097_v53 }
 0x4bf   : > { %v1589_v10 = vsel %vm1096_vm5, %v1587_v49, %v1588_v22  ;;  %v1591_v15 = vsel %vm1096_vm5, %v1588_v22, %v1590_v4  ;;  %v1610_v7 = vsel %vm1118_vm6, %v1608_v40, %v1609_v8  ;;  %v1611_v19 = vrot.slane %v1604_v63, 3 }
 0x4c0   : > { %v1575_v62 = vadd.f32 %v1570_v35, %v1558_v13  ;;  %v1576_v32 = vadd.f32 %v1569_v37, %v1559_v45  ;;  %v1595_v50 = vadd.f32 %v1589_v10, %v1574_v21  ;;  %v1625_v38 = vmul.f32 %v3027_v25, %v3111_v16 }
 0x4c1   : > { %v1612_v31 = vsel %vm1118_vm6, %v1609_v8, %v1611_v19  ;;  %v1630_v33 = vrot.slane %v1624_v55, 2  ;;  %v1645_v2 = vmul.f32 %v3017_v6, %v3097_v53  ;;  %v1646_v49 = vmul.f32 %v3017_v6, %v3111_v16 }
 0x4c2   : > { %v1596_v17 = vadd.f32 %v1591_v15, %v1575_v62  ;;  %v1597_v34 = vadd.f32 %v1590_v4, %v1576_v32  ;;  %v1616_v51 = vadd.f32 %v1610_v7, %v1595_v50  ;;  %v1632_v40 = vrot.slane %v1625_v38, 2 }
 0x4c3   : > { %v1631_v37 = vsel %vm1140_vm7, %v1629_v52, %v1630_v33  ;;  %v1651_v42 = vrot.slane %v1645_v2, 1  ;;  %v1653_v48 = vrot.slane %v1646_v49, 1  ;;  %v1666_v25 = vmul.f32 %v3062_v28, %v3097_v53 }
 0x4c4   : > { %v1617_v14 = vadd.f32 %v1612_v31, %v1596_v17  ;;  %v1618_v57 = vadd.f32 %v1611_v19, %v1597_v34  ;;  %v1633_v24 = vsel %vm1140_vm7, %v1630_v33, %v1632_v40  ;;  %v1637_v1 = vadd.f32 %v1631_v37, %v1616_v51 }
 0x4c5   : > { %v1652_v6 = vsel %vm1162_vm8, %v1650_v12, %v1651_v42  ;;  %v1654_v36 = vsel %vm1162_vm8, %v1651_v42, %v1653_v48  ;;  %v1667_v18 = vmul.f32 %v3062_v28, %v3111_v16  ;;  %v1676_v52 = vmul.f32 %v3024_v60, %v3097_v53 }
 0x4c6   : > { %v1638_v30 = vadd.f32 %v1633_v24, %v1617_v14  ;;  %v1639_v46 = vadd.f32 %v1632_v40, %v1618_v57  ;;  %v1658_v56 = vadd.f32 %v1652_v6, %v1637_v1  ;;  %v1677_v35 = vmul.f32 %v3024_v60, %v3111_v16 }
 0x4c7   : > { %v1682_v22 = vrot.slane %v1676_v52, 7  ;;  %v1697_v29 = vmul.f32 %v3052_v0, %v3097_v53  ;;  %v1698_v12 = vmul.f32 %v3052_v0, %v3111_v16  ;;  %v1718_v4 = vmul.f32 %v3055_v23, %v3097_v53 }
 0x4c8   : > { %v1659_v28 = vadd.f32 %v1654_v36, %v1638_v30  ;;  %v1660_v63 = vadd.f32 %v1653_v48, %v1639_v46  ;;  %v1668_v8 = vadd.f32 %v3079_v41, %v1658_v56  ;;  %v1684_v13 = vrot.slane %v1677_v35, 7 }
 0x4c9   : > { %v1702_v45 = vrot.slane %v3085_v47, 6  ;;  %v1703_v21 = vrot.slane %v1697_v29, 6  ;;  %v1705_v55 = vrot.slane %v1698_v12, 6  ;;  %v1721_v60 = vrot.slane %v3088_v27, 5 }
 0x4ca   : > { %v1669_v10 = vadd.f32 %v1666_v25, %v1659_v28  ;;  %v1670_v15 = vadd.f32 %v1667_v18, %v1660_v63  ;;  %v1685_v7 = vsel %vm1035_vm3, %v1682_v22, %v1684_v13  ;;  %v1689_v0 = vadd.f32 %v1681_v44, %v1668_v8 }
 0x4cb   : > { %v1683_v23 = vsel %vm1035_vm3, %v1681_v44, %v1682_v22  ;;  %v1706_v41 = vsel %vm1057_vm4, %v1703_v21, %v1705_v55  ;;  %v1722_v16 = vrot.slane %v1718_v4, 5  ;;  %v1735_v47 = vmul.f32 %v3058_v11, %v3097_v53 }
 0x4cc   : > { %v1690_v19 = vadd.f32 %v1683_v23, %v1669_v10  ;;  %v1691_v62 = vadd.f32 %v1685_v7, %v1670_v15  ;;  %v1710_v27 = vadd.f32 %v1702_v45, %v1689_v0  ;;  %v1753_v32 = vmul.f32 %v3065_v39, %v3097_v53 }
 0x4cd   : > { %v1704_v50 = vsel %vm1057_vm4, %v1702_v45, %v1703_v21  ;;  %v1738_v38 = vrot.slane %v3091_v3, 4  ;;  %v1740_v31 = vrot.slane %v1735_v47, 4  ;;  %v1771_v61 = vmul.f32 %v3068_v26, %v3097_v53  ;;  %v2095_v45 = vld [vmem:[%s3263_s11] ss:$0 sm:$0xff] }
 0x4ce   : > { %v1711_v44 = vadd.f32 %v1704_v50, %v1690_v19  ;;  %v1712_v33 = vadd.f32 %v1706_v41, %v1691_v62  ;;  %v1727_v2 = vadd.f32 %v1721_v60, %v1710_v27  ;;  %v1788_v49 = vmul.f32 0.0, %v3094_v58 }
 0x4cf   : > { %v1723_v11 = vsel %vm1007_vm2, %v1721_v60, %v1722_v16  ;;  %v1756_v17 = vrot.slane %v3101_v54, 3  ;;  %v1758_v34 = vrot.slane %v1753_v32, 3  ;;  %v1789_v39 = vmul.f32 %v3094_v58, %v3097_v53 }
 0x4d0   : > { %v1728_v51 = vadd.f32 %v1723_v11, %v1711_v44  ;;  %v1729_v40 = vadd.f32 %v1722_v16, %v1712_v33  ;;  %v1745_v3 = vadd.f32 %v1738_v38, %v1727_v2  ;;  %v1741_v37 = vsel %vm1096_vm5, %v1738_v38, %v1740_v31 }
 0x4d1   : > { %v1774_v26 = vrot.slane %v3104_v9, 2  ;;  %v1776_v42 = vrot.slane %v1771_v61, 2  ;;  %v1759_v57 = vsel %vm1118_vm6, %v1756_v17, %v1758_v34  ;;  %v1792_v24 = vrot.slane %v1788_v49, 1 }
 0x4d2   : > { %v1746_v48 = vadd.f32 %v1741_v37, %v1728_v51  ;;  %v1747_v25 = vadd.f32 %v1740_v31, %v1729_v40  ;;  %v1763_v14 = vadd.f32 %v1756_v17, %v1745_v3  ;;  %v1794_v1 = vrot.slane %v1789_v39, 1 }
 0x4d3   : > { %v1777_v58 = vsel %vm1140_vm7, %v1774_v26, %v1776_v42  ;;  %v1802_v29 = vadd.f32 %v3070_v43, %v2978_v59  ;;  %v1803_v12 = vadd.f32 %v3082_v20, %v2980_v5 }
 0x4d4   : > { %v1764_v54 = vadd.f32 %v1759_v57, %v1746_v48  ;;  %v1765_v6 = vadd.f32 %v1758_v34, %v1747_v25  ;;  %v1781_v36 = vadd.f32 %v1774_v26, %v1763_v14  ;;  %v1795_v30 = vsel %vm1162_vm8, %v1792_v24, %v1794_v1 }
 0x4d6   : > { %v1782_v53 = vadd.f32 %v1777_v58, %v1764_v54  ;;  %v1783_v18 = vadd.f32 %v1776_v42, %v1765_v6  ;;  %v1799_v52 = vadd.f32 %v1792_v24, %v1781_v36 }
 0x4d8   : > { %v1800_v46 = vadd.f32 %v1795_v30, %v1782_v53  ;;  %v1801_v9 = vadd.f32 %v1794_v1, %v1783_v18  ;;  %v1807_v56 = vrot.slane %v1799_v52, 3 }
 0x4da   : > { %v1808_v35 = vrot.slane %v1800_v46, 3  ;;  %v1810_v22 = vrot.slane %v1801_v9, 3 }
 0x4dc   : > { %v1809_v4 = vsel %vm1118_vm6, %v1807_v56, %v1808_v35  ;;  %v1811_v28 = vsel %vm1118_vm6, %v1808_v35, %v1810_v22 }
 0x4dd   : > { %v1814_v63 = vadd.f32 %v1809_v4, %v1802_v29  ;;  %v1815_v8 = vadd.f32 %v1811_v28, %v1803_v12 }
 0x4df   : > { %v1816_v13 = vpack.c.bf16 %v1815_v8, %v1814_v63 }
 0x4e1   : > { %2260 = vmatmul.mubr.msk.bf16.vlgmr.msra.gmra.mrb[12].mxu1 %vm557_vm1, %v1816_v13 }
 0x5b4   : > { %v1893_v21 = vpop.f32.mrb[12].mxu1 }
 0x5b5   : > { %v1894_v55 = vadd.f32 %v2095_v45, %v1893_v21  ;;  %v2261_v59 = vpop.f32.mrb[13].mxu1 }
 0x5b6   : > { %v1896_v43 = vpop.f32.mrb[14].mxu1 }
 0x5b7   : > { %v2101_v5 = vmul.f32 -1.442695, %v1894_v55  ;;  %v1897_v20 = vadd.f32 %v2095_v45, %v1896_v43  ;;  %v2262_v60 = vpop.f32.mrb[15].mxu1 }
 0x5b9   : > { %2355 = vpow2.f32 %v2101_v5  ;;  %v2102_v10 = vmul.f32 -1.442695, %v1897_v20 }
 0x5bb   : > { %2357 = vpow2.f32 %v2102_v10 }
 0x5c3   : > { %v2356_v15 = vpop.eup %2355 }
 0x5c4   : > { %v1906_v7 = vadd.f32 1.0, %v2356_v15 }
 0x5c5   : > { %v2358_v0 = vpop.eup %2357 }
 0x5c6   : > { %2359 = vrcp.f32 %v1906_v7  ;;  %v1907_v23 = vadd.f32 1.0, %v2358_v0 }
 0x5c8   : > { %2361 = vrcp.f32 %v1907_v23 }
 0x5d0   : > { %v2360_v41 = vpop.eup %2359 }
 0x5d1   : > { %1912 = vst.msk [vmem:[%s436_s23] sm:$0xff] %vm557_vm1, %v2360_v41 }
 0x5d2   : > { %v2362_v16 = vpop.eup %2361 }
 0x5d3   : > { %1913 = vst.msk [vmem:[%s436_s23 + $0x8] sm:$0xff] %vm557_vm1, %v2362_v16 }
 0x5d4   : > { %2376 = shalt.err (!%p2373_p3)
}
 0x5d5   : > { %s2377_s20 = scalar_lea.hbm %s3205_s14, 256  ;;  %s2381_s16 = scalar_lea.hbm %s3264_s12, 512 }
 0x5d6   : > { %p2378_p4 = scmp.ne.s32.totalorder %s3205_s14, %s2377_s20  ;;  %p2382_p9 = scmp.lt.u32.totalorder %s3205_s14, %s3264_s12 }
 0x5d7   : > { %p2383_p10 = scmp.lt.u32.totalorder %s2381_s16, %s2377_s20  ;;  %p2385_p12 = scmp.lt.u32.totalorder %s2377_s20, %s3205_s14 }
 0x5d8   : > { %p2379_p7 = pnand %p2378_p4, %p2535_p5 }
 0x5d9   : > { %p2384_p11 = por %p2383_p10, %p2382_p9 }
 0x5da   : > { %p2380_p8 = pneg %p2379_p7 }
 0x5db   : > { %p2386_p13 = por %p2385_p12, %p2384_p11 }
 0x5dd   : > { %p2387_p0 = pnand %p2386_p13, %p2380_p8 }
 0x5df   : > { %2390 = shalt.err (!%p2387_p0)
}
 0x5e0   : > { %s2430_s28 = smov 128   ;;  %s2431_s25 = smov 8  }
 0x5e1   : > { %2264 = dma.vmem_to_hbm [thread:$0]  (%p2535_p5), %s3207_s27, 256, %s3205_s14, %s3211_s17, %s2430_s28, %s2430_s28, %s2431_s25  }
 0x5e2 PF: > { %p2270_p1 = scmp.ge.s32.totalorder %s2425_s24, 2  ;;  %s1943_s15 = sand.u32 1, %s2413_s21  }
 0x5e3   : > { %s1944_s19 = scalar_lea.sflag [#allocation3], %s1943_s15 }
 0x5e4   : > { %p2267_p2 = pnand %p2270_p1, %p2539_p6 }
 0x5e6   : > { %2408 = dma.done.wait (!%p2267_p2), %s1944_s19, 256  }
 0x5e7   : > { %2410 = vsyncadd (!%p2267_p2), %s1944_s19, 4294967040  ;;  %s3292_s24 = sld [smem:[#allocation6_spill]]  ;;  %s3293_s20 = sld [smem:[#allocation5_spill]] }
 0x5e8   : > { %s3294_s23 = sld [smem:[#allocation7_spill]]  ;;  %s3295_s21 = smov %s2417_s22 }
 0x5ed   : > { %p22_p3 = scmp.ge.s32.totalorder %s3292_s24, 4   ;;  %s3296_s22 = smov %s3293_s20 }
 0x5ef   :  { %24 = sbr.rel (!%p22_p3) target bundleno = 3 (0x3), region = 113 }
 0x5f6   :  { %1949 = vsyncpa [#allocation3], 1 }
 0x5f7   :  { %1951 = vsyncpa [#allocation3 + $0x1], 1 }

// kernel: _lambda_.3
= control target key start
LH: loop header
LB: loop body
LE: loop exit
PB: predicated region body
PF: predicated region fallthrough
CT: control target
= control target key end

     0   :  { %s1996_s30 = smov 0   ;;  %s2587_s0 = inlined_call_operand.vmem [shape: f32[2,16,64], index: 0, kind: input, shape index: {}]   ;;  %s2588_s1 = inlined_call_operand.vmem [shape: bf16[64,64], index: 1, kind: input, shape index: {}]   ;;  %s2589_s2 = inlined_call_operand.vmem [shape: f32[1,64], index: 2, kind: input, shape index: {}]   ;;  %s2590_s3 = inlined_call_operand.vmem [shape: bf16[2,64,64], index: 3, kind: input, shape index: {}]   ;;  %s2591_s4 = inlined_call_operand.vmem [shape: f32[2,1,64], index: 4, kind: input, shape index: {}]   ;;  %s2592_s5 = inlined_call_operand.vmem [shape: bf16[2,64,64], index: 5, kind: input, shape index: {}]   ;;  %s2593_s6 = inlined_call_operand.vmem [shape: f32[2,20,64], index: 6, kind: input, shape index: {}]   ;;  %s2594_s7 = inlined_call_operand.vmem [shape: bf16[64,384], index: 7, kind: input, shape index: {}]   ;;  %s2595_s8 = inlined_call_operand.vmem [shape: f32[1,384], index: 8, kind: input, shape index: {}]   ;;  %s2596_s9 = inlined_call_operand.vmem [shape: f32[2,16,384], index: 9, kind: output, shape index: {}]  }
   0x1 LB: > { %s1682_s10 = sadd.s32 4294967295, %s1941_s30   ;;  %p1686_p0 = scmp.ge.s32.totalorder %s1941_s30, 1  ;;  %s1941_s30 = sphi %s1996_s30, %s19_s30  }
   0x2   : > { %p287_p1 = scmp.lt.s32.totalorder %s1941_s30, 3 }
   0x4   : > { %p288_p2 = pnand %p1686_p0, %p287_p1 }
   0x5   : > { %v1875_v0 = vld [vmem:[%s2588_s1] sm:$0xff] (!%p288_p2)   ;;  %v2597_v1 = vmov (!%p288_p2), 0.0   ;;  %v1876_v2 = vld [vmem:[%s2588_s1 + $0x8] sm:$0xff] (!%p288_p2)   ;;  %vm1944_vm0 = vmmov (!%p288_p2), 0   ;;  %p323_p3 = scmp.lt.s32.totalorder (!%p288_p2), %s1682_s10, 1  ;;  %v1877_v4 = vld [vmem:[%s2588_s1 + $0x10] sm:$0xff] (!%p288_p2)   ;;  %v599_v42 = vlaneseq (!%p288_p2) }
   0x6   : > { %291 = sbr.rel (%p288_p2) target bundleno = 1450 (0x5aa), region = 56  ;;  %1791 = vmatprep.subr.bf16.mxu0 (!%p288_p2), %v2597_v1  ;;  %1803 = vmatprep.subr.bf16.mxu1 (!%p288_p2), %v2597_v1  ;;  %v1879_v3 = vld [vmem:[%s2590_s3] sm:$0xff] (!%p288_p2)   ;;  %v1880_v5 = vld [vmem:[%s2590_s3 + $0x8] sm:$0xff] (!%p288_p2)   ;;  %v1878_v6 = vld [vmem:[%s2588_s1 + $0x18] sm:$0xff] (!%p288_p2)   ;;  %vm376_vm1 = vcmask (!%p288_p2), 523264   ;;  %vm591_vm2 = vcmask (!%p288_p2), 1042432  }
   0x7   : > { %1792 = vmatpush3.bf16.msra.mxu0 (!%p288_p2), %v1875_v0  ;;  %1799 = vmatprep.mubr.msk.bf16.mxu0 (!%p288_p2), %vm1944_vm0, %v2597_v1  ;;  %v1881_v10 = vld [vmem:[%s2590_s3 + $0x10] sm:$0xff] (!%p288_p2)   ;;  %v1882_v11 = vld [vmem:[%s2590_s3 + $0x18] sm:$0xff] (!%p288_p2)   ;;  %v1883_v12 = vld [vmem:[%s2592_s5] sm:$0xff] (!%p288_p2)   ;;  %v600_v43 = vshrl.u32 (!%p288_p2), %v599_v42, 7  ;;  %vm619_vm3 = vcmask (!%p288_p2), 1040384   ;;  %vm641_vm4 = vcmask (!%p288_p2), 1041408  }
   0x8   : > { %1793 = vmatprep.subr.bf16.mxu0 (!%p288_p2), %v2597_v1  ;;  %1811 = vmatprep.mubr.msk.bf16.mxu1 (!%p288_p2), %vm1944_vm0, %v2597_v1  ;;  %v1884_v13 = vld [vmem:[%s2592_s5 + $0x8] sm:$0xff] (!%p288_p2)   ;;  %v1690_v14 = vld [vmem:[%s2589_s2] ss:$0 sm:$0xff] (!%p288_p2)  ;;  %v1885_v24 = vld [vmem:[%s2592_s5 + $0x10] sm:$0xff] (!%p288_p2)   ;;  %vm680_vm5 = vcmask (!%p288_p2), 1043456   ;;  %vm702_vm6 = vcmask (!%p288_p2), 1044480  }
   0x9   : > { %1804 = vmatpush3.bf16.msra.mxu1 (!%p288_p2), %v1879_v3  ;;  %v1886_v25 = vld [vmem:[%s2592_s5 + $0x18] sm:$0xff] (!%p288_p2)   ;;  %v1696_v26 = vld [vmem:[%s2591_s4] ss:$0 sm:$0xff] (!%p288_p2)  ;;  %v1888_v37 = vld [vmem:[%s2590_s3 + $0x28] sm:$0xff] (!%p288_p2)   ;;  %v2112_v44 = vsub.s32 (!%p288_p2), 7, %v600_v43  ;;  %v2114_v45 = vsub.s32 (!%p288_p2), 6, %v600_v43 }
   0xa   : > { %1805 = vmatprep.subr.bf16.mxu1 (!%p288_p2), %v2597_v1  ;;  %v1887_v36 = vld [vmem:[%s2590_s3 + $0x20] sm:$0xff] (!%p288_p2)   ;;  %v1892_v39 = vld [vmem:[%s2592_s5 + $0x28] sm:$0xff] (!%p288_p2)   ;;  %v1889_v40 = vld [vmem:[%s2590_s3 + $0x30] sm:$0xff] (!%p288_p2)   ;;  %v2119_v47 = vsub.s32 (!%p288_p2), 2, %v600_v43  ;;  %v2121_v48 = vsub.s32 (!%p288_p2), 5, %v600_v43  ;;  %v2123_v49 = vsub.s32 (!%p288_p2), 4, %v600_v43 }
   0xb   : > { %1794 = vmatpush3.bf16.msra.mxu0 (!%p288_p2), %v1876_v2  ;;  %v1891_v38 = vld [vmem:[%s2592_s5 + $0x20] sm:$0xff] (!%p288_p2)   ;;  %v1890_v41 = vld [vmem:[%s2590_s3 + $0x38] sm:$0xff] (!%p288_p2)   ;;  %v441_v46 = vld [vmem:[%s2593_s6 + $0x8] sm:$0xff] (!%p288_p2)  ;;  %v2125_v50 = vsub.s32 (!%p288_p2), 1, %v600_v43  ;;  %v2127_v51 = vsub.s32 (!%p288_p2), 0, %v600_v43  ;;  %v2155_v60 = vsub.s32 (!%p288_p2), 3, %v600_v43 }
   0xc   : > { %1795 = vmatprep.subr.bf16.mxu0 (!%p288_p2), %v2597_v1  ;;  %v2130_v52 = vrot.slane (!%p288_p2), %v441_v46, %v2112_v44  ;;  %v2133_v53 = vrot.slane (!%p288_p2), %v441_v46, %v2114_v45  ;;  %v2136_v54 = vrot.slane (!%p288_p2), %v441_v46, %v2121_v48  ;;  %v2139_v55 = vrot.slane (!%p288_p2), %v441_v46, %v2123_v49  ;;  %v2153_v59 = vld [vmem:[%s2593_s6] sm:$0xff] (!%p288_p2)  ;;  %v442_v61 = vld [vmem:[%s2593_s6 + $0x10] sm:$0xf] (!%p288_p2) }
   0xd   : > { %s2614_s10 = smov (!%p323_p3, %s1682_s10), 1  ;;  %1806 = vmatpush3.bf16.msra.mxu1 %v1880_v5  ;;  %v2142_v56 = vrot.slane %v441_v46, %v2119_v47  ;;  %v2145_v57 = vrot.slane %v441_v46, %v2125_v50  ;;  %v2148_v58 = vrot.slane %v441_v46, %v2127_v51  ;;  %vm724_vm7 = vcmask 1045504  }
   0xe   : > { %s1760_s19 = sshll.u32 %s2614_s10, 4  ;;  %1807 = vmatprep.subr.bf16.mxu1 %v2597_v1  ;;  %v2161_v62 = vmul.f32 0.0, %v2130_v52  ;;  %v2164_v63 = vmul.f32 0.0, %v2133_v53  ;;  %v2167_v0 = vmul.f32 0.0, %v2136_v54  ;;  %v2170_v2 = vmul.f32 0.0, %v2139_v55  ;;  %s1863_s23 = smul.u32 48, %s2614_s10 }
   0xf   : > { %s327_s24 = scalar_lea.vmem %s2587_s0, %s1760_s19  ;;  %1796 = vmatpush3.bf16.msra.mxu0 %v1877_v4  ;;  %v2173_v3 = vmul.f32 0.0, %v2142_v56  ;;  %v2176_v4 = vmul.f32 0.0, %v2145_v57  ;;  %v2179_v5 = vmul.f32 0.0, %v2148_v58  ;;  %vm746_vm8 = vcmask 1046528  }
  0x10   : > { %v334_v7 = vld [vmem:[%s327_s24] sm:$0xff]  ;;  %v335_v8 = vld [vmem:[%s327_s24 + $0x8] sm:$0xff]  ;;  %1797 = vmatprep.subr.bf16.mxu0 %v2597_v1  ;;  %s332_s26 = scalar_lea.vmem %s2596_s9, %s1863_s23 }
  0x11   : > { %v336_v9 = vpack.c.bf16 %v335_v8, %v334_v7  ;;  %1808 = vmatpush3.bf16.msra.mxu1 %v1881_v10  ;;  %v602_v7 = vrot.slane %v442_v61, %v2155_v60  ;;  %v612_v8 = vrot.slane %v442_v61, %v2119_v47  ;;  %v2190_v10 = vrot.slane %v2153_v59, %v2114_v45 }
  0x12   : > { %1809 = vmatprep.subr.bf16.mxu1 %v2597_v1 }
  0x13   : > { %1798 = vmatpush3.bf16.msra.mxu0 %v1878_v6  ;;  %v2183_v6 = vrot.slane %v2153_v59, %v2112_v44 }
  0x14   : > { %1815 = vmatprep.subr.bf16.mxu0 %v2597_v1 }
  0x15   : > { %1810 = vmatpush3.bf16.msra.mxu1 %v1882_v11 }
  0x16   : > { %1800 = vmatmul.mubr.msk.bf16.vlgmr.msra.gmra.mrb[0].mxu0 %vm376_vm1, %v336_v9  ;;  %1827 = vmatprep.subr.bf16.mxu1 %v2597_v1  ;;  %v634_v9 = vrot.slane %v442_v61, %v2125_v50 }
  0x17   : > { %1823 = vmatprep.mubr.msk.bf16.mxu0 %vm1944_vm0, %v2597_v1  ;;  %1816 = vmatpush3.bf16.msra.mxu0 %v1883_v12  ;;  %v656_v12 = vrot.slane %v442_v61, %v2127_v51 }
  0x18   : > { %1817 = vmatprep.subr.bf16.mxu0 %v2597_v1 }
  0x1b   : > { %1818 = vmatpush3.bf16.msra.mxu0 %v1884_v13  ;;  %v681_v13 = vrot.slane %v2161_v62, 4 }
  0x1c   : > { %1819 = vmatprep.subr.bf16.mxu0 %v2597_v1 }
  0x1f   : > { %1820 = vmatpush3.bf16.msra.mxu0 %v1885_v24 }
  0x20   : > { %1821 = vmatprep.subr.bf16.mxu0 %v2597_v1 }
  0x23   : > { %1822 = vmatpush3.bf16.msra.mxu0 %v1886_v25 }
  0x24   : > { %1839 = vmatprep.subr.bf16.mxu0 %v2597_v1 }
  0xe9   : > { %v414_v15 = vpop.f32.mrb[0].mxu0 }
  0xea   : > { %v2062_v16 = vadd.f32 %v1690_v14, %v414_v15  ;;  %v1801_v17 = vpop.f32.mrb[1].mxu0  ;;  %v2198_v15 = vrot.slane %v441_v46, %v2155_v60 }
  0xeb   : > { %v417_v18 = vpop.f32.mrb[2].mxu0 }
  0xec   : > { %v2064_v19 = vadd.f32 %v1690_v14, %v417_v18  ;;  %v1802_v20 = vpop.f32.mrb[3].mxu0  ;;  %v2600_v21 = vmax.f32 %v2062_v16, 0.0 }
  0xee   : > { %v2599_v22 = vmax.f32 %v2064_v19, 0.0 }
  0xf0   : > { %v443_v23 = vpack.c.bf16 %v2599_v22, %v2600_v21 }
  0xf2   : > { %1812 = vmatmul.mubr.msk.bf16.vlgmr.msra.gmra.mrb[0].mxu1 %vm376_vm1, %v443_v23 }
  0xf3   : > { %1835 = vmatprep.mubr.msk.bf16.mxu1 %vm1944_vm0, %v2597_v1  ;;  %1828 = vmatpush3.bf16.msra.mxu1 %v1887_v36 }
  0xf4   : > { %1829 = vmatprep.subr.bf16.mxu1 %v2597_v1 }
  0xf7   : > { %1830 = vmatpush3.bf16.msra.mxu1 %v1888_v37 }
  0xf8   : > { %1831 = vmatprep.subr.bf16.mxu1 %v2597_v1 }
  0xfb   : > { %1832 = vmatpush3.bf16.msra.mxu1 %v1889_v40 }
  0xfc   : > { %1833 = vmatprep.subr.bf16.mxu1 %v2597_v1 }
  0xff   : > { %1834 = vmatpush3.bf16.msra.mxu1 %v1890_v41 }
 0x1c5   : > { %v511_v27 = vpop.f32.mrb[0].mxu1 }
 0x1c6   : > { %v512_v28 = vadd.f32 %v1696_v26, %v511_v27  ;;  %v1813_v29 = vpop.f32.mrb[1].mxu1 }
 0x1c7   : > { %v514_v30 = vpop.f32.mrb[2].mxu1  ;;  %v2212_v29 = vmul.f32 0.0, %v2183_v6 }
 0x1c8   : > { %v515_v31 = vadd.f32 %v1696_v26, %v514_v30  ;;  %v1814_v32 = vpop.f32.mrb[3].mxu1  ;;  %v518_v33 = vmax.f32 %v512_v28, 0.0  ;;  %v2207_v26 = vmul.f32 0.0, %v2198_v15 }
 0x1c9   : > { %v2219_v32 = vmul.f32 0.0, %v2190_v10 }
 0x1ca   : > { %v519_v34 = vmax.f32 %v515_v31, 0.0 }
 0x1cc   : > { %v520_v35 = vpack.c.bf16 %v519_v34, %v518_v33  ;;  %v2223_v33 = vrot.slane %v2153_v59, %v2121_v48 }
 0x1ce   : > { %1824 = vmatmul.mubr.msk.bf16.vlgmr.msra.gmra.mrb[4].mxu0 %vm376_vm1, %v520_v35 }
 0x1cf   : > { %1847 = vmatprep.mubr.msk.bf16.mxu0 %vm1944_vm0, %v2597_v1  ;;  %1840 = vmatpush3.bf16.msra.mxu0 %v1891_v38 }
 0x1d0   : > { %1841 = vmatprep.subr.bf16.mxu0 %v2597_v1 }
 0x1d3   : > { %1842 = vmatpush3.bf16.msra.mxu0 %v1892_v39 }
 0x1d4   : > { %1843 = vmatprep.subr.bf16.mxu0 %v2597_v1 }
 0x2a1   : > { %v2192_v11 = vpop.f32.mrb[4].mxu0 }
 0x2a2   : > { %v592_v17 = vrot.slane %v2192_v11, 5  ;;  %v1825_v18 = vpop.f32.mrb[5].mxu0 }
 0x2a3   : > { %v2204_v25 = vpop.f32.mrb[6].mxu0 }
 0x2a4   : > { %v2215_v30 = vsel %vm591_vm2, 0.0, %v592_v17  ;;  %v593_v31 = vrot.slane %v2204_v25, 5  ;;  %v1826_v34 = vpop.f32.mrb[7].mxu0 }
 0x2a5   : > { %v603_v35 = vmul.f32 %v602_v7, %v2215_v30  ;;  %v613_v36 = vmul.f32 %v612_v8, %v2215_v30  ;;  %v635_v37 = vmul.f32 %v634_v9, %v2215_v30  ;;  %v657_v38 = vmul.f32 %v656_v12, %v2215_v30 }
 0x2a6   : > { %v2230_v39 = vsel %vm591_vm2, %v592_v17, %v593_v31  ;;  %v605_v40 = vmul.f32 %v602_v7, %v593_v31  ;;  %v615_v41 = vmul.f32 %v612_v8, %v593_v31  ;;  %v637_v42 = vmul.f32 %v634_v9, %v593_v31 }
 0x2a7   : > { %v604_v43 = vmul.f32 %v602_v7, %v2230_v39  ;;  %v614_v46 = vmul.f32 %v612_v8, %v2230_v39  ;;  %v620_v61 = vrot.slane %v613_v36, 7  ;;  %v636_v18 = vmul.f32 %v634_v9, %v2230_v39 }
 0x2a8   : > { %v623_v34 = vrot.slane %v615_v41, 7  ;;  %v642_v1 = vrot.slane %v635_v37, 6  ;;  %v645_v22 = vrot.slane %v637_v42, 6  ;;  %v658_v21 = vmul.f32 %v656_v12, %v2230_v39 }
 0x2a9   : > { %v621_v28 = vrot.slane %v614_v46, 7  ;;  %v628_v27 = vadd.f32 %v620_v61, %v603_v35  ;;  %v643_v17 = vrot.slane %v636_v18, 6  ;;  %v661_v24 = vrot.slane %v657_v38, 5 }
 0x2aa   : > { %v662_v23 = vrot.slane %v658_v21, 5  ;;  %v675_v31 = vmul.f32 %v2130_v52, %v2215_v30  ;;  %v676_v7 = vmul.f32 %v2130_v52, %v2230_v39  ;;  %v697_v8 = vmul.f32 %v2133_v53, %v2215_v30 }
 0x2ab   : > { %v622_v9 = vsel %vm619_vm3, %v620_v61, %v621_v28  ;;  %v624_v12 = vsel %vm619_vm3, %v621_v28, %v623_v34  ;;  %v644_v36 = vsel %vm641_vm4, %v642_v1, %v643_v17  ;;  %v646_v35 = vsel %vm641_vm4, %v643_v17, %v645_v22 }
 0x2ac   : > { %v629_v37 = vadd.f32 %v622_v9, %v604_v43  ;;  %v630_v21 = vadd.f32 %v624_v12, %v605_v40  ;;  %v650_v38 = vadd.f32 %v642_v1, %v628_v27  ;;  %v663_v41 = vsel %vm591_vm2, %v661_v24, %v662_v23 }
 0x2ad   : > { %v682_v42 = vrot.slane %v675_v31, 4  ;;  %v684_v46 = vrot.slane %v676_v7, 4  ;;  %v698_v52 = vmul.f32 %v2133_v53, %v2230_v39  ;;  %v704_v18 = vrot.slane %v697_v8, 3 }
 0x2ae   : > { %v651_v20 = vadd.f32 %v644_v36, %v629_v37  ;;  %v652_v14 = vadd.f32 %v646_v35, %v630_v21  ;;  %v667_v61 = vadd.f32 %v661_v24, %v650_v38  ;;  %v719_v28 = vmul.f32 %v2136_v54, %v2215_v30 }
 0x2af   : > { %v683_v22 = vsel %vm680_vm5, %v681_v13, %v682_v42  ;;  %v685_v1 = vsel %vm680_vm5, %v682_v42, %v684_v46  ;;  %v2601_v27 = vrot.slane %v2164_v63, 3  ;;  %v706_v43 = vrot.slane %v698_v52, 3 }
 0x2b0   : > { %v668_v34 = vadd.f32 %v663_v41, %v651_v20  ;;  %v669_v53 = vadd.f32 %v662_v23, %v652_v14  ;;  %v689_v17 = vadd.f32 %v683_v22, %v667_v61  ;;  %v720_v24 = vmul.f32 %v2136_v54, %v2230_v39 }
 0x2b1   : > { %v705_v40 = vsel %vm702_vm6, %v2601_v27, %v704_v18  ;;  %v707_v31 = vsel %vm702_vm6, %v704_v18, %v706_v43  ;;  %v726_v7 = vrot.slane %v719_v28, 2  ;;  %v741_v62 = vmul.f32 %v2139_v55, %v2215_v30 }
 0x2b2   : > { %v742_v13 = vmul.f32 %v2139_v55, %v2230_v39  ;;  %v690_v8 = vadd.f32 %v685_v1, %v668_v34  ;;  %v691_v63 = vadd.f32 %v684_v46, %v669_v53  ;;  %v711_v9 = vadd.f32 %v705_v40, %v689_v17 }
 0x2b3   : > { %v728_v12 = vrot.slane %v720_v24, 2  ;;  %v2602_v20 = vrot.slane %v2167_v0, 2  ;;  %v748_v23 = vrot.slane %v741_v62, 1  ;;  %v763_v54 = vmul.f32 %v2198_v15, %v2215_v30 }
 0x2b4   : > { %v750_v36 = vrot.slane %v742_v13, 1  ;;  %v712_v35 = vadd.f32 %v707_v31, %v690_v8  ;;  %v713_v37 = vadd.f32 %v706_v43, %v691_v63  ;;  %v2603_v55 = vrot.slane %v2170_v2, 1 }
 0x2b5   : > { %v727_v14 = vsel %vm724_vm7, %v2602_v20, %v726_v7  ;;  %v729_v21 = vsel %vm724_vm7, %v726_v7, %v728_v12  ;;  %v764_v0 = vmul.f32 %v2198_v15, %v2230_v39  ;;  %v773_v46 = vmul.f32 %v2142_v56, %v2215_v30 }
 0x2b6   : > { %v733_v38 = vadd.f32 %v727_v14, %v711_v9  ;;  %v749_v41 = vsel %vm746_vm8, %v2603_v55, %v748_v23  ;;  %v751_v42 = vsel %vm746_vm8, %v748_v23, %v750_v36  ;;  %v734_v52 = vadd.f32 %v729_v21, %v712_v35 }
 0x2b7   : > { %v735_v18 = vadd.f32 %v728_v12, %v713_v37  ;;  %v774_v28 = vmul.f32 %v2142_v56, %v2230_v39  ;;  %v779_v22 = vrot.slane %v773_v46, 7  ;;  %v794_v2 = vmul.f32 %v2145_v57, %v2215_v30 }
 0x2b8   : > { %v755_v61 = vadd.f32 %v749_v41, %v733_v38  ;;  %v795_v1 = vmul.f32 %v2145_v57, %v2230_v39  ;;  %v815_v27 = vmul.f32 %v2148_v58, %v2215_v30  ;;  %v756_v15 = vadd.f32 %v751_v42, %v734_v52 }
 0x2b9   : > { %v757_v40 = vadd.f32 %v750_v36, %v735_v18  ;;  %v781_v34 = vrot.slane %v774_v28, 7  ;;  %v800_v53 = vrot.slane %v794_v2, 6  ;;  %v867_v24 = vmul.f32 0.0, %v2223_v33 }
 0x2ba   : > { %v765_v43 = vadd.f32 %v2207_v26, %v755_v61  ;;  %v802_v17 = vrot.slane %v795_v1, 6  ;;  %v884_v56 = vrot.slane %v2153_v59, %v2123_v49  ;;  %v766_v31 = vadd.f32 %v763_v54, %v756_v15 }
 0x2bb   : > { %v767_v7 = vadd.f32 %v764_v0, %v757_v40  ;;  %v782_v62 = vsel %vm619_vm3, %v779_v22, %v781_v34  ;;  %v2604_v57 = vrot.slane %v2173_v3, 7  ;;  %v819_v8 = vrot.slane %v815_v27, 5 }
 0x2bc   : > { %v803_v26 = vsel %vm641_vm4, %v800_v53, %v802_v17  ;;  %v832_v63 = vmul.f32 %v2183_v6, %v2215_v30  ;;  %v2606_v59 = vrot.slane %v2176_v4, 6  ;;  %v850_v14 = vmul.f32 %v2190_v10, %v2215_v30 }
 0x2bd   : > { %v786_v39 = vadd.f32 %v2604_v57, %v765_v43  ;;  %v2605_v58 = vmov %v2604_v57  ;;  %v788_v12 = vadd.f32 %v782_v62, %v767_v7  ;;  %v835_v36 = vrot.slane %v2212_v29, 4 }
 0x2be   : > { %v780_v13 = vsel %vm619_vm3, %v2605_v58, %v779_v22  ;;  %v2607_v23 = vmov %v2606_v59  ;;  %v837_v54 = vrot.slane %v832_v63, 4  ;;  %v868_v35 = vmul.f32 %v2223_v33, %v2215_v30 }
 0x2bf   : > { %v787_v9 = vadd.f32 %v780_v13, %v766_v31  ;;  %v807_v20 = vadd.f32 %v2606_v59, %v786_v39  ;;  %v801_v3 = vsel %vm641_vm4, %v2607_v23, %v800_v53  ;;  %v809_v6 = vadd.f32 %v803_v26, %v788_v12 }
 0x2c0   : > { %v2608_v21 = vrot.slane %v2179_v5, 5  ;;  %v885_v55 = vmul.f32 0.0, %v884_v56  ;;  %v853_v4 = vrot.slane %v2219_v32, 3  ;;  %v855_v42 = vrot.slane %v850_v14, 3 }
 0x2c1   : > { %v808_v37 = vadd.f32 %v801_v3, %v787_v9  ;;  %v886_v0 = vmul.f32 %v884_v56, %v2215_v30  ;;  %v826_v46 = vadd.f32 %v819_v8, %v809_v6  ;;  %v838_v33 = vsel %vm680_vm5, %v835_v36, %v837_v54  ;;  %v1895_v6 = vld [vmem:[%s2594_s7] ss:$12 sps:$4 sm:$0xff]  }
 0x2c2   : > { %v824_v38 = vadd.f32 %v2608_v21, %v807_v20  ;;  %v2609_v41 = vmov %v2608_v21  ;;  %v871_v18 = vrot.slane %v867_v24, 2  ;;  %v873_v61 = vrot.slane %v868_v35, 2  ;;  %v1897_v21 = vld [vmem:[%s2594_s7 + $0x4] ss:$12 sps:$4 sm:$0xff]  }
 0x2c3   : > { %v820_v10 = vsel %vm591_vm2, %v2609_v41, %v819_v8  ;;  %v844_v22 = vadd.f32 %v837_v54, %v826_v46  ;;  %v856_v1 = vsel %vm702_vm6, %v853_v4, %v855_v42  ;;  %v889_v5 = vrot.slane %v885_v55, 1  ;;  %v1901_v55 = vld [vmem:[%s2594_s7 + $0x1c] ss:$12 sps:$4 sm:$0xff]   ;;  %1501 = vmatprep.subr.bf16.mxu1 %v1897_v21  ;;  %v1902_v41 = vld [vmem:[%s2594_s7 + $0x20] ss:$12 sps:$4 sm:$0xff]  }
 0x2c4   : > { %v825_v29 = vadd.f32 %v820_v10, %v808_v37  ;;  %v842_v52 = vadd.f32 %v835_v36, %v824_v38  ;;  %v891_v27 = vrot.slane %v886_v0, 1  ;;  %v874_v43 = vsel %vm724_vm7, %v871_v18, %v873_v61  ;;  %v1898_v38 = vld [vmem:[%s2594_s7 + $0x8] ss:$12 sps:$4 sm:$0xff]   ;;  %v1899_v10 = vld [vmem:[%s2594_s7 + $0x18] ss:$12 sps:$4 sm:$0xff]  }
 0x2c5   : > { %v862_v40 = vadd.f32 %v855_v42, %v844_v22  ;;  %v2610_v57 = vmax.f32 %v2062_v16, 0.0  ;;  %v2611_v58 = vmax.f32 %v2064_v19, 0.0  ;;  %v1893_v16 = vld [vmem:[%s2592_s5 + $0x30] sm:$0xff]   ;;  %v1894_v19 = vld [vmem:[%s2592_s5 + $0x38] sm:$0xff]   ;;  %v1945_v42 = vmov 0  }
 0x2c6   : > { %v843_v28 = vadd.f32 %v838_v33, %v825_v29  ;;  %v860_v2 = vadd.f32 %v853_v4, %v842_v52  ;;  %v892_v17 = vsel %vm746_vm8, %v889_v5, %v891_v27  ;;  %1844 = vmatpush3.bf16.msra.mxu0 %v1893_v16  ;;  %v1905_v4 = vld [vmem:[%s2594_s7 + $0x34] ss:$12 sps:$4 sm:$0xff]   ;;  %v1906_v0 = vld [vmem:[%s2594_s7 + $0x38] ss:$12 sps:$4 sm:$0xff]   ;;  %v1903_v29 = vld [vmem:[%s2594_s7 + $0x30] ss:$12 sps:$4 sm:$0xff]  }
 0x2c7   : > { %v880_v34 = vadd.f32 %v873_v61, %v862_v40  ;;  %v899_v39 = vadd.f32 %v2192_v11, %v2610_v57  ;;  %v900_v13 = vadd.f32 %v2204_v25, %v2611_v58  ;;  %v2612_v11 = vmov 0.0   ;;  %v1727_v25 = vld [vmem:[%s2591_s4 + $0x1] ss:$0 sm:$0xff]  ;;  %v1909_v46 = vld [vmem:[%s2594_s7 + $0x4c] ss:$12 sps:$4 sm:$0xff]  }
 0x2c8   : > { %v861_v15 = vadd.f32 %v856_v1, %v843_v28  ;;  %v878_v32 = vadd.f32 %v871_v18, %v860_v2  ;;  %1845 = vmatprep.subr.bf16.mxu0 %v2612_v11  ;;  %v1910_v52 = vld [vmem:[%s2594_s7 + $0x50] ss:$12 sps:$4 sm:$0xff]   ;;  %v1907_v33 = vld [vmem:[%s2594_s7 + $0x48] ss:$12 sps:$4 sm:$0xff]   ;;  %v1725_v18 = vld [vmem:[%s2593_s6 + $0x20] sm:$0xff] }
 0x2c9   : > { %v898_v24 = vadd.f32 %v891_v27, %v880_v34  ;;  %v2393_v61 = vrot.slane %v1725_v18, %v2123_v49  ;;  %v1164_v28 = vrot.slane %v1725_v18, %v2112_v44  ;;  %v2397_v22 = vrot.slane %v1725_v18, %v2114_v45  ;;  %v1726_v1 = vld [vmem:[%s2593_s6 + $0x28] sm:$0xf] }
 0x2ca   : > { %v879_v30 = vadd.f32 %v874_v43, %v861_v15  ;;  %v896_v53 = vadd.f32 %v889_v5, %v878_v32  ;;  %1846 = vmatpush3.bf16.msra.mxu0 %v1894_v19  ;;  %v2400_v2 = vrot.slane %v1725_v18, %v2121_v48  ;;  %v1724_v5 = vld [vmem:[%s2593_s6 + $0x18] sm:$0xff]  ;;  %v2409_v27 = vrot.slane %v1725_v18, %v2119_v47 }
 0x2cb   : > { %v907_v62 = vrot.slane %v898_v24, 3  ;;  %1851 = vmatprep.subr.bf16.mxu0 %v2612_v11  ;;  %v2412_v15 = vmul.f32 0.0, %v2393_v61  ;;  %v2414_v40 = vmul.f32 0.0, %v1164_v28  ;;  %v2417_v32 = vmul.f32 0.0, %v2397_v22 }
 0x2cc   : > { %v897_v56 = vadd.f32 %v892_v17, %v879_v30  ;;  %v904_v31 = vrot.slane %v896_v53, 3  ;;  %v1095_v43 = vrot.slane %v1726_v1, %v2155_v60  ;;  %v1105_v30 = vrot.slane %v1726_v1, %v2119_v47 }
 0x2cd   : > { %v2422_v34 = vmul.f32 0.0, %v2400_v2  ;;  %v2425_v53 = vrot.slane %v1725_v18, %v2125_v50  ;;  %v2428_v17 = vrot.slane %v1725_v18, %v2127_v51  ;;  %v2434_v24 = vrot.slane %v1724_v5, %v2114_v45 }
 0x2ce   : > { %v905_v7 = vrot.slane %v897_v56, 3  ;;  %v2431_v56 = vrot.slane %v1724_v5, %v2112_v44  ;;  %v2444_v57 = vrot.slane %v1724_v5, %v2121_v48  ;;  %v1147_v58 = vrot.slane %v1726_v1, %v2127_v51 }
 0x2cf   : > { %v1171_v44 = vrot.slane %v2414_v40, 4  ;;  %v1192_v45 = vrot.slane %v2417_v32, 3  ;;  %v2458_v48 = vrot.slane %v1724_v5, %v2123_v49  ;;  %v2463_v19 = vmul.f32 0.0, %v2425_v53 }
 0x2d0   : > { %v906_v26 = vsel %vm702_vm6, %v904_v31, %v905_v7  ;;  %v908_v8 = vsel %vm702_vm6, %v905_v7, %v907_v62  ;;  %v1126_v31 = vrot.slane %v1726_v1, %v2125_v50  ;;  %v2438_v7 = vrot.slane %v1725_v18, %v2155_v60 }
 0x2d1   : > { %v2329_v63 = vadd.f32 %v906_v26, %v899_v39  ;;  %v2331_v9 = vadd.f32 %v908_v8, %v900_v13  ;;  %v2441_v62 = vmul.f32 0.0, %v2409_v27  ;;  %v1234_v13 = vrot.slane %v2412_v15, 1 }
 0x2d2   : > { %v1213_v8 = vrot.slane %v2422_v34, 2 }
 0x2d3   : > { %v937_v12 = vpack.c.bf16 %v2331_v9, %v2329_v63 }
 0x2d5   : > { %1836 = vmatmul.mubr.msk.bf16.vlgmr.msra.gmra.mrb[4].mxu1 %vm376_vm1, %v937_v12  ;;  %v2455_v12 = vmul.f32 0.0, %v2438_v7 }
 0x2d6   : > { %1502 = vmatpush1.bf16.msra.mxu1 %v1895_v6  ;;  %1533 = vmatprep.mubr.bf16.mxu1 %v1945_v42 }
 0x2d7   : > { %1503 = vmatprep.subr.bf16.mxu1 %v1901_v55 }
 0x2da   : > { %1504 = vmatpush1.bf16.msra.mxu1 %v1899_v10 }
 0x2db   : > { %1505 = vmatprep.subr.bf16.mxu1 %v1905_v4 }
 0x2de   : > { %1506 = vmatpush1.bf16.msra.mxu1 %v1903_v29 }
 0x2df   : > { %1507 = vmatprep.subr.bf16.mxu1 %v1909_v46 }
 0x2e2   : > { %1508 = vmatpush1.bf16.msra.mxu1 %v1907_v33 }
 0x3a8   : > { %v1005_v59 = vpop.f32.mrb[4].mxu1 }
 0x3a9   : > { %v1006_v20 = vadd.f32 %v1727_v25, %v1005_v59  ;;  %v1837_v14 = vpop.f32.mrb[5].mxu1  ;;  %v2472_v59 = vmul.f32 0.0, %v2434_v24 }
 0x3aa   : > { %v1008_v23 = vpop.f32.mrb[6].mxu1  ;;  %v1265_v14 = vrot.slane %v2441_v62, 7 }
 0x3ab   : > { %v1009_v3 = vadd.f32 %v1727_v25, %v1008_v23  ;;  %v1838_v36 = vpop.f32.mrb[7].mxu1  ;;  %v1012_v54 = vmax.f32 %v1006_v20, 0.0  ;;  %v2469_v25 = vmul.f32 0.0, %v2431_v56  ;;  %v2480_v23 = vmul.f32 0.0, %v2444_v57 }
 0x3ad   : > { %v1013_v35 = vmax.f32 %v1009_v3, 0.0 }
 0x3af   : > { %v1014_v37 = vpack.c.bf16 %v1013_v35, %v1012_v54 }
 0x3b1   : > { %1848 = vmatmul.mubr.msk.bf16.vlgmr.msra.gmra.mrb[8].mxu0 %vm376_vm1, %v1014_v37 }
 0x3b2   : > { %1859 = vmatprep.mubr.msk.bf16.mxu0 %vm1944_vm0, %v2612_v11  ;;  %1852 = vmatpush3.bf16.msra.mxu0 %v1898_v38 }
 0x3b3   : > { %1853 = vmatprep.subr.bf16.mxu0 %v2612_v11 }
 0x3b6   : > { %1854 = vmatpush3.bf16.msra.mxu0 %v1902_v41 }
 0x3b7   : > { %1855 = vmatprep.subr.bf16.mxu0 %v2612_v11 }
 0x3ba   : > { %1856 = vmatpush3.bf16.msra.mxu0 %v1906_v0 }
 0x3bb   : > { %1857 = vmatprep.subr.bf16.mxu0 %v2612_v11  ;;  %v2466_v11 = vmul.f32 0.0, %v2428_v17 }
 0x3be   : > { %1858 = vmatpush3.bf16.msra.mxu0 %v1910_v52 }
 0x484   : > { %v2446_v39 = vpop.f32.mrb[8].mxu0 }
 0x485   : > { %v1085_v26 = vrot.slane %v2446_v39, 5  ;;  %v1849_v60 = vpop.f32.mrb[9].mxu0 }
 0x486   : > { %v2460_v16 = vpop.f32.mrb[10].mxu0 }
 0x487   : > { %v2475_v20 = vsel %vm591_vm2, 0.0, %v1085_v26  ;;  %v1086_v49 = vrot.slane %v2460_v16, 5  ;;  %v1850_v3 = vpop.f32.mrb[11].mxu0 }
 0x488   : > { %v1096_v36 = vmul.f32 %v1095_v43, %v2475_v20  ;;  %v1106_v54 = vmul.f32 %v1105_v30, %v2475_v20  ;;  %v1127_v35 = vmul.f32 %v1126_v31, %v2475_v20  ;;  %v1148_v37 = vmul.f32 %v1147_v58, %v2475_v20 }
 0x489   : > { %v2487_v6 = vsel %vm591_vm2, %v1085_v26, %v1086_v49  ;;  %v1098_v21 = vmul.f32 %v1095_v43, %v1086_v49  ;;  %v1108_v38 = vmul.f32 %v1105_v30, %v1086_v49  ;;  %v1129_v55 = vmul.f32 %v1126_v31, %v1086_v49 }
 0x48a   : > { %v1097_v41 = vmul.f32 %v1095_v43, %v2487_v6  ;;  %v1107_v10 = vmul.f32 %v1105_v30, %v2487_v6  ;;  %v1112_v4 = vrot.slane %v1106_v54, 7  ;;  %v1128_v42 = vmul.f32 %v1126_v31, %v2487_v6 }
 0x48b   : > { %v1115_v0 = vrot.slane %v1108_v38, 7  ;;  %v1133_v29 = vrot.slane %v1127_v35, 6  ;;  %v1136_v46 = vrot.slane %v1129_v55, 6  ;;  %v1149_v52 = vmul.f32 %v1147_v58, %v2487_v6 }
 0x48c   : > { %v1113_v33 = vrot.slane %v1107_v10, 7  ;;  %v1120_v18 = vadd.f32 %v1112_v4, %v1096_v36  ;;  %v1134_v1 = vrot.slane %v1128_v42, 6  ;;  %v1152_v5 = vrot.slane %v1148_v37, 5 }
 0x48d   : > { %v1153_v40 = vrot.slane %v1149_v52, 5  ;;  %v1166_v32 = vmul.f32 %v1164_v28, %v2475_v20  ;;  %v1167_v26 = vmul.f32 %v1164_v28, %v2487_v6  ;;  %v1187_v43 = vmul.f32 %v2397_v22, %v2475_v20 }
 0x48e   : > { %v1114_v30 = vsel %vm619_vm3, %v1112_v4, %v1113_v33  ;;  %v1116_v31 = vsel %vm619_vm3, %v1113_v33, %v1115_v0  ;;  %v1135_v60 = vsel %vm641_vm4, %v1133_v29, %v1134_v1  ;;  %v1137_v58 = vsel %vm641_vm4, %v1134_v1, %v1136_v46 }
 0x48f   : > { %v1121_v49 = vadd.f32 %v1114_v30, %v1097_v41  ;;  %v1122_v3 = vadd.f32 %v1116_v31, %v1098_v21  ;;  %v1141_v36 = vadd.f32 %v1133_v29, %v1120_v18  ;;  %v1154_v54 = vsel %vm591_vm2, %v1152_v5, %v1153_v40 }
 0x490   : > { %v1172_v35 = vrot.slane %v1166_v32, 4  ;;  %v1174_v37 = vrot.slane %v1167_v26, 4  ;;  %v1188_v28 = vmul.f32 %v2397_v22, %v2487_v6  ;;  %v1193_v38 = vrot.slane %v1187_v43, 3 }
 0x491   : > { %v1142_v55 = vadd.f32 %v1135_v60, %v1121_v49  ;;  %v1143_v10 = vadd.f32 %v1137_v58, %v1122_v3  ;;  %v1158_v4 = vadd.f32 %v1152_v5, %v1141_v36  ;;  %v1208_v42 = vmul.f32 %v2400_v2, %v2475_v20 }
 0x492   : > { %v1173_v0 = vsel %vm680_vm5, %v1171_v44, %v1172_v35  ;;  %v1175_v41 = vsel %vm680_vm5, %v1172_v35, %v1174_v37  ;;  %v1194_v21 = vsel %vm702_vm6, %v1192_v45, %v1193_v38  ;;  %v1195_v29 = vrot.slane %v1188_v28, 3 }
 0x493   : > { %v1159_v46 = vadd.f32 %v1154_v54, %v1142_v55  ;;  %v1160_v52 = vadd.f32 %v1153_v40, %v1143_v10  ;;  %v1179_v33 = vadd.f32 %v1173_v0, %v1158_v4  ;;  %v1209_v22 = vmul.f32 %v2400_v2, %v2487_v6 }
 0x494   : > { %v1196_v18 = vsel %vm702_vm6, %v1193_v38, %v1195_v29  ;;  %v1214_v1 = vrot.slane %v1208_v42, 2  ;;  %v1229_v5 = vmul.f32 %v2393_v61, %v2475_v20  ;;  %v1230_v44 = vmul.f32 %v2393_v61, %v2487_v6 }
 0x495   : > { %v1180_v32 = vadd.f32 %v1175_v41, %v1159_v46  ;;  %v1181_v26 = vadd.f32 %v1174_v37, %v1160_v52  ;;  %v1200_v43 = vadd.f32 %v1194_v21, %v1179_v33  ;;  %v1216_v45 = vrot.slane %v1209_v22, 2 }
 0x496   : > { %v1215_v40 = vsel %vm724_vm7, %v1213_v8, %v1214_v1  ;;  %v1235_v30 = vrot.slane %v1229_v5, 1  ;;  %v1237_v31 = vrot.slane %v1230_v44, 1  ;;  %v1250_v2 = vmul.f32 %v2438_v7, %v2475_v20 }
 0x497   : > { %v1201_v60 = vadd.f32 %v1196_v18, %v1180_v32  ;;  %v1202_v58 = vadd.f32 %v1195_v29, %v1181_v26  ;;  %v1217_v49 = vsel %vm724_vm7, %v1214_v1, %v1216_v45  ;;  %v1221_v3 = vadd.f32 %v1215_v40, %v1200_v43 }
 0x498   : > { %v1236_v61 = vsel %vm746_vm8, %v1234_v13, %v1235_v30  ;;  %v1238_v36 = vsel %vm746_vm8, %v1235_v30, %v1237_v31  ;;  %v1251_v34 = vmul.f32 %v2438_v7, %v2487_v6  ;;  %v1260_v8 = vmul.f32 %v2409_v27, %v2475_v20 }
 0x499   : > { %v1222_v54 = vadd.f32 %v1217_v49, %v1201_v60  ;;  %v1223_v35 = vadd.f32 %v1216_v45, %v1202_v58  ;;  %v1242_v37 = vadd.f32 %v1236_v61, %v1221_v3  ;;  %v1261_v28 = vmul.f32 %v2409_v27, %v2487_v6 }
 0x49a   : > { %v1266_v38 = vrot.slane %v1260_v8, 7  ;;  %v1281_v15 = vmul.f32 %v2425_v53, %v2475_v20  ;;  %v1282_v13 = vmul.f32 %v2425_v53, %v2487_v6  ;;  %v1302_v55 = vmul.f32 %v2428_v17, %v2475_v20 }
 0x49b   : > { %v1243_v7 = vadd.f32 %v1238_v36, %v1222_v54  ;;  %v1244_v10 = vadd.f32 %v1237_v31, %v1223_v35  ;;  %v1252_v4 = vadd.f32 %v2455_v12, %v1242_v37  ;;  %v1268_v42 = vrot.slane %v1261_v28, 7 }
 0x49c   : > { %v1286_v0 = vrot.slane %v2463_v19, 6  ;;  %v1287_v41 = vrot.slane %v1281_v15, 6  ;;  %v1289_v21 = vrot.slane %v1282_v13, 6  ;;  %v1305_v27 = vrot.slane %v2466_v11, 5 }
 0x49d   : > { %v1253_v29 = vadd.f32 %v1250_v2, %v1243_v7  ;;  %v1254_v46 = vadd.f32 %v1251_v34, %v1244_v10  ;;  %v1269_v52 = vsel %vm619_vm3, %v1266_v38, %v1268_v42  ;;  %v1273_v53 = vadd.f32 %v1265_v14, %v1252_v4 }
 0x49e   : > { %v1267_v17 = vsel %vm619_vm3, %v1265_v14, %v1266_v38  ;;  %v1290_v12 = vsel %vm641_vm4, %v1287_v41, %v1289_v21  ;;  %v1306_v6 = vrot.slane %v1302_v55, 5  ;;  %v1319_v19 = vmul.f32 %v2431_v56, %v2475_v20 }
 0x49f   : > { %v1274_v33 = vadd.f32 %v1267_v17, %v1253_v29  ;;  %v1275_v22 = vadd.f32 %v1269_v52, %v1254_v46  ;;  %v1294_v11 = vadd.f32 %v1286_v0, %v1273_v53  ;;  %v1337_v18 = vmul.f32 %v2434_v24, %v2475_v20 }
 0x4a0   : > { %v1288_v1 = vsel %vm641_vm4, %v1286_v0, %v1287_v41  ;;  %v1322_v5 = vrot.slane %v2469_v25, 4  ;;  %v1324_v44 = vrot.slane %v1319_v19, 4  ;;  %v1355_v62 = vmul.f32 %v2444_v57, %v2475_v20 }
 0x4a1   : > { %v1295_v14 = vadd.f32 %v1288_v1, %v1274_v33  ;;  %v1296_v32 = vadd.f32 %v1290_v12, %v1275_v22  ;;  %v1311_v26 = vadd.f32 %v1305_v27, %v1294_v11  ;;  %v1372_v43 = vmul.f32 0.0, %v2458_v48 }
 0x4a2   : > { %v1307_v56 = vsel %vm591_vm2, %v1305_v27, %v1306_v6  ;;  %v1340_v45 = vrot.slane %v2472_v59, 3  ;;  %v1342_v40 = vrot.slane %v1337_v18, 3  ;;  %v1373_v24 = vmul.f32 %v2458_v48, %v2475_v20  ;;  %v1417_v27 = vld [vmem:[%s2595_s8] sm:$0x7] }
 0x4a3   : > { %v1312_v30 = vadd.f32 %v1307_v56, %v1295_v14  ;;  %v1313_v31 = vadd.f32 %v1306_v6, %v1296_v32  ;;  %v1329_v25 = vadd.f32 %v1322_v5, %v1311_v26  ;;  %v1325_v2 = vsel %vm680_vm5, %v1322_v5, %v1324_v44 }
 0x4a4   : > { %v1358_v57 = vrot.slane %v2480_v23, 2  ;;  %v1360_v60 = vrot.slane %v1355_v62, 2  ;;  %v1343_v61 = vsel %vm702_vm6, %v1340_v45, %v1342_v40  ;;  %v1376_v36 = vrot.slane %v1372_v43, 1 }
 0x4a5   : > { %v1330_v58 = vadd.f32 %v1325_v2, %v1312_v30  ;;  %v1331_v49 = vadd.f32 %v1324_v44, %v1313_v31  ;;  %v1347_v3 = vadd.f32 %v1340_v45, %v1329_v25  ;;  %v1378_v34 = vrot.slane %v1373_v24, 1 }
 0x4a6   : > { %v1361_v48 = vsel %vm724_vm7, %v1358_v57, %v1360_v60  ;;  %v1386_v7 = vadd.f32 %v2446_v39, %v2329_v63  ;;  %v1387_v10 = vadd.f32 %v2460_v16, %v2331_v9  ;;  %v1422_v63 = vrot.slane %v1417_v27, %v2127_v51 }
 0x4a7   : > { %v1348_v59 = vadd.f32 %v1343_v61, %v1330_v58  ;;  %v1349_v8 = vadd.f32 %v1342_v40, %v1331_v49  ;;  %v1365_v54 = vadd.f32 %v1358_v57, %v1347_v3  ;;  %v1379_v28 = vsel %vm746_vm8, %v1376_v36, %v1378_v34 }
 0x4a8   : > { %v1430_v39 = vrot.slane %v1417_v27, %v2119_v47  ;;  %v1426_v9 = vrot.slane %v1417_v27, %v2125_v50 }
 0x4a9   : > { %v1366_v20 = vadd.f32 %v1361_v48, %v1348_v59  ;;  %v1367_v35 = vadd.f32 %v1360_v60, %v1349_v8  ;;  %v1383_v37 = vadd.f32 %v1376_v36, %v1365_v54 }
 0x4ab   : > { %v1384_v38 = vadd.f32 %v1379_v28, %v1366_v20  ;;  %v1385_v23 = vadd.f32 %v1378_v34, %v1367_v35  ;;  %v1391_v15 = vrot.slane %v1383_v37, 3 }
 0x4ad   : > { %v1392_v13 = vrot.slane %v1384_v38, 3  ;;  %v1394_v55 = vrot.slane %v1385_v23, 3 }
 0x4af   : > { %v1393_v4 = vsel %vm702_vm6, %v1391_v15, %v1392_v13  ;;  %v1395_v42 = vsel %vm702_vm6, %v1392_v13, %v1394_v55 }
 0x4b0   : > { %v1398_v0 = vadd.f32 %v1393_v4, %v1386_v7  ;;  %v1399_v41 = vadd.f32 %v1395_v42, %v1387_v10 }
 0x4b2   : > { %v1400_v21 = vpack.c.bf16 %v1399_v41, %v1398_v0 }
 0x4b4   : > { %1750 = vmatmul.mubr.msk.bf16.vlgmr.msra.gmra.mrb[8].mxu1 %vm376_vm1, %v1400_v21  ;;  %1860 = vmatmul.mubr.msk.bf16.vlgmr.msra.gmra.mrb[12].mxu0 %vm376_vm1, %v1400_v21 }
 0x587   : > { %v1535_v16 = vpop.f32.mrb[8].mxu1  ;;  %v1578_v29 = vpop.f32.mrb[12].mxu0 }
 0x588   : > { %v1536_v46 = vadd.f32 %v1535_v16, %v1422_v63  ;;  %v1579_v52 = vadd.f32 %v1578_v29, %v1430_v39  ;;  %v1537_v53 = vpop.f32.mrb[9].mxu1  ;;  %v1861_v17 = vpop.f32.mrb[13].mxu0 }
 0x589   : > { %v1538_v12 = vadd.f32 %v1537_v53, %v1426_v9  ;;  %v1539_v6 = vpop.f32.mrb[10].mxu1  ;;  %v1581_v19 = vpop.f32.mrb[14].mxu0 }
 0x58a   : > { %v1752_v33 = vmul.f32 -1.442695, %v1536_v46  ;;  %v1754_v22 = vmul.f32 -1.442695, %v1579_v52  ;;  %v1540_v11 = vadd.f32 %v1539_v6, %v1422_v63  ;;  %v1582_v18 = vadd.f32 %v1581_v19, %v1430_v39  ;;  %v1541_v1 = vpop.f32.mrb[11].mxu1  ;;  %v1862_v5 = vpop.f32.mrb[15].mxu0 }
 0x58b   : > { %v1753_v51 = vmul.f32 -1.442695, %v1538_v12  ;;  %v1542_v44 = vadd.f32 %v1541_v1, %v1426_v9 }
 0x58c   : > { %1911 = vpow2.f32 %v1752_v33  ;;  %v1755_v47 = vmul.f32 -1.442695, %v1540_v11  ;;  %v1757_v50 = vmul.f32 -1.442695, %v1582_v18 }
 0x58d   : > { %1913 = vpow2.f32 %v1754_v22  ;;  %v1756_v62 = vmul.f32 -1.442695, %v1542_v44 }
 0x58e   : > { %1915 = vpow2.f32 %v1753_v51 }
 0x58f   : > { %1917 = vpow2.f32 %v1755_v47 }
 0x590   : > { %1919 = vpow2.f32 %v1757_v50 }
 0x591   : > { %1921 = vpow2.f32 %v1756_v62 }
 0x596   : > { %v1912_v14 = vpop.eup %1911 }
 0x597   : > { %v1914_v32 = vpop.eup %1913  ;;  %v1603_v26 = vadd.f32 1.0, %v1912_v14 }
 0x598   : > { %v1916_v43 = vpop.eup %1915  ;;  %v1605_v56 = vadd.f32 1.0, %v1914_v32 }
 0x599   : > { %v1918_v45 = vpop.eup %1917  ;;  %1923 = vrcp.f32 %v1603_v26  ;;  %v1604_v40 = vadd.f32 1.0, %v1916_v43 }
 0x59a   : > { %v1920_v24 = vpop.eup %1919  ;;  %1925 = vrcp.f32 %v1605_v56  ;;  %v1606_v30 = vadd.f32 1.0, %v1918_v45 }
 0x59b   : > { %v1922_v31 = vpop.eup %1921  ;;  %1927 = vrcp.f32 %v1604_v40  ;;  %v1608_v25 = vadd.f32 1.0, %v1920_v24 }
 0x59c   : > { %1929 = vrcp.f32 %v1606_v30  ;;  %v1607_v2 = vadd.f32 1.0, %v1922_v31 }
 0x59d   : > { %1931 = vrcp.f32 %v1608_v25 }
 0x59e   : > { %1933 = vrcp.f32 %v1607_v2 }
 0x5a3   : > { %v1924_v57 = vpop.eup %1923 }
 0x5a4   : > { %v1926_v60 = vpop.eup %1925  ;;  %1621 = vst [vmem:[%s332_s26] sm:$0xff] %v1924_v57 }
 0x5a5   : > { %v1928_v58 = vpop.eup %1927  ;;  %1623 = vst [vmem:[%s332_s26 + $0x10] sm:$0xff] %v1926_v60 }
 0x5a6   : > { %v1930_v49 = vpop.eup %1929  ;;  %1622 = vst [vmem:[%s332_s26 + $0x8] sm:$0xff] %v1928_v58 }
 0x5a7   : > { %v1932_v3 = vpop.eup %1931  ;;  %1624 = vst [vmem:[%s332_s26 + $0x18] sm:$0xff] %v1930_v49 }
 0x5a8   : > { %v1934_v61 = vpop.eup %1933  ;;  %1626 = vst [vmem:[%s332_s26 + $0x28] sm:$0xff] %v1932_v3 }
 0x5a9   : > { %1625 = vst [vmem:[%s332_s26 + $0x20] sm:$0xff] %v1934_v61 }
 0x5aa PF: > { %s19_s30 = sadd.s32 1, %s1941_s30  }
 0x5ab   : > { %p16_p4 = scmp.ge.s32.totalorder %s19_s30, 4  }
 0x5ad   :  { %18 = sbr.rel (!%p16_p4) target bundleno = 1 (0x1), region = 90 }

</bundles_post_ra>
